<compile_context>
chip_gen: v6e
topology: v6e:2x2x1
jax: 0.10.0
libtpu: 0.0.40
codegen_flags: <defaults>
</compile_context>

<pallas_src>
import numpy as np
import jax
import jax.numpy as jnp
from jax.experimental import pallas as pl
from jax.experimental.pallas import tpu as pltpu

EMB1 = 1
EMB2 = 16
SINGLE = 3                    # ['userId', 'movieId', 'year']
MULTI = 4                     # {'user_genre','urb','movie_genre','movie_tag'}
L = 8                         # max ids per multi-value feature
NN_SIZE = [64, 32, 1]
EPS = 1e-5                    # torch BatchNorm1d default eps

ML = MULTI * L                # 32  rows of m1 / atten / mask  (row = f*L + l)
MD = MULTI * L * EMB2         # 512 rows of m2 (row = f*128 + e*8 + l : feature, emb, slot)
K2 = MULTI * EMB2             # 64  pooled deep features (col = f*16 + e)
D_S2 = SINGLE * EMB2          # 48
D_IN = D_S2 + K2              # 112 deep MLP input width


def wdl_kernel(s1_ref, s2_ref, m1_ref, m2_ref, at_ref, valid_ref,
               wd_ref, w1s_ref, w2_ref, par_ref, out_ref):
    # ---- packed small parameters (one column per parameter vector) ----------
    b1p  = par_ref[0:NN_SIZE[0], 0:1]                 # [64,1] b1 + folded BN2 shift
    b2   = par_ref[0:NN_SIZE[1], 1:2]                 # [32,1]
    w3c  = par_ref[0:NN_SIZE[1], 2:3]                 # [32,1] layer3 weight
    vwid = par_ref[0:ML, 3:4]                         # [32,1] wo_m * bn1_scale (per slot)
    wo_s = par_ref[0:SINGLE, 4:5]                     # [3,1]
    wo_n = par_ref[SINGLE:SINGLE + 1, 4:5]            # [1,1]
    bo_p = par_ref[SINGLE + 1:SINGLE + 2, 4:5]        # [1,1] bo + folded BN1 shift
    b3   = par_ref[SINGLE + 2:SINGLE + 3, 4:5]        # [1,1]

    valid = valid_ref[...]                            # [32,TB] f32 0/1 (precomputed mask)
    at_m = at_ref[...] * valid                        # masked attention logits (masked -> 0)

    # ---- per-feature masked softmax over the 8 slots (sublane reductions) ---
    # Matches the reference: masked slots carry logit 0 and stay in the
    # denominator; per-feature max keeps exp() stable for arbitrary logits.
    aw_parts = []
    for f in range(MULTI):
        a_f = at_m[f * L:(f + 1) * L, :]                        # [8,TB]
        mx = jnp.max(a_f, axis=0, keepdims=True)                # [1,TB]
        e_f = jnp.exp(a_f - mx)
        d_f = jnp.sum(e_f, axis=0, keepdims=True)               # [1,TB]
        aw_parts.append(e_f / d_f)
    aw = jnp.concatenate(aw_parts, axis=0) * valid              # [32,TB], 0 at masked slots

    # ---- wide side (BN1 + wide multi weights folded into vwid / bo_p) -------
    wide = (jnp.sum(s1_ref[...] * wo_s, axis=0, keepdims=True)
            + jnp.sum(m1_ref[...] * aw * vwid, axis=0, keepdims=True))      # [1,TB]

    # ---- deep side: expand softmax weights to the 512 (f,e,l) rows with ----
    # ---- plain sublane copies (no MXU, no f32 m2 slab) ----------------------
    aw_wide = jnp.concatenate(
        [jnp.concatenate([aw[f * L:(f + 1) * L, :]] * EMB2, axis=0)
         for f in range(MULTI)], axis=0)                        # [512,TB] f32
    weighted2 = (m2_ref[...] * aw_wide).astype(jnp.bfloat16)    # bf16 MXU feed

    # ---- deep MLP: (w1_single @ s2) + (W_deep @ weighted2) -> 64 -> 32 -> 1 -
    h = jnp.dot(w1s_ref[...], s2_ref[...], preferred_element_type=jnp.float32)
    h = h + jnp.dot(wd_ref[...], weighted2, preferred_element_type=jnp.float32)
    h = jnp.maximum(h + b1p, 0.0)                               # [64,TB]
    h = jnp.maximum(jnp.dot(w2_ref[...], h.astype(jnp.bfloat16),
                            preferred_element_type=jnp.float32) + b2, 0.0)  # [32,TB]
    h = jnp.maximum(jnp.sum(h * w3c, axis=0, keepdims=True) + b3, 0.0)      # [1,TB]

    # ---- wide & deep head ----------------------------------------------------
    logit = wide + wo_n * h + bo_p
    out_ref[...] = jax.nn.sigmoid(logit)


def wdl_forward(s1T, s2T, m1T, m2T, atT, validT, p, *, tb=512):
    """All per-sample inputs are lane-dense (batch on the last axis):
         s1T   [3,   B] f32    single emb1
         s2T   [48,  B] bf16   single emb2, rows s*16+e
         m1T   [32,  B] f32    multi emb1, rows f*8+l
         m2T   [512, B] bf16   multi emb2, rows f*128+e*8+l  (feature, emb, slot)
         atT   [32,  B] f32    attention logits, rows f*8+l
         validT[32,  B] f32    0/1 slot validity mask (l < count[f])
       tb: batch tile. 512 default; v5e/v6e (single TC, 128 MiB VMEM) can use
       1024-2048; on v7x keep B/tb a multiple of 2 so both cores stay busy."""
    B = s1T.shape[1]
    assert s2T.shape == (D_S2, B) and m2T.shape == (MD, B)
    assert m1T.shape == (ML, B) and atT.shape == (ML, B) and validT.shape == (ML, B)
    assert B % tb == 0 and tb % 128 == 0
    nb = B // tb

    # ---- host-side folds: eval-mode BN + first linear layers into weights ---
    w1 = p["w1"]                                         # [112, 64]  (in, out)
    w1s = w1[:D_S2, :].T.astype(jnp.bfloat16)            # [64, 48]   single part
    w1d = w1[D_S2:, :].T                                 # [64, 64]   cols k = f*16+e
    g2, be2, mu2, va2 = [p["bn2"][i].reshape(-1) for i in range(4)]
    sc2 = g2 / jnp.sqrt(va2 + EPS)
    sh2 = be2 - sc2 * mu2
    wd = jnp.repeat(w1d * sc2[None, :], L, axis=1).astype(jnp.bfloat16)   # [64, 512]
    b1p = p["b1"].reshape(-1) + w1d @ sh2                                  # [64]

    g1, be1, mu1, va1 = p["bn1"]
    sc1 = g1 / jnp.sqrt(va1 + EPS)
    sh1 = be1 - sc1 * mu1
    wo = p["wo"].reshape(-1)                              # [8] = [wo_s(3), wo_m(4), wo_n]
    vwid = jnp.repeat(wo[SINGLE:SINGLE + MULTI] * sc1, L)                  # [32]
    bo_p = p["bo"].reshape(()) + jnp.dot(wo[SINGLE:SINGLE + MULTI], sh1)

    w2T = p["w2"].T.astype(jnp.bfloat16)                  # [32, 64]

    # ---- one packed [128,16] block for every tiny parameter vector ----------
    par = jnp.zeros((128, 16), jnp.float32)
    par = par.at[0:NN_SIZE[0], 0].set(b1p)
    par = par.at[0:NN_SIZE[1], 1].set(p["b2"].reshape(-1))
    par = par.at[0:NN_SIZE[1], 2].set(p["w3"].reshape(-1))
    par = par.at[0:ML, 3].set(vwid)
    par = par.at[0:SINGLE, 4].set(wo[:SINGLE])
    par = par.at[SINGLE, 4].set(wo[SINGLE + MULTI])
    par = par.at[SINGLE + 1, 4].set(bo_p)
    par = par.at[SINGLE + 2, 4].set(p["b3"][0, 0])

    in_specs = [
        pl.BlockSpec((SINGLE, tb), lambda i: (0, i)),            # s1T
        pl.BlockSpec((D_S2, tb), lambda i: (0, i)),              # s2T (bf16)
        pl.BlockSpec((ML, tb), lambda i: (0, i)),                # m1T
        pl.BlockSpec((MD, tb), lambda i: (0, i)),                # m2T (bf16)
        pl.BlockSpec((ML, tb), lambda i: (0, i)),                # attention logits
        pl.BlockSpec((ML, tb), lambda i: (0, i)),                # validity mask
        pl.BlockSpec((NN_SIZE[0], MD), lambda i: (0, 0)),        # wd  (bf16, folded)
        pl.BlockSpec((NN_SIZE[0], D_S2), lambda i: (0, 0)),      # w1 single part (bf16)
        pl.BlockSpec((NN_SIZE[1], NN_SIZE[0]), lambda i: (0, 0)),  # w2 (bf16)
        pl.BlockSpec((128, 16), lambda i: (0, 0)),               # packed small params
    ]
    out = pl.pallas_call(
        wdl_kernel,
        out_shape=jax.ShapeDtypeStruct((1, B), jnp.float32),     # lane-dense output
        grid=(nb,),
        in_specs=in_specs,
        out_specs=pl.BlockSpec((1, tb), lambda i: (0, i)),
        compiler_params=pltpu.CompilerParams(
            dimension_semantics=("parallel",),
            vmem_limit_bytes=32 * 1024 * 1024),
    )(s1T, s2T, m1T, m2T, atT, validT, wd, w1s, w2T, par)
    return out.reshape(-1)                                       # .view([-1])


def reference(s1T, s2T, m1T, m2T, atT, counts, p):
    """Pure-JAX replica of WDLModel.forward (eval-mode BN) on the same data."""
    B = s1T.shape[1]
    s_emb1 = s1T.T                                                         # [B,3]
    s_emb2 = s2T.astype(jnp.float32).T                                     # [B,48]
    m_emb1 = m1T.reshape(MULTI, L, B).transpose(2, 0, 1)                   # [B,4,8]
    m_emb2 = m2T.astype(jnp.float32).reshape(MULTI, EMB2, L, B).transpose(3, 0, 2, 1)
    atten = atT.reshape(MULTI, L, B).transpose(2, 0, 1)                    # [B,4,8]
    pos = jnp.arange(L, dtype=jnp.int32)[None, None, :]
    valid = counts[:, :, None] > pos
    at_m = jnp.where(valid, atten, 0.0)
    at_w = jax.nn.softmax(at_m, axis=2)
    pooled1 = jnp.sum(jnp.where(valid, m_emb1, 0.0) * at_w, axis=2)
    pooled2 = jnp.sum(jnp.where(valid[..., None], m_emb2, 0.0) * at_w[..., None], axis=2)
    bn1, bn2 = p["bn1"], p["bn2"]
    multi1 = (pooled1 - bn1[2]) / jnp.sqrt(bn1[3] + EPS) * bn1[0] + bn1[1]
    multi2 = (pooled2 - bn2[2]) / jnp.sqrt(bn2[3] + EPS) * bn2[0] + bn2[1]
    with jax.default_matmul_precision("float32"):
        fea2 = jnp.concatenate([s_emb2, multi2.reshape(B, -1)], axis=1)
        h = jax.nn.relu(fea2 @ p["w1"] + p["b1"])
        h = jax.nn.relu(h @ p["w2"] + p["b2"])
        h = jax.nn.relu(h @ p["w3"].T + p["b3"])
        out_fea = jnp.concatenate([s_emb1, multi1, h], axis=1)
        return jax.nn.sigmoid(out_fea @ p["wo"].T + p["bo"]).reshape(-1)


if __name__ == "__main__":
    key = jax.random.PRNGKey(0)
    B, TB = 1024, 512          # nb = 2 -> both TensorCores busy on v7x

    # vocab sizes scaled down from the module's fea_size (only the gather index
    # range differs; forward semantics are identical).
    fea_size = {"userId": 1390, "movieId": 1320, "tagId": 410, "genreId": 30, "year": 150}
    single_name = ["userId", "movieId", "year"]
    multi_tables = ["genreId", "movieId", "genreId", "tagId"]

    keys = iter(jax.random.split(key, 64))

    def nrm(shape, scale=0.1):
        return scale * jax.random.normal(next(keys), shape, jnp.float32)

    emb1_tab = {n: nrm((v,)) for n, v in fea_size.items()}            # emb_size1 = 1
    # emb2 tables stored PRE-TRANSPOSED ([16, V]) and in bf16 so the gathers
    # below produce the kernel's lane-dense slabs directly (no HBM transpose).
    emb2T_tab = {n: nrm((EMB2, v)).astype(jnp.bfloat16) for n, v in fea_size.items()}
    # init_param(): attention embeddings ~ N(1.0, 1e-6)
    atten_tab = {n: 1.0 + 1e-6 * jax.random.normal(next(keys), (fea_size[n],), jnp.float32)
                 for n in ["movieId", "tagId", "genreId"]}

    single_fea = [jax.random.randint(next(keys), (B,), 0, fea_size[n]) for n in single_name]
    multi_fea = [jax.random.randint(next(keys), (B, L), 0, fea_size[t]) for t in multi_tables]
    counts = jax.random.randint(next(keys), (B, MULTI), 1, L + 1).astype(jnp.int32)

    # embedding gathers straight into the kernel layout (glue, plain JAX)
    s1T = jnp.stack([emb1_tab[n][single_fea[i]] for i, n in enumerate(single_name)], axis=0)
    s2T = jnp.concatenate([emb2T_tab[n][:, single_fea[i]]
                           for i, n in enumerate(single_name)], axis=0)           # [48,B]
    m1T = jnp.concatenate([emb1_tab[t][multi_fea[k].T]
                           for k, t in enumerate(multi_tables)], axis=0)          # [32,B]
    m2T = jnp.concatenate([emb2T_tab[t][:, multi_fea[k].T].reshape(EMB2 * L, B)
                           for k, t in enumerate(multi_tables)], axis=0)          # [512,B]
    atT = jnp.concatenate([atten_tab[t][multi_fea[k].T]
                           for k, t in enumerate(multi_tables)], axis=0)          # [32,B]
    validT = (jnp.arange(L, dtype=jnp.int32)[None, :, None]
              < counts.T[:, None, :]).reshape(ML, B).astype(jnp.float32)          # [32,B]

    # parameters (deterministic synthetic init; BN in eval / running-stats mode)
    params = {
        "bn1": jnp.stack([1.0 + nrm((MULTI,)), nrm((MULTI,)), nrm((MULTI,)),
                          0.5 + jnp.abs(nrm((MULTI,)))], axis=0),                 # [4,4]
        "bn2": jnp.stack([1.0 + nrm((MULTI, EMB2)), nrm((MULTI, EMB2)), nrm((MULTI, EMB2)),
                          0.5 + jnp.abs(nrm((MULTI, EMB2)))], axis=0),            # [4,4,16]
        "w1": nrm((D_IN, NN_SIZE[0])), "b1": nrm((1, NN_SIZE[0])),
        "w2": nrm((NN_SIZE[0], NN_SIZE[1])), "b2": nrm((1, NN_SIZE[1])),
        "w3": nrm((1, NN_SIZE[1])), "b3": nrm((1, 1)),                            # torch [out,in]
        "wo": nrm((1, SINGLE + MULTI + 1)), "bo": nrm((1, 1)),
    }

    out = wdl_forward(s1T, s2T, m1T, m2T, atT, validT, params, tb=TB)
    out = jax.block_until_ready(out)

    ref = reference(s1T, s2T, m1T, m2T, atT, counts, params)
    # Tolerance sized for bf16 MXU operands (the kernel feeds every big dot bf16).
    np.testing.assert_allclose(np.asarray(out), np.asarray(ref), rtol=2e-3, atol=5e-4)
    assert out.shape == (B,)
    print("KERNEL_OK")
</pallas_src>

<mosaic_0001>
module attributes {stable_mosaic.version = 11 : i64} {
  func.func @wdl_kernel(%arg0: i32, %arg1: memref<3x512xf32, #tpu.memory_space<vmem>>, %arg2: memref<48x512xbf16, #tpu.memory_space<vmem>>, %arg3: memref<32x512xf32, #tpu.memory_space<vmem>>, %arg4: memref<512x512xbf16, #tpu.memory_space<vmem>>, %arg5: memref<32x512xf32, #tpu.memory_space<vmem>>, %arg6: memref<32x512xf32, #tpu.memory_space<vmem>>, %arg7: memref<64x512xbf16, #tpu.memory_space<vmem>>, %arg8: memref<64x48xbf16, #tpu.memory_space<vmem>>, %arg9: memref<32x64xbf16, #tpu.memory_space<vmem>>, %arg10: memref<128x16xf32, #tpu.memory_space<vmem>>, %arg11: memref<1x512xf32, #tpu.memory_space<vmem>>) attributes {dimension_semantics = [#tpu.dimension_semantics<parallel>], iteration_bounds = array<i64: 2>, scalar_prefetch = 0 : i64, scratch_operands = 0 : i64, tpu.core_type = #tpu.core_type<tc>, window_params = [{transform_indices = @transform_0, window_bounds = array<i64: 3, 512>}, {transform_indices = @transform_1, window_bounds = array<i64: 48, 512>}, {transform_indices = @transform_2, window_bounds = array<i64: 32, 512>}, {transform_indices = @transform_3, window_bounds = array<i64: 512, 512>}, {transform_indices = @transform_4, window_bounds = array<i64: 32, 512>}, {transform_indices = @transform_5, window_bounds = array<i64: 32, 512>}, {pipeline_mode = #tpu.pipeline_mode<synchronous>, transform_indices = @transform_6, window_bounds = array<i64: 64, 512>}, {pipeline_mode = #tpu.pipeline_mode<synchronous>, transform_indices = @transform_7, window_bounds = array<i64: 64, 48>}, {pipeline_mode = #tpu.pipeline_mode<synchronous>, transform_indices = @transform_8, window_bounds = array<i64: 32, 64>}, {pipeline_mode = #tpu.pipeline_mode<synchronous>, transform_indices = @transform_9, window_bounds = array<i64: 128, 16>}, {transform_indices = @transform_10, window_bounds = array<i64: 1, 512>}]} {
    %c0 = arith.constant 0 : index
    %c0_0 = arith.constant 0 : index
    %0 = vector.load %arg10[%c0, %c0_0] : memref<128x16xf32, #tpu.memory_space<vmem>>, vector<64x1xf32>
    %c0_1 = arith.constant 0 : index
    %c1 = arith.constant 1 : index
    %1 = vector.load %arg10[%c0_1, %c1] : memref<128x16xf32, #tpu.memory_space<vmem>>, vector<32x1xf32>
    %c0_2 = arith.constant 0 : index
    %c2 = arith.constant 2 : index
    %2 = vector.load %arg10[%c0_2, %c2] : memref<128x16xf32, #tpu.memory_space<vmem>>, vector<32x1xf32>
    %c0_3 = arith.constant 0 : index
    %c3 = arith.constant 3 : index
    %3 = vector.load %arg10[%c0_3, %c3] : memref<128x16xf32, #tpu.memory_space<vmem>>, vector<32x1xf32>
    %c0_4 = arith.constant 0 : index
    %c4 = arith.constant 4 : index
    %4 = vector.load %arg10[%c0_4, %c4] : memref<128x16xf32, #tpu.memory_space<vmem>>, vector<3x1xf32>
    %c3_5 = arith.constant 3 : index
    %c4_6 = arith.constant 4 : index
    %5 = vector.load %arg10[%c3_5, %c4_6] : memref<128x16xf32, #tpu.memory_space<vmem>>, vector<1x1xf32>
    %c4_7 = arith.constant 4 : index
    %c4_8 = arith.constant 4 : index
    %6 = vector.load %arg10[%c4_7, %c4_8] : memref<128x16xf32, #tpu.memory_space<vmem>>, vector<1x1xf32>
    %c5 = arith.constant 5 : index
    %c4_9 = arith.constant 4 : index
    %7 = vector.load %arg10[%c5, %c4_9] : memref<128x16xf32, #tpu.memory_space<vmem>>, vector<1x1xf32>
    %c0_10 = arith.constant 0 : index
    %c0_11 = arith.constant 0 : index
    %8 = vector.load %arg6[%c0_10, %c0_11] : memref<32x512xf32, #tpu.memory_space<vmem>>, vector<32x512xf32>
    %c0_12 = arith.constant 0 : index
    %c0_13 = arith.constant 0 : index
    %9 = vector.load %arg5[%c0_12, %c0_13] : memref<32x512xf32, #tpu.memory_space<vmem>>, vector<32x512xf32>
    %10 = arith.mulf %9, %8 : vector<32x512xf32>
    %11 = vector.extract_strided_slice %10 {offsets = [0, 0], sizes = [8, 512], strides = [1, 1]} : vector<32x512xf32> to vector<8x512xf32>
    %cst = arith.constant dense<0xFF800000> : vector<512xf32>
    %12 = vector.multi_reduction <maximumf>, %11, %cst [0] : vector<8x512xf32> to vector<512xf32>
    %13 = vector.shape_cast %12 : vector<512xf32> to vector<1x512xf32>
    %14 = vector.broadcast %13 : vector<1x512xf32> to vector<8x512xf32>
    %15 = arith.subf %11, %14 : vector<8x512xf32>
    %16 = math.exp %15 : vector<8x512xf32>
    %cst_14 = arith.constant dense<0.000000e+00> : vector<512xf32>
    %17 = vector.multi_reduction <add>, %16, %cst_14 [0] : vector<8x512xf32> to vector<512xf32>
    %18 = vector.shape_cast %17 : vector<512xf32> to vector<1x512xf32>
    %19 = vector.broadcast %18 : vector<1x512xf32> to vector<8x512xf32>
    %20 = arith.divf %16, %19 : vector<8x512xf32>
    %21 = vector.extract_strided_slice %10 {offsets = [8, 0], sizes = [8, 512], strides = [1, 1]} : vector<32x512xf32> to vector<8x512xf32>
    %cst_15 = arith.constant dense<0xFF800000> : vector<512xf32>
    %22 = vector.multi_reduction <maximumf>, %21, %cst_15 [0] : vector<8x512xf32> to vector<512xf32>
    %23 = vector.shape_cast %22 : vector<512xf32> to vector<1x512xf32>
    %24 = vector.broadcast %23 : vector<1x512xf32> to vector<8x512xf32>
    %25 = arith.subf %21, %24 : vector<8x512xf32>
    %26 = math.exp %25 : vector<8x512xf32>
    %cst_16 = arith.constant dense<0.000000e+00> : vector<512xf32>
    %27 = vector.multi_reduction <add>, %26, %cst_16 [0] : vector<8x512xf32> to vector<512xf32>
    %28 = vector.shape_cast %27 : vector<512xf32> to vector<1x512xf32>
    %29 = vector.broadcast %28 : vector<1x512xf32> to vector<8x512xf32>
    %30 = arith.divf %26, %29 : vector<8x512xf32>
    %31 = vector.extract_strided_slice %10 {offsets = [16, 0], sizes = [8, 512], strides = [1, 1]} : vector<32x512xf32> to vector<8x512xf32>
    %cst_17 = arith.constant dense<0xFF800000> : vector<512xf32>
    %32 = vector.multi_reduction <maximumf>, %31, %cst_17 [0] : vector<8x512xf32> to vector<512xf32>
    %33 = vector.shape_cast %32 : vector<512xf32> to vector<1x512xf32>
    %34 = vector.broadcast %33 : vector<1x512xf32> to vector<8x512xf32>
    %35 = arith.subf %31, %34 : vector<8x512xf32>
    %36 = math.exp %35 : vector<8x512xf32>
    %cst_18 = arith.constant dense<0.000000e+00> : vector<512xf32>
    %37 = vector.multi_reduction <add>, %36, %cst_18 [0] : vector<8x512xf32> to vector<512xf32>
    %38 = vector.shape_cast %37 : vector<512xf32> to vector<1x512xf32>
    %39 = vector.broadcast %38 : vector<1x512xf32> to vector<8x512xf32>
    %40 = arith.divf %36, %39 : vector<8x512xf32>
    %41 = vector.extract_strided_slice %10 {offsets = [24, 0], sizes = [8, 512], strides = [1, 1]} : vector<32x512xf32> to vector<8x512xf32>
    %cst_19 = arith.constant dense<0xFF800000> : vector<512xf32>
    %42 = vector.multi_reduction <maximumf>, %41, %cst_19 [0] : vector<8x512xf32> to vector<512xf32>
    %43 = vector.shape_cast %42 : vector<512xf32> to vector<1x512xf32>
    %44 = vector.broadcast %43 : vector<1x512xf32> to vector<8x512xf32>
    %45 = arith.subf %41, %44 : vector<8x512xf32>
    %46 = math.exp %45 : vector<8x512xf32>
    %cst_20 = arith.constant dense<0.000000e+00> : vector<512xf32>
    %47 = vector.multi_reduction <add>, %46, %cst_20 [0] : vector<8x512xf32> to vector<512xf32>
    %48 = vector.shape_cast %47 : vector<512xf32> to vector<1x512xf32>
    %49 = vector.broadcast %48 : vector<1x512xf32> to vector<8x512xf32>
    %50 = arith.divf %46, %49 : vector<8x512xf32>
    %51 = tpu.concatenate %20, %30, %40, %50 in 0 : vector<8x512xf32>, vector<8x512xf32>, vector<8x512xf32>, vector<8x512xf32> -> vector<32x512xf32>
    %52 = arith.mulf %51, %8 : vector<32x512xf32>
    %c0_21 = arith.constant 0 : index
    %c0_22 = arith.constant 0 : index
    %53 = vector.load %arg1[%c0_21, %c0_22] : memref<3x512xf32, #tpu.memory_space<vmem>>, vector<3x512xf32>
    %54 = vector.broadcast %4 : vector<3x1xf32> to vector<3x512xf32>
    %55 = arith.mulf %53, %54 : vector<3x512xf32>
    %cst_23 = arith.constant dense<0.000000e+00> : vector<512xf32>
    %56 = vector.multi_reduction <add>, %55, %cst_23 [0] : vector<3x512xf32> to vector<512xf32>
    %57 = vector.shape_cast %56 : vector<512xf32> to vector<1x512xf32>
    %c0_24 = arith.constant 0 : index
    %c0_25 = arith.constant 0 : index
    %58 = vector.load %arg3[%c0_24, %c0_25] : memref<32x512xf32, #tpu.memory_space<vmem>>, vector<32x512xf32>
    %59 = arith.mulf %58, %52 : vector<32x512xf32>
    %60 = vector.broadcast %3 : vector<32x1xf32> to vector<32x512xf32>
    %61 = arith.mulf %59, %60 : vector<32x512xf32>
    %cst_26 = arith.constant dense<0.000000e+00> : vector<512xf32>
    %62 = vector.multi_reduction <add>, %61, %cst_26 [0] : vector<32x512xf32> to vector<512xf32>
    %63 = vector.shape_cast %62 : vector<512xf32> to vector<1x512xf32>
    %64 = arith.addf %57, %63 : vector<1x512xf32>
    %65 = vector.extract_strided_slice %52 {offsets = [0, 0], sizes = [8, 512], strides = [1, 1]} : vector<32x512xf32> to vector<8x512xf32>
    %66 = tpu.concatenate %65, %65, %65, %65, %65, %65, %65, %65, %65, %65, %65, %65, %65, %65, %65, %65 in 0 : vector<8x512xf32>, vector<8x512xf32>, vector<8x512xf32>, vector<8x512xf32>, vector<8x512xf32>, vector<8x512xf32>, vector<8x512xf32>, vector<8x512xf32>, vector<8x512xf32>, vector<8x512xf32>, vector<8x512xf32>, vector<8x512xf32>, vector<8x512xf32>, vector<8x512xf32>, vector<8x512xf32>, vector<8x512xf32> -> vector<128x512xf32>
    %67 = vector.extract_strided_slice %52 {offsets = [8, 0], sizes = [8, 512], strides = [1, 1]} : vector<32x512xf32> to vector<8x512xf32>
    %68 = tpu.concatenate %67, %67, %67, %67, %67, %67, %67, %67, %67, %67, %67, %67, %67, %67, %67, %67 in 0 : vector<8x512xf32>, vector<8x512xf32>, vector<8x512xf32>, vector<8x512xf32>, vector<8x512xf32>, vector<8x512xf32>, vector<8x512xf32>, vector<8x512xf32>, vector<8x512xf32>, vector<8x512xf32>, vector<8x512xf32>, vector<8x512xf32>, vector<8x512xf32>, vector<8x512xf32>, vector<8x512xf32>, vector<8x512xf32> -> vector<128x512xf32>
    %69 = vector.extract_strided_slice %52 {offsets = [16, 0], sizes = [8, 512], strides = [1, 1]} : vector<32x512xf32> to vector<8x512xf32>
    %70 = tpu.concatenate %69, %69, %69, %69, %69, %69, %69, %69, %69, %69, %69, %69, %69, %69, %69, %69 in 0 : vector<8x512xf32>, vector<8x512xf32>, vector<8x512xf32>, vector<8x512xf32>, vector<8x512xf32>, vector<8x512xf32>, vector<8x512xf32>, vector<8x512xf32>, vector<8x512xf32>, vector<8x512xf32>, vector<8x512xf32>, vector<8x512xf32>, vector<8x512xf32>, vector<8x512xf32>, vector<8x512xf32>, vector<8x512xf32> -> vector<128x512xf32>
    %71 = vector.extract_strided_slice %52 {offsets = [24, 0], sizes = [8, 512], strides = [1, 1]} : vector<32x512xf32> to vector<8x512xf32>
    %72 = tpu.concatenate %71, %71, %71, %71, %71, %71, %71, %71, %71, %71, %71, %71, %71, %71, %71, %71 in 0 : vector<8x512xf32>, vector<8x512xf32>, vector<8x512xf32>, vector<8x512xf32>, vector<8x512xf32>, vector<8x512xf32>, vector<8x512xf32>, vector<8x512xf32>, vector<8x512xf32>, vector<8x512xf32>, vector<8x512xf32>, vector<8x512xf32>, vector<8x512xf32>, vector<8x512xf32>, vector<8x512xf32>, vector<8x512xf32> -> vector<128x512xf32>
    %73 = tpu.concatenate %66, %68, %70, %72 in 0 : vector<128x512xf32>, vector<128x512xf32>, vector<128x512xf32>, vector<128x512xf32> -> vector<512x512xf32>
    %c0_27 = arith.constant 0 : index
    %c0_28 = arith.constant 0 : index
    %74 = vector.load %arg4[%c0_27, %c0_28] : memref<512x512xbf16, #tpu.memory_space<vmem>>, vector<512x512xbf16>
    %75 = arith.extf %74 : vector<512x512xbf16> to vector<512x512xf32>
    %76 = arith.mulf %75, %73 : vector<512x512xf32>
    %77 = arith.truncf %76 : vector<512x512xf32> to vector<512x512xbf16>
    %c0_29 = arith.constant 0 : index
    %c0_30 = arith.constant 0 : index
    %78 = vector.load %arg8[%c0_29, %c0_30] : memref<64x48xbf16, #tpu.memory_space<vmem>>, vector<64x48xbf16>
    %c0_31 = arith.constant 0 : index
    %c0_32 = arith.constant 0 : index
    %79 = vector.load %arg2[%c0_31, %c0_32] : memref<48x512xbf16, #tpu.memory_space<vmem>>, vector<48x512xbf16>
    %cst_33 = arith.constant dense<0.000000e+00> : vector<64x512xf32>
    %80 = tpu.matmul %78, %79, %cst_33 {dimension_numbers = #tpu.dot_dimension_numbers<[1], [0], [0], [1], [0, 0, 1, 1], [], []>} : vector<64x48xbf16>, vector<48x512xbf16>, vector<64x512xf32> -> vector<64x512xf32>
    %c0_34 = arith.constant 0 : index
    %c0_35 = arith.constant 0 : index
    %81 = vector.load %arg7[%c0_34, %c0_35] : memref<64x512xbf16, #tpu.memory_space<vmem>>, vector<64x512xbf16>
    %cst_36 = arith.constant dense<0.000000e+00> : vector<64x512xf32>
    %82 = tpu.matmul %81, %77, %cst_36 {dimension_numbers = #tpu.dot_dimension_numbers<[1], [0], [0], [1], [0, 0, 1, 1], [], []>} : vector<64x512xbf16>, vector<512x512xbf16>, vector<64x512xf32> -> vector<64x512xf32>
    %83 = arith.addf %80, %82 : vector<64x512xf32>
    %84 = vector.broadcast %0 : vector<64x1xf32> to vector<64x512xf32>
    %85 = arith.addf %83, %84 : vector<64x512xf32>
    %cst_37 = arith.constant 0.000000e+00 : f32
    %86 = vector.broadcast %cst_37 : f32 to vector<64x512xf32>
    %87 = arith.maximumf %85, %86 : vector<64x512xf32>
    %c0_38 = arith.constant 0 : index
    %c0_39 = arith.constant 0 : index
    %88 = vector.load %arg9[%c0_38, %c0_39] : memref<32x64xbf16, #tpu.memory_space<vmem>>, vector<32x64xbf16>
    %89 = arith.truncf %87 : vector<64x512xf32> to vector<64x512xbf16>
    %cst_40 = arith.constant dense<0.000000e+00> : vector<32x512xf32>
    %90 = tpu.matmul %88, %89, %cst_40 {dimension_numbers = #tpu.dot_dimension_numbers<[1], [0], [0], [1], [0, 0, 1, 1], [], []>} : vector<32x64xbf16>, vector<64x512xbf16>, vector<32x512xf32> -> vector<32x512xf32>
    %91 = vector.broadcast %1 : vector<32x1xf32> to vector<32x512xf32>
    %92 = arith.addf %90, %91 : vector<32x512xf32>
    %cst_41 = arith.constant 0.000000e+00 : f32
    %93 = vector.broadcast %cst_41 : f32 to vector<32x512xf32>
    %94 = arith.maximumf %92, %93 : vector<32x512xf32>
    %95 = vector.broadcast %2 : vector<32x1xf32> to vector<32x512xf32>
    %96 = arith.mulf %94, %95 : vector<32x512xf32>
    %cst_42 = arith.constant dense<0.000000e+00> : vector<512xf32>
    %97 = vector.multi_reduction <add>, %96, %cst_42 [0] : vector<32x512xf32> to vector<512xf32>
    %98 = vector.shape_cast %97 : vector<512xf32> to vector<1x512xf32>
    %99 = vector.broadcast %7 : vector<1x1xf32> to vector<1x512xf32>
    %100 = arith.addf %98, %99 : vector<1x512xf32>
    %cst_43 = arith.constant 0.000000e+00 : f32
    %101 = vector.broadcast %cst_43 : f32 to vector<1x512xf32>
    %102 = arith.maximumf %100, %101 : vector<1x512xf32>
    %103 = vector.broadcast %5 : vector<1x1xf32> to vector<1x512xf32>
    %104 = arith.mulf %103, %102 : vector<1x512xf32>
    %105 = arith.addf %64, %104 : vector<1x512xf32>
    %106 = vector.broadcast %6 : vector<1x1xf32> to vector<1x512xf32>
    %107 = arith.addf %105, %106 : vector<1x512xf32>
    %108 = arith.negf %107 : vector<1x512xf32>
    %109 = math.exp %108 : vector<1x512xf32>
    %cst_44 = arith.constant 1.000000e+00 : f32
    %110 = vector.broadcast %cst_44 : f32 to vector<1x512xf32>
    %111 = arith.addf %110, %109 : vector<1x512xf32>
    %112 = arith.divf %110, %111 : vector<1x512xf32>
    %c0_45 = arith.constant 0 : index
    %c0_46 = arith.constant 0 : index
    %113 = vector.load %arg11[%c0_45, %c0_46] : memref<1x512xf32, #tpu.memory_space<vmem>>, vector<1x512xf32>
    tpu.vector_store %arg11[%c0_45, %c0_46], %112 {strides = array<i32>} : memref<1x512xf32, #tpu.memory_space<vmem>>, vector<1x512xf32>,
    return
  }
  func.func @transform_0(%arg0: i32) -> (i32, i32) {
    %c0_i32 = arith.constant 0 : i32
    %c0_i32_0 = arith.constant 0 : i32
    return %c0_i32, %arg0 : i32, i32
  }
  func.func @transform_1(%arg0: i32) -> (i32, i32) {
    %c0_i32 = arith.constant 0 : i32
    %c0_i32_0 = arith.constant 0 : i32
    return %c0_i32, %arg0 : i32, i32
  }
  func.func @transform_2(%arg0: i32) -> (i32, i32) {
    %c0_i32 = arith.constant 0 : i32
    %c0_i32_0 = arith.constant 0 : i32
    return %c0_i32, %arg0 : i32, i32
  }
  func.func @transform_3(%arg0: i32) -> (i32, i32) {
    %c0_i32 = arith.constant 0 : i32
    %c0_i32_0 = arith.constant 0 : i32
    return %c0_i32, %arg0 : i32, i32
  }
  func.func @transform_4(%arg0: i32) -> (i32, i32) {
    %c0_i32 = arith.constant 0 : i32
    %c0_i32_0 = arith.constant 0 : i32
    return %c0_i32, %arg0 : i32, i32
  }
  func.func @transform_5(%arg0: i32) -> (i32, i32) {
    %c0_i32 = arith.constant 0 : i32
    %c0_i32_0 = arith.constant 0 : i32
    return %c0_i32, %arg0 : i32, i32
  }
  func.func @transform_6(%arg0: i32) -> (i32, i32) {
    %c0_i32 = arith.constant 0 : i32
    %c0_i32_0 = arith.constant 0 : i32
    %c0_i32_1 = arith.constant 0 : i32
    return %c0_i32, %c0_i32_0 : i32, i32
  }
  func.func @transform_7(%arg0: i32) -> (i32, i32) {
    %c0_i32 = arith.constant 0 : i32
    %c0_i32_0 = arith.constant 0 : i32
    %c0_i32_1 = arith.constant 0 : i32
    return %c0_i32, %c0_i32_0 : i32, i32
  }
  func.func @transform_8(%arg0: i32) -> (i32, i32) {
    %c0_i32 = arith.constant 0 : i32
    %c0_i32_0 = arith.constant 0 : i32
    %c0_i32_1 = arith.constant 0 : i32
    return %c0_i32, %c0_i32_0 : i32, i32
  }
  func.func @transform_9(%arg0: i32) -> (i32, i32) {
    %c0_i32 = arith.constant 0 : i32
    %c0_i32_0 = arith.constant 0 : i32
    %c0_i32_1 = arith.constant 0 : i32
    return %c0_i32, %c0_i32_0 : i32, i32
  }
  func.func @transform_10(%arg0: i32) -> (i32, i32) {
    %c0_i32 = arith.constant 0 : i32
    %c0_i32_0 = arith.constant 0 : i32
    return %c0_i32, %arg0 : i32, i32
  }
}

</mosaic_0001>

<bundles_post_ra>
// kernel: tpu_custom_call.1
= control target key start
LH: loop header
LB: loop body
LE: loop exit
PB: predicated region body
PF: predicated region fallthrough
CT: control target
= control target key end

     0   :  { %s6262_s0 = inlined_call_operand.hbm [shape: f32[3,1024], index: 0, kind: input, shape index: {}]   ;;  %s6263_s1 = inlined_call_operand.vmem [shape: bf16[48,1024], index: 1, kind: input, shape index: {}]   ;;  %s6264_s2 = inlined_call_operand.hbm [shape: f32[32,1024], index: 2, kind: input, shape index: {}]   ;;  %s6265_s3 = inlined_call_operand.hbm [shape: bf16[512,1024], index: 3, kind: input, shape index: {}]   ;;  %s6266_s4 = inlined_call_operand.hbm [shape: f32[32,1024], index: 4, kind: input, shape index: {}]   ;;  %s6267_s5 = inlined_call_operand.hbm [shape: f32[32,1024], index: 5, kind: input, shape index: {}]   ;;  %s6268_s6 = inlined_call_operand.hbm [shape: bf16[64,512], index: 6, kind: input, shape index: {}]   ;;  %s6269_s7 = inlined_call_operand.vmem [shape: bf16[64,48], index: 7, kind: input, shape index: {}]   ;;  %s6270_s8 = inlined_call_operand.hbm [shape: bf16[32,64], index: 8, kind: input, shape index: {}]   ;;  %s6271_s9 = inlined_call_operand.vmem [shape: f32[128,16], index: 9, kind: input, shape index: {}]   ;;  %s6272_s10 = inlined_call_operand.hbm [shape: f32[1,1024], index: 10, kind: output, shape index: {}]  }
   0x1   :  { %6326 = sst [smem:[#allocation50_spill]] %s6262_s0 }
   0x2   :  { %6327 = sst [smem:[#allocation51_spill]] %s6263_s1 }
   0x3   :  { %6328 = sst [smem:[#allocation52_spill]] %s6264_s2 }
   0x4   :  { %6329 = sst [smem:[#allocation53_spill]] %s6268_s6 }
   0x5   :  { %6330 = sst [smem:[#allocation54_spill]] %s6270_s8 }
   0x6   :  { %15 = vsyncpa [#allocation3], 0 }
   0x7   :  { %17 = vsyncpa [#allocation3 + $0x1], 0 }
   0x8   :  { %18 = vsyncpa [#allocation7], 0 }
   0x9   :  { %20 = vsyncpa [#allocation7 + $0x1], 0 }
   0xa   :  { %21 = vsyncpa [#allocation10], 0 }
   0xb   :  { %23 = vsyncpa [#allocation10 + $0x1], 0 }
   0xc   :  { %24 = vsyncpa [#allocation13], 0 }
   0xd   :  { %25 = vsyncpa [#allocation4], 0 }
   0xe   :  { %27 = vsyncpa [#allocation4 + $0x1], 0  ;;  %s3869_s13 = smov 0   ;;  %s3871_s14 = smov 0  }
   0xf   :  { %s3873_s15 = smov 0   ;;  %s3875_s16 = smov 0  }
  0x10 LB: > { %6331 = sst [smem:[#allocation21_spill]] %s3776_s13  ;;  %s3890_s17 = sadd.s32 4294967295, %s3788_s16   ;;  %s3788_s16 = sphi %s3875_s16, %s6650_s16   ;;  %s3784_s15 = sphi %s3873_s15, %s6652_s15   ;;  %s3780_s14 = sphi %s3871_s14, %s6654_s14   ;;  %s3776_s13 = sphi %s3869_s13, %s6653_s13  }
  0x11   : > { %6332 = sst [smem:[#allocation22_spill]] %s3784_s15  ;;  %s3195_s18 = sadd.s32 4294967294, %s3788_s16  }
  0x12   : > { %s3894_s19 = sadd.s32 1, %s3788_s16   ;;  %s40_s20 = sadd.s32 1, %s3784_s15 }
  0x13   : > { %6333 = sst [smem:[#allocation23_spill]] %s3894_s19  ;;  %s37_s21 = ssub.s32 %s3788_s16, %s3894_s19 }
  0x14   : > { %p47_p0 = scmp.ne.s32.totalorder %s3784_s15, %s3780_s14  ;;  %p38_p1 = scmp.eq.s32.totalorder %s37_s21, 0 }
  0x15   : > { %p48_p2 = scmp.eq.s32.totalorder %s3788_s16, 0  ;;  %p53_p3 = scmp.ne.s32.totalorder %s3780_s14, %s3776_s13 }
  0x16   : > { %p6273_p4 = scmp.eq.s32.totalorder %s3890_s17, 0  ;;  %p291_p7 = scmp.eq.s32.totalorder %s3890_s17, 1 }
  0x17   : > { %s3906_s22 = scalar_select %p38_p1, %s3784_s15, %s40_s20  }
  0x18   : > { %p3908_p5 = por %p48_p2, %p47_p0  ;;  %p3914_p6 = por %p6273_p4, %p53_p3 }
  0x19   : > { %6334 = sst [smem:[#allocation24_spill]] %s3906_s22  ;;  %p297_p8 = scmp.eq.s32.totalorder %s3195_s18, 1 }
  0x1a   : > { %s6336_s24 = scalar_select %p3914_p6, 1, 0 }
  0x1b   : > { %p3196_p9 = scmp.ge.s32.totalorder %s3788_s16, 1  ;;  %p304_p10 = scmp.lt.s32.totalorder %s3788_s16, 3 }
  0x1c   : > { %p3921_p11 = por %p291_p7, %p47_p0  ;;  %p3925_p12 = por %p297_p8, %p53_p3 }
  0x1d   : > { %p3929_p13 = pnand %p3196_p9, %p304_p10  ;;  %s3790_s28 = smov [#allocation12]  }
  0x1e   : > { %s6337_s25 = scalar_select %p3921_p11, 1, 0 }
  0x1f   : > { %s6338_s26 = scalar_select %p3925_p12, 1, 0 }
  0x20   : > { %p3310_p1 = pneg %p3929_p13  ;;  %s316_s29 = sshll.u32 %s3790_s28, 4  ;;  %s317_s29 = int_to_ptr.vmem [resolvable:$true] %s316_s29 }
  0x21   : > { %6339 = sst [smem:[#allocation25_spill]] %s6338_s26  ;;  %s3791_s11 = smov [#allocation14]  }
  0x22   : > { %p3937_p2 = pnand %p3310_p1, %p6273_p4  ;;  %s332_s12 = sshll.u32 %s3791_s11, 4  ;;  %s333_s12 = int_to_ptr.vmem [resolvable:$true] %s332_s12 }
  0x23   : > { %s3541_s18 = scalar_lea.vmem %s317_s29, 2048  ;;  %p3549_p9 = scmp.lt.s32.totalorder %s317_s29, %s317_s29 }
  0x24   : > { %p3532_p0 = pneg %p3937_p2  ;;  %p3542_p3 = scmp.ne.s32.totalorder %s317_s29, %s3541_s18 }
  0x25   : > { %p3550_p10 = scmp.lt.s32.totalorder %s3541_s18, %s3541_s18 }
  0x26   : > { %p3544_p7 = pnand %p3542_p3, %p3532_p0 }
  0x27   : > { %p3551_p12 = por %p3550_p10, %p3549_p9 }
  0x28   : > { %p3545_p8 = pneg %p3544_p7 }
  0x2a   : > { %p3552_p1 = pnand %p3551_p12, %p3545_p8 }
  0x2c   : > { %3555 = shalt.err (!%p3552_p1)
}
  0x2d   : > { %s3792_s20 = smov 256   ;;  %s3793_s21 = smov 16  }
  0x2e   : > { %s6342_s6 = sld [smem:[#allocation53_spill]]  ;;  %s3567_s22 = scalar_lea.vmem %s333_s12, 256 }
  0x2f   : > { %p3568_p4 = scmp.ne.s32.totalorder %s333_s12, %s3567_s22  ;;  %p3575_p11 = scmp.lt.s32.totalorder %s333_s12, %s333_s12 }
  0x30   : > { %p3576_p6 = scmp.lt.s32.totalorder %s3567_s22, %s3567_s22 }
  0x31   : > { %p3570_p3 = pnand %p3568_p4, %p3532_p0 }
  0x32   : > { %p3577_p9 = por %p3576_p6, %p3575_p11 }
  0x33   : > { %p3571_p7 = pneg %p3570_p3 }
  0x34   : > { %3313 = dma.hbm_to_vmem [thread:$0]  (!%p3937_p2), %s6342_s6, 2048, %s317_s29, [#allocation13], %s3792_s20, %s3792_s20, %s3793_s21  }
  0x35   : > { %p3578_p12 = pnand %p3577_p9, %p3571_p7 }
  0x37   : > { %3581 = shalt.err (!%p3578_p12)
}
  0x38   : > { %s3794_s18 = smov 64   ;;  %s3795_s19 = smov 4  }
  0x39   : > { %s6343_s8 = sld [smem:[#allocation54_spill]]  ;;  %p6281_p8 = scmp.ge.s32.totalorder %s3788_s16, 2 }
  0x3a   : > { %s3963_s22 = sand.u32 (!%p6281_p8), 1, %s3784_s15   ;;  %s6280_s29 = sshll.u32 (!%p6281_p8), %s3788_s16, 8 }
  0x3b   : > { %345 = sbr.rel (%p6281_p8) target bundleno = 205 (0xcd), region = 32  ;;  %s3200_s20 = sshll.u32 (!%p6281_p8), %s3963_s22, 4 }
  0x3c   : > { %s6344_s0 = sld [smem:[#allocation50_spill]] (!%p6281_p8) }
  0x3f   : > { %3316 = dma.hbm_to_vmem [thread:$0]  (!%p3937_p2), %s6343_s8, 256, %s333_s12, [#allocation13], %s3794_s18, %s3794_s18, %s3795_s19  }
  0x40   : > { %s353_s19 = scalar_lea.vmem [#allocation2], %s3200_s20  ;;  %s350_s12 = scalar_lea.sflag [#allocation3], %s3963_s22 }
  0x41   : > { %s361_s26 = sshll.u32 %s353_s19, 4  ;;  %s362_s26 = int_to_ptr.vmem [resolvable:$true] %s361_s26 }
  0x42   : > { %s3972_s13 = scalar_lea.hbm %s6344_s0, %s6280_s29  ;;  %s3586_s6 = scalar_lea.hbm %s6344_s0, 512 }
  0x43   : > { %s3582_s28 = scalar_lea.hbm %s3972_s13, 256  ;;  %p3587_p2 = scmp.lt.s32.totalorder %s3972_s13, %s6344_s0 }
  0x44   : > { %p3583_p4 = scmp.ne.s32.totalorder %s3972_s13, %s3582_s28  ;;  %p3588_p0 = scmp.lt.s32.totalorder %s3586_s6, %s3582_s28 }
  0x46   : > { %p3584_p6 = pnand %p3583_p4, %p3908_p5  ;;  %p3589_p10 = por %p3588_p0, %p3587_p2 }
  0x48   : > { %p3585_p11 = pneg %p3584_p6 }
  0x4a   : > { %p3590_p1 = pnand %p3589_p10, %p3585_p11 }
  0x4c   : > { %3593 = shalt.err (!%p3590_p1)
}
  0x4d   : > { %s3594_s20 = scalar_lea.vmem %s362_s26, 256  ;;  %s3796_s21 = smov [#allocation2]  }
  0x4e   : > { %p3595_p3 = scmp.ne.s32.totalorder %s362_s26, %s3594_s20  ;;  %s3598_s19 = sshll.u32 %s3796_s21, 4  ;;  %s3599_s19 = int_to_ptr.vmem [resolvable:$false] %s3598_s19 }
  0x4f   : > { %s3600_s29 = scalar_lea.vmem %s3599_s19, 512  ;;  %p3601_p12 = scmp.lt.s32.totalorder %s362_s26, %s3599_s19 }
  0x50   : > { %p3596_p7 = pnand %p3595_p3, %p3908_p5  ;;  %p3602_p4 = scmp.lt.s32.totalorder %s3600_s29, %s3594_s20 }
  0x52   : > { %p3597_p9 = pneg %p3596_p7  ;;  %p3603_p6 = por %p3602_p4, %p3601_p12 }
  0x54   : > { %p3604_p8 = pnand %p3603_p6, %p3597_p9 }
  0x56   : > { %3607 = shalt.err (!%p3604_p8)
}
  0x57   : > { %3294 = dma.hbm_to_vmem [thread:$0]  (%p3908_p5), %s3972_s13, 256, %s362_s26, %s350_s12  }
  0x58   : > { %367 = sbr.rel (!%p3908_p5) target bundleno = 103 (0x67), region = 40  ;;  %s3282_s8 = sshll.u32 (%p3908_p5), %s3788_s16, 4 }
  0x59   : > { %s3288_s6 = smul.u32 (%p3908_p5), 96, %s3963_s22  ;;  %s6345_s1 = sld [smem:[#allocation51_spill]] (%p3908_p5) }
  0x5b   : > { %s371_s29 = scalar_lea.vmem (%p3908_p5), [#allocation5], %s3288_s6 }
  0x5f   : > { %s374_s18 = scalar_lea.vmem %s6345_s1, %s3282_s8 }
  0x60   : > { %v387_v0 = vld [vmem:[%s374_s18] sm:$0xff]  ;;  %v389_v1 = vld [vmem:[%s374_s18 + $0x8] sm:$0xff] }
  0x61   : > { %v391_v2 = vld [vmem:[%s374_s18 + $0x20] sm:$0xff]  ;;  %388 = vst [vmem:[%s371_s29] sm:$0xff] %v387_v0  ;;  %390 = vst [vmem:[%s371_s29 + $0x8] sm:$0xff] %v389_v1  ;;  %v393_v3 = vld [vmem:[%s374_s18 + $0x28] sm:$0xff] }
  0x62   : > { %392 = vst [vmem:[%s371_s29 + $0x10] sm:$0xff] %v391_v2  ;;  %v395_v4 = vld [vmem:[%s374_s18 + $0x40] sm:$0xff]  ;;  %v397_v5 = vld [vmem:[%s374_s18 + $0x48] sm:$0xff]  ;;  %394 = vst [vmem:[%s371_s29 + $0x18] sm:$0xff] %v393_v3 }
  0x63   : > { %396 = vst [vmem:[%s371_s29 + $0x20] sm:$0xff] %v395_v4  ;;  %398 = vst [vmem:[%s371_s29 + $0x28] sm:$0xff] %v397_v5  ;;  %v399_v6 = vld [vmem:[%s374_s18 + $0x60] sm:$0xff]  ;;  %v401_v7 = vld [vmem:[%s374_s18 + $0x68] sm:$0xff] }
  0x64   : > { %v403_v8 = vld [vmem:[%s374_s18 + $0x80] sm:$0xff]  ;;  %400 = vst [vmem:[%s371_s29 + $0x30] sm:$0xff] %v399_v6  ;;  %402 = vst [vmem:[%s371_s29 + $0x38] sm:$0xff] %v401_v7  ;;  %v405_v9 = vld [vmem:[%s374_s18 + $0x88] sm:$0xff] }
  0x65   : > { %404 = vst [vmem:[%s371_s29 + $0x40] sm:$0xff] %v403_v8  ;;  %v407_v10 = vld [vmem:[%s374_s18 + $0xa0] sm:$0xff]  ;;  %v409_v11 = vld [vmem:[%s374_s18 + $0xa8] sm:$0xff]  ;;  %406 = vst [vmem:[%s371_s29 + $0x48] sm:$0xff] %v405_v9 }
  0x66   : > { %408 = vst [vmem:[%s371_s29 + $0x50] sm:$0xff] %v407_v10  ;;  %410 = vst [vmem:[%s371_s29 + $0x58] sm:$0xff] %v409_v11 }
  0x67 PF: > { %s6282_s13 = sand.u32 1, %s3788_s16   ;;  %s4000_s26 = sshll.u32 %s3963_s22, 7 }
  0x68   : > { %s4003_s12 = sshll.u32 %s3788_s16, 9  ;;  %s421_s30 = scalar_lea.vmem [#allocation6], %s4000_s26 }
  0x69   : > { %s428_s20 = sshll.u32 %s421_s30, 4  ;;  %s6346_s2 = sld [smem:[#allocation52_spill]]  ;;  %s4012_s20 = int_to_ptr.vmem [resolvable:$true] %s428_s20 }
  0x6a   : > { %s4016_s8 = scalar_lea.sflag [#allocation7], %s6282_s13 }
  0x6f   : > { %s4010_s6 = scalar_lea.hbm %s6346_s2, %s4003_s12  ;;  %s3612_s29 = scalar_lea.hbm %s6346_s2, 4096 }
  0x70   : > { %s3608_s28 = scalar_lea.hbm %s4010_s6, 2048  ;;  %p3613_p0 = scmp.lt.s32.totalorder %s4010_s6, %s6346_s2 }
  0x71   : > { %p3609_p8 = scmp.ne.s32.totalorder %s4010_s6, %s3608_s28  ;;  %p3614_p10 = scmp.lt.s32.totalorder %s3612_s29, %s3608_s28 }
  0x73   : > { %p3610_p11 = pnand %p3609_p8, %p3908_p5  ;;  %p3615_p1 = por %p3614_p10, %p3613_p0 }
  0x75   : > { %p3611_p2 = pneg %p3610_p11 }
  0x77   : > { %p3616_p3 = pnand %p3615_p1, %p3611_p2 }
  0x79   : > { %3619 = shalt.err (!%p3616_p3)
}
  0x7a   : > { %s3620_s19 = scalar_lea.vmem %s4012_s20, 2048  ;;  %s3797_s13 = smov [#allocation6]  }
  0x7b   : > { %p3621_p7 = scmp.ne.s32.totalorder %s4012_s20, %s3620_s19  ;;  %s3624_s11 = sshll.u32 %s3797_s13, 4  ;;  %s3625_s11 = int_to_ptr.vmem [resolvable:$false] %s3624_s11 }
  0x7c   : > { %s3626_s18 = scalar_lea.vmem %s3625_s11, 4096  ;;  %p3627_p4 = scmp.lt.s32.totalorder %s4012_s20, %s3625_s11 }
  0x7d   : > { %p3622_p9 = pnand %p3621_p7, %p3908_p5  ;;  %p3628_p6 = scmp.lt.s32.totalorder %s3626_s18, %s3620_s19 }
  0x7f   : > { %p3623_p12 = pneg %p3622_p9  ;;  %p3629_p8 = por %p3628_p6, %p3627_p4 }
  0x81   : > { %p3630_p11 = pnand %p3629_p8, %p3623_p12 }
  0x83   : > { %3633 = shalt.err (!%p3630_p11)
}
  0x84   : > { %s6284_s28 = smov 1024   ;;  %s3799_s29 = smov 512  }
  0x85   : > { %s6286_s30 = smov 32   ;;  %s4046_s19 = scalar_lea.hbm %s6266_s4, %s4003_s12 }
  0x86   : > { %3295 = dma.hbm_to_vmem [thread:$0]  (%p3908_p5), %s4010_s6, 2048, %s4012_s20, %s4016_s8, %s6284_s28, %s3799_s29, %s6286_s30  }
  0x87   : > { %s463_s11 = scalar_lea.vmem [#allocation9], %s4000_s26  ;;  %s3208_s0 = sshll.u32 %s3963_s22, 10 }
  0x88   : > { %s470_s18 = sshll.u32 %s463_s11, 4  ;;  %s6347_s1 = sand.u32 1, %s3788_s16   ;;  %s4050_s18 = int_to_ptr.vmem [resolvable:$true] %s470_s18 }
  0x89   : > { %s4054_s2 = scalar_lea.sflag [#allocation10], %s6347_s1  ;;  %s3634_s15 = scalar_lea.hbm %s4046_s19, 2048 }
  0x8a   : > { %p3635_p2 = scmp.ne.s32.totalorder %s4046_s19, %s3634_s15  ;;  %s3638_s13 = scalar_lea.hbm %s6266_s4, 4096 }
  0x8b   : > { %p3639_p1 = scmp.lt.s32.totalorder %s4046_s19, %s6266_s4  ;;  %p3640_p3 = scmp.lt.s32.totalorder %s3638_s13, %s3634_s15 }
  0x8c   : > { %p3636_p0 = pnand %p3635_p2, %p3908_p5 }
  0x8d   : > { %p3641_p7 = por %p3640_p3, %p3639_p1 }
  0x8e   : > { %p3637_p10 = pneg %p3636_p0 }
  0x90   : > { %p3642_p9 = pnand %p3641_p7, %p3637_p10 }
  0x92   : > { %3645 = shalt.err (!%p3642_p9)
}
  0x93   : > { %s3646_s1 = scalar_lea.vmem %s4050_s18, 2048  ;;  %s3801_s11 = smov [#allocation9]  }
  0x94   : > { %p3647_p12 = scmp.ne.s32.totalorder %s4050_s18, %s3646_s1  ;;  %s3650_s20 = sshll.u32 %s3801_s11, 4  ;;  %s3651_s20 = int_to_ptr.vmem [resolvable:$false] %s3650_s20 }
  0x95   : > { %s3652_s6 = scalar_lea.vmem %s3651_s20, 4096  ;;  %p3653_p8 = scmp.lt.s32.totalorder %s4050_s18, %s3651_s20 }
  0x96   : > { %p3648_p4 = pnand %p3647_p12, %p3908_p5  ;;  %p3654_p11 = scmp.lt.s32.totalorder %s3652_s6, %s3646_s1 }
  0x98   : > { %p3649_p6 = pneg %p3648_p4  ;;  %p3655_p2 = por %p3654_p11, %p3653_p8 }
  0x9a   : > { %p3656_p0 = pnand %p3655_p2, %p3649_p6 }
  0x9c   : > { %3659 = shalt.err (!%p3656_p0)
}
  0x9d   : > { %s6348_s15 = smov 1024   ;;  %s6349_s28 = sshll.u32 %s3788_s16, 8 }
  0x9e   : > { %3297 = dma.hbm_to_vmem [thread:$0]  (%p3908_p5), %s4046_s19, 2048, %s4050_s18, %s4054_s2, %s6348_s15, %s3799_s29, %s6286_s30  }
  0x9f   : > { %s4085_s1 = scalar_lea.hbm %s6265_s3, %s6349_s28  ;;  %s442_s11 = scalar_lea.vmem [#allocation8], %s3208_s0 }
  0xa0   : > { %s449_s20 = sshll.u32 %s442_s11, 4  ;;  %s3660_s6 = scalar_lea.hbm %s4085_s1, 16384  ;;  %s4089_s20 = int_to_ptr.vmem [resolvable:$true] %s449_s20 }
  0xa1   : > { %p3661_p10 = scmp.ne.s32.totalorder %s4085_s1, %s3660_s6  ;;  %s3664_s30 = scalar_lea.hbm %s6265_s3, 32768 }
  0xa2   : > { %p3665_p7 = scmp.lt.s32.totalorder %s4085_s1, %s6265_s3  ;;  %p3666_p9 = scmp.lt.s32.totalorder %s3664_s30, %s3660_s6 }
  0xa3   : > { %p3662_p1 = pnand %p3661_p10, %p3908_p5 }
  0xa4   : > { %p3667_p12 = por %p3666_p9, %p3665_p7 }
  0xa5   : > { %p3663_p3 = pneg %p3662_p1 }
  0xa7   : > { %p3668_p4 = pnand %p3667_p12, %p3663_p3 }
  0xa9   : > { %3671 = shalt.err (!%p3668_p4)
}
  0xaa   : > { %s3672_s0 = scalar_lea.vmem %s4089_s20, 16384  ;;  %s3802_s22 = smov [#allocation8]  }
  0xab   : > { %p3673_p6 = scmp.ne.s32.totalorder %s4089_s20, %s3672_s0  ;;  %s3676_s21 = sshll.u32 %s3802_s22, 4  ;;  %s3677_s21 = int_to_ptr.vmem [resolvable:$false] %s3676_s21 }
  0xac   : > { %s3678_s11 = scalar_lea.vmem %s3677_s21, 32768  ;;  %p3679_p2 = scmp.lt.s32.totalorder %s4089_s20, %s3677_s21 }
  0xad   : > { %p3674_p8 = pnand %p3673_p6, %p3908_p5  ;;  %p3680_p0 = scmp.lt.s32.totalorder %s3678_s11, %s3672_s0 }
  0xaf   : > { %p3675_p11 = pneg %p3674_p8  ;;  %p3681_p10 = por %p3680_p0, %p3679_p2 }
  0xb1   : > { %p3682_p1 = pnand %p3681_p10, %p3675_p11 }
  0xb3   : > { %3685 = shalt.err (!%p3682_p1)
}
  0xb4   : > { %s3803_s30 = smov 256   ;;  %s3804_s6 = smov 16  }
  0xb5   : > { %3296 = dma.hbm_to_vmem [thread:$0]  (%p3908_p5), %s4085_s1, 16384, %s4089_s20, %s4016_s8, %s3799_s29, %s3803_s30, %s3804_s6  }
  0xb6   : > { %s4117_s13 = scalar_lea.hbm %s6267_s5, %s4003_s12  ;;  %s484_s28 = scalar_lea.vmem [#allocation11], %s4000_s26 }
  0xb7   : > { %s491_s0 = sshll.u32 %s484_s28, 4  ;;  %s3686_s22 = scalar_lea.hbm %s4117_s13, 2048  ;;  %s492_s0 = int_to_ptr.vmem [resolvable:$true] %s491_s0 }
  0xb8   : > { %p3687_p3 = scmp.ne.s32.totalorder %s4117_s13, %s3686_s22  ;;  %s3690_s8 = scalar_lea.hbm %s6267_s5, 4096 }
  0xb9   : > { %p3691_p12 = scmp.lt.s32.totalorder %s4117_s13, %s6267_s5  ;;  %p3692_p4 = scmp.lt.s32.totalorder %s3690_s8, %s3686_s22 }
  0xba   : > { %p3688_p7 = pnand %p3687_p3, %p3908_p5 }
  0xbb   : > { %p3693_p6 = por %p3692_p4, %p3691_p12 }
  0xbc   : > { %p3689_p9 = pneg %p3688_p7 }
  0xbe   : > { %p3694_p8 = pnand %p3693_p6, %p3689_p9 }
  0xc0   : > { %3697 = shalt.err (!%p3694_p8)
}
  0xc1   : > { %s3698_s26 = scalar_lea.vmem %s492_s0, 2048  ;;  %s3805_s12 = smov [#allocation11]  }
  0xc2   : > { %p3699_p11 = scmp.ne.s32.totalorder %s492_s0, %s3698_s26  ;;  %s3702_s30 = sshll.u32 %s3805_s12, 4  ;;  %s3703_s30 = int_to_ptr.vmem [resolvable:$false] %s3702_s30 }
  0xc3   : > { %s3704_s6 = scalar_lea.vmem %s3703_s30, 4096  ;;  %p3705_p10 = scmp.lt.s32.totalorder %s492_s0, %s3703_s30 }
  0xc4   : > { %p3700_p2 = pnand %p3699_p11, %p3908_p5  ;;  %p3706_p1 = scmp.lt.s32.totalorder %s3704_s6, %s3698_s26 }
  0xc6   : > { %p3701_p0 = pneg %p3700_p2  ;;  %p3707_p3 = por %p3706_p1, %p3705_p10 }
  0xc8   : > { %p3708_p7 = pnand %p3707_p3, %p3701_p0 }
  0xca   : > { %3711 = shalt.err (!%p3708_p7)
}
  0xcb   : > { %s6350_s19 = smov 32  }
  0xcc   : > { %3298 = dma.hbm_to_vmem [thread:$0]  (%p3908_p5), %s4117_s13, 2048, %s492_s0, %s4054_s2, %s6348_s15, %s3799_s29, %s6350_s19  }
  0xcd PF: > { %503 = sbr.rel (%p3929_p13) target bundleno = 1115 (0x45b), region = 79 }
  0xd2   : > { %s4143_s18 = sand.u32 1, %s3780_s14   ;;  %p6351_p9 = scmp.ne.s32.totalorder %s6336_s24, 0 }
  0xd3   : > { %s3218_s28 = sshll.u32 %s4143_s18, 4  ;;  %s506_s22 = scalar_lea.sflag [#allocation3], %s4143_s18 }
  0xd4   : > { %s4147_s21 = scalar_lea.vmem [#allocation2], %s3218_s28 }
  0xd5   : > { %3755 = dma.done.wait (%p6351_p9), %s506_s22, 256  }
  0xd6   : > { %3757 = vsyncadd (%p6351_p9), %s506_s22, 4294967040  ;;  %s3289_s2 = smul.u32 96, %s4143_s18  ;;  %s521_s23 = sand.u32 1, %s3890_s17  }
  0xd7   : > { %s3219_s27 = sshll.u32 %s4143_s18, 7  ;;  %s522_s15 = scalar_lea.sflag [#allocation7], %s521_s23 }
  0xd8   : > { %s4156_s29 = scalar_lea.vmem [#allocation5], %s3289_s2  ;;  %s4158_s13 = scalar_lea.vmem [#allocation6], %s3219_s27 }
  0xd9   : > { %3759 = dma.done.wait (%p6351_p9), %s522_s15, 18432  }
  0xda   : > { %3761 = vsyncadd (%p6351_p9), %s522_s15, 4294948864  ;;  %s3220_s0 = sshll.u32 %s4143_s18, 10  ;;  %s540_s8 = scalar_lea.sflag [#allocation10], %s521_s23 }
  0xdb   : > { %s4165_s11 = scalar_lea.vmem [#allocation8], %s3220_s0  ;;  %s4167_s1 = scalar_lea.vmem [#allocation9], %s3219_s27 }
  0xdc   : > { %3763 = dma.done.wait (%p6351_p9), %s540_s8, 4096  }
  0xdd   : > { %3765 = vsyncadd (%p6351_p9), %s540_s8, 4294963200  ;;  %s4173_s20 = scalar_lea.vmem [#allocation11], %s3219_s27  ;;  %p6352_p5 = scmp.eq.s32.totalorder %s3890_s17, 0 }
  0xdf   : > { %3767 = dma.done.wait (%p6352_p5), [#allocation13], 2304   ;;  %p6353_p13 = pmov %p6352_p5 }
  0xe0   : > { %v4180_v12 = vld [vmem:[%s4173_s20 + $0x8] sm:$0xff]  ;;  %v4190_v18 = vld [vmem:[%s4173_s20] sm:$0xff]  ;;  %v4203_v48 = vld [vmem:[%s4165_s11 + $0xf0] sm:$0xff]  ;;  %vm2392_vm0 = vcmask 392192   ;;  %vm2697_vm1 = vcmask 523264   ;;  %vm999_vm2 = vcmask 1042432  }
  0xe1   : > { %3769 = vsyncadd (%p6353_p13), [#allocation13], 4294964992  ;;  %v658_v13 = vld [vmem:[%s4167_s1 + $0x8] sm:$0xff]  ;;  %v657_v20 = vld [vmem:[%s4167_s1] sm:$0xff]  ;;  %s2988_s26 = scalar_lea.sflag [#allocation4], %s4143_s18  ;;  %p6645_p4 = scmp.ne.s32.totalorder %s6337_s25, 0 }
  0xe2   : > { %v674_v14 = vmul.f32 %v658_v13, %v4180_v12  ;;  %v4185_v15 = vld [vmem:[%s4173_s20 + $0x48] sm:$0xff]  ;;  %v4194_v21 = vld [vmem:[%s4173_s20 + $0x40] sm:$0xff]  ;;  %v673_v24 = vmul.f32 %v657_v20, %v4190_v18  ;;  %v4209_v55 = vld [vmem:[%s4165_s11 + $0x2f0] sm:$0xff]  ;;  %s3813_s30 = smov [#allocation15]  }
  0xe3   : > { %v666_v16 = vld [vmem:[%s4167_s1 + $0x48] sm:$0xff]  ;;  %v665_v22 = vld [vmem:[%s4167_s1 + $0x40] sm:$0xff]  ;;  %v4218_v62 = vld [vmem:[%s4165_s11 + $0xd0] sm:$0xff] }
  0xe4   : > { %v682_v17 = vmul.f32 %v666_v16, %v4185_v15  ;;  %v695_v19 = vrot.slane %v674_v14, 4  ;;  %v681_v25 = vmul.f32 %v665_v22, %v4194_v21  ;;  %v689_v28 = vrot.slane %v673_v24, 4  ;;  %v4200_v47 = vld [vmem:[%s4165_s11 + $0xe0] sm:$0xff]  ;;  %v4225_v3 = vld [vmem:[%s4165_s11 + $0x2d0] sm:$0xff] }
  0xe5   : > { %v4206_v54 = vld [vmem:[%s4165_s11 + $0x2e0] sm:$0xff]  ;;  %v4235_v9 = vld [vmem:[%s4165_s11 + $0xb0] sm:$0xff] }
  0xe6   : > { %v831_v23 = vrot.slane %v682_v17, 4  ;;  %v696_v26 = vmax.f32 %v674_v14, %v695_v19  ;;  %v825_v29 = vrot.slane %v681_v25, 4  ;;  %v690_v32 = vmax.f32 %v673_v24, %v689_v28  ;;  %v4215_v61 = vld [vmem:[%s4165_s11 + $0xc0] sm:$0xff]  ;;  %v4244_v16 = vld [vmem:[%s4165_s11 + $0x2b0] sm:$0xff] }
  0xe7   : > { %v4221_v63 = vld [vmem:[%s4165_s11 + $0x2c0] sm:$0xff]  ;;  %v4368_v5 = vld [vmem:[%s4165_s11 + $0x30] sm:$0xff] }
  0xe8   : > { %v832_v27 = vmax.f32 %v682_v17, %v831_v23  ;;  %v697_v30 = vrot.slane %v696_v26, 2  ;;  %v826_v33 = vmax.f32 %v681_v25, %v825_v29  ;;  %v691_v36 = vrot.slane %v690_v32, 2  ;;  %v4232_v8 = vld [vmem:[%s4165_s11 + $0xa0] sm:$0xff]  ;;  %v4253_v23 = vld [vmem:[%s4165_s11 + $0x90] sm:$0xff]  ;;  %6358 = vst [vmem:[#allocation30_spill] sm:$0xff] %v4368_v5 }
  0xe9   : > { %v4365_v11 = vld [vmem:[%s4165_s11 + $0x20] sm:$0xff]  ;;  %v4375_v10 = vld [vmem:[%s4165_s11 + $0x230] sm:$0xff] }
  0xea   : > { %v833_v31 = vrot.slane %v832_v27, 2  ;;  %v698_v34 = vmax.f32 %v696_v26, %v697_v30  ;;  %v827_v37 = vrot.slane %v826_v33, 2  ;;  %v692_v40 = vmax.f32 %v690_v32, %v691_v36  ;;  %v4266_v30 = vld [vmem:[%s4165_s11 + $0x60] sm:$0xff]  ;;  %v646_v32 = vld [vmem:[%s4173_s20 + $0x28] sm:$0xff]  ;;  %v4404_v5 = vld [vmem:[%s4165_s11 + $0x1f0] sm:$0xff] }
  0xeb   : > { %v4372_v4 = vld [vmem:[%s4165_s11 + $0x220] sm:$0xff] }
  0xec   : > { %v834_v35 = vmax.f32 %v832_v27, %v833_v31  ;;  %v699_v38 = vrot.slane %v698_v34, 1  ;;  %v828_v41 = vmax.f32 %v826_v33, %v827_v37  ;;  %v693_v44 = vrot.slane %v692_v40, 1  ;;  %v4269_v31 = vld [vmem:[%s4165_s11 + $0x70] sm:$0xff]  ;;  %v662_v33 = vld [vmem:[%s4167_s1 + $0x28] sm:$0xff] }
  0xed   : > { %v4325_v37 = vld [vmem:[%s4165_s11 + $0x50] sm:$0xff] }
  0xee   : > { %v835_v39 = vrot.slane %v834_v35, 1  ;;  %v700_v42 = vmax.f32 %v698_v34, %v699_v38  ;;  %v829_v45 = vrot.slane %v828_v41, 1  ;;  %v694_v50 = vmax.f32 %v692_v40, %v693_v44  ;;  %v4278_v38 = vld [vmem:[%s4165_s11 + $0x260] sm:$0xff]  ;;  %v4284_v40 = vld [vmem:[%s4173_s20 + $0x68] sm:$0xff] }
  0xef   : > { %6354 = vst [vmem:[#allocation26_spill] sm:$0xff] %v4284_v40 }
  0xf0   : > { %v836_v43 = vmax.f32 %v834_v35, %v835_v39  ;;  %v714_v46 = vsub.f32 %v674_v14, %v700_v42  ;;  %v830_v51 = vmax.f32 %v828_v41, %v829_v45  ;;  %v713_v56 = vsub.f32 %v673_v24, %v694_v50  ;;  %v4241_v14 = vld [vmem:[%s4165_s11 + $0x2a0] sm:$0xff]  ;;  %v4281_v39 = vld [vmem:[%s4165_s11 + $0x270] sm:$0xff]  ;;  %v670_v41 = vld [vmem:[%s4167_s1 + $0x68] sm:$0xff] }
  0xf1   : > { %v4256_v24 = vld [vmem:[%s4165_s11 + $0x280] sm:$0xff]  ;;  %v4306_v44 = vmul.f32 %v670_v41, %v4284_v40  ;;  %v4385_v40 = vld [vmem:[%s4165_s11 + $0x10] sm:$0xff] }
  0xf2   : > { %v850_v49 = vsub.f32 %v682_v17, %v836_v43  ;;  %v719_v52 = vmul.f32 1.442695, %v714_v46  ;;  %v849_v57 = vsub.f32 %v681_v25, %v830_v51  ;;  %v717_v0 = vmul.f32 1.442695, %v713_v56  ;;  %v4247_v17 = vld [vmem:[%s4165_s11 + $0x80] sm:$0xff]  ;;  %v4259_v25 = vld [vmem:[%s4165_s11 + $0x290] sm:$0xff] }
  0xf3   : > { %v4292_v46 = vld [vmem:[%s4173_s20 + $0x20] sm:$0xff]  ;;  %v4299_v56 = vmul.f32 %v662_v33, %v646_v32  ;;  %v899_v41 = vrot.slane %v4306_v44, 4 }
  0xf4   : > { %v855_v53 = vmul.f32 1.442695, %v850_v49  ;;  %3437 = vpow2.f32 %v719_v52  ;;  %v853_v2 = vmul.f32 1.442695, %v849_v57  ;;  %6355 = vst [vmem:[#allocation27_spill] sm:$0xff] %v4292_v46  ;;  %v661_v49 = vld [vmem:[%s4167_s1 + $0x20] sm:$0xff] }
  0xf5   : > { %v653_v50 = vld [vmem:[%s4173_s20 + $0x60] sm:$0xff]  ;;  %v763_v32 = vrot.slane %v4299_v56, 4  ;;  %v4312_v33 = vmul.f32 %v661_v49, %v4292_v46 }
  0xf6   : > { %3439 = vpow2.f32 %v855_v53  ;;  %v669_v57 = vld [vmem:[%s4167_s1 + $0x60] sm:$0xff] }
  0xf7   : > { %3441 = vpow2.f32 %v717_v0  ;;  %v3391_v51 = vld [vmem:[#allocation12 + $0x4] ss:$16 sps:$4 sm:$0xff]   ;;  %v3394_v0 = vld [vmem:[#allocation12 + $0xc] ss:$16 sps:$4 sm:$0xff]   ;;  %v4320_v42 = vmul.f32 %v669_v57, %v653_v50  ;;  %v757_v36 = vrot.slane %v4312_v33, 4  ;;  %v900_v57 = vmax.f32 %v4306_v44, %v899_v41 }
  0xf8   : > { %3443 = vpow2.f32 %v853_v2  ;;  %v4317_v53 = vld [vmem:[%s4165_s11 + $0x40] sm:$0xff]  ;;  %2052 = vmatprep.mubr.bf16.mxu0 %v3391_v51  ;;  %v764_v2 = vmax.f32 %v4299_v56, %v763_v32  ;;  %2125 = vmatprep.mubr.bf16.mxu1 %v3394_v0  ;;  %v4337_v51 = vld [vmem:[%s4165_s11 + $0x250] sm:$0xff] }
  0xf9   : > { %v4328_v49 = vld [vmem:[%s4165_s11 + $0x240] sm:$0xff]  ;;  %6357 = vst [vmem:[#allocation29_spill] sm:$0xff] %v4337_v51  ;;  %v893_v52 = vrot.slane %v4320_v42, 4  ;;  %v758_v0 = vmax.f32 %v4312_v33, %v757_v36  ;;  %v901_v20 = vrot.slane %v900_v57, 2 }
  0xfa   : > { %6356 = vst [vmem:[#allocation28_spill] sm:$0xff] %v4328_v49  ;;  %v765_v29 = vrot.slane %v764_v2, 2 }
  0xfb   : > { %v894_v27 = vmax.f32 %v4320_v42, %v893_v52  ;;  %v759_v32 = vrot.slane %v758_v0, 2 }
  0xfc   : > { %v766_v50 = vmax.f32 %v764_v2, %v765_v29 }
  0xfd   : > { %v895_v52 = vrot.slane %v894_v27, 2  ;;  %v760_v22 = vmax.f32 %v758_v0, %v759_v32 }
  0xff   : > { %v896_v13 = vmax.f32 %v894_v27, %v895_v52  ;;  %v761_v0 = vrot.slane %v760_v22, 1  ;;  %v4382_v52 = vld [vmem:[%s4165_s11] sm:$0xff] }
 0x101   : > { %v4332_v45 = vpop.eup %3437  ;;  %v897_v49 = vrot.slane %v896_v13, 1 }
 0x102   : > { %v731_v34 = vrot.slane %v4332_v45, 4 }
 0x103   : > { %v4341_v43 = vpop.eup %3439 }
 0x104   : > { %v867_v28 = vrot.slane %v4341_v43, 4  ;;  %v4350_v41 = vpop.eup %3441  ;;  %v732_v26 = vadd.f32 %v4332_v45, %v731_v34  ;;  %v902_v34 = vmax.f32 %v900_v57, %v901_v20  ;;  %v762_v20 = vmax.f32 %v760_v22, %v761_v0  ;;  %v4430_v22 = vld [vmem:[%s4165_s11 + $0x3c0] sm:$0xff] }
 0x105   : > { %v4354_v7 = vpop.eup %3443  ;;  %v725_v35 = vrot.slane %v4350_v41, 4  ;;  %6359 = vst [vmem:[#allocation31_spill] sm:$0xff] %v4430_v22 }
 0x106   : > { %v868_v36 = vadd.f32 %v4341_v43, %v867_v28  ;;  %v733_v6 = vrot.slane %v732_v26, 2  ;;  %v861_v1 = vrot.slane %v4354_v7, 4  ;;  %v903_v32 = vrot.slane %v902_v34, 1 }
 0x107   : > { %v726_v19 = vadd.f32 %v4350_v41, %v725_v35  ;;  %v767_v35 = vrot.slane %v766_v50, 1 }
 0x108   : > { %v869_v60 = vrot.slane %v868_v36, 2  ;;  %v734_v29 = vadd.f32 %v733_v6, %v732_v26  ;;  %v862_v2 = vadd.f32 %v4354_v7, %v861_v1 }
 0x109   : > { %v727_v58 = vrot.slane %v726_v19, 2  ;;  %v768_v6 = vmax.f32 %v766_v50, %v767_v35  ;;  %v4469_v50 = vld [vmem:[%s4165_s11 + $0x380] sm:$0xff] }
 0x10a   : > { %v870_v59 = vadd.f32 %v869_v60, %v868_v36  ;;  %v735_v28 = vrot.slane %v734_v29, 1  ;;  %v863_v46 = vrot.slane %v862_v2, 2 }
 0x10b   : > { %v728_v1 = vadd.f32 %v727_v58, %v726_v19  ;;  %v782_v51 = vsub.f32 %v4299_v56, %v768_v6  ;;  %v4433_v6 = vld [vmem:[%s4165_s11 + $0x3d0] sm:$0xff]  ;;  %v4443_v56 = vld [vmem:[%s4165_s11 + $0x1a0] sm:$0xff] }
 0x10c   : > { %v871_v26 = vrot.slane %v870_v59, 1  ;;  %v736_v60 = vadd.f32 %v735_v28, %v734_v29  ;;  %v864_v57 = vadd.f32 %v863_v46, %v862_v2  ;;  %v4390_v46 = vld [vmem:[%s4165_s11 + $0x200] sm:$0xff]  ;;  %6360 = vst [vmem:[#allocation32_spill] sm:$0xff] %v4433_v6  ;;  %6361 = vst [vmem:[#allocation33_spill] sm:$0xff] %v4443_v56  ;;  %v4476_v29 = vld [vmem:[%s4165_s11 + $0x390] sm:$0xff] }
 0x10d   : > { %v729_v36 = vrot.slane %v728_v1, 1  ;;  %v4398_v2 = vld [vmem:[%s4165_s11 + $0x1e0] sm:$0xff]  ;;  %v787_v0 = vmul.f32 1.442695, %v782_v51  ;;  %6362 = vst [vmem:[#allocation34_spill] sm:$0xff] %v4476_v29 }
 0x10e   : > { %v872_v27 = vadd.f32 %v871_v26, %v870_v59  ;;  %3445 = vrcp.f32 %v736_v60  ;;  %v865_v58 = vrot.slane %v864_v57, 1  ;;  %v4393_v59 = vld [vmem:[%s4165_s11 + $0x210] sm:$0xff]  ;;  %v904_v60 = vmax.f32 %v902_v34, %v903_v32  ;;  %v4416_v32 = vld [vmem:[%s4165_s11 + $0x1c0] sm:$0xff] }
 0x10f   : > { %v730_v28 = vadd.f32 %v729_v36, %v728_v1  ;;  %v4407_v1 = vld [vmem:[%s4165_s11 + $0x3e0] sm:$0xff]  ;;  %v898_v36 = vmax.f32 %v896_v13, %v897_v49  ;;  %v4427_v34 = vld [vmem:[%s4165_s11 + $0x1d0] sm:$0xff] }
 0x110   : > { %3447 = vrcp.f32 %v872_v27  ;;  %v866_v35 = vadd.f32 %v865_v58, %v864_v57  ;;  %v4410_v27 = vld [vmem:[%s4165_s11 + $0x3f0] sm:$0xff]  ;;  %v918_v49 = vsub.f32 %v4306_v44, %v904_v60  ;;  %v4453_v60 = vld [vmem:[%s4165_s11 + $0x3a0] sm:$0xff] }
 0x111   : > { %3449 = vrcp.f32 %v730_v28  ;;  %v917_v44 = vsub.f32 %v4320_v42, %v898_v36  ;;  %v4450_v36 = vld [vmem:[%s4165_s11 + $0x1b0] sm:$0xff]  ;;  %v4461_v19 = vld [vmem:[%s4165_s11 + $0x180] sm:$0xff]  ;;  %v6365_v42 = vunpack.c.h.bf16 %v4200_v47 }
 0x112   : > { %3451 = vrcp.f32 %v866_v35  ;;  %v781_v35 = vsub.f32 %v4312_v33, %v762_v20  ;;  %v4456_v33 = vld [vmem:[%s4165_s11 + $0x3b0] sm:$0xff]  ;;  %v923_v20 = vmul.f32 1.442695, %v918_v49  ;;  %v4486_v57 = vld [vmem:[%s4165_s11 + $0x160] sm:$0xff] }
 0x113   : > { %3453 = vpow2.f32 %v787_v0  ;;  %v921_v51 = vmul.f32 1.442695, %v917_v44  ;;  %v4466_v26 = vld [vmem:[%s4165_s11 + $0x190] sm:$0xff] }
 0x114   : > { %v785_v58 = vmul.f32 1.442695, %v781_v35  ;;  %3455 = vpow2.f32 %v923_v20 }
 0x116   : > { %3457 = vpow2.f32 %v785_v58  ;;  %v6369_v58 = vunpack.c.h.bf16 %v4209_v55 }
 0x117   : > { %3459 = vpow2.f32 %v921_v51  ;;  %v6366_v51 = vunpack.c.h.bf16 %v4203_v48 }
 0x11b   : > { %v3446_v0 = vpop.eup %3445 }
 0x11c   : > { %v752_v49 = vmul.f32 %v3446_v0, %v4332_v45 }
 0x11d   : > { %v3448_v22 = vpop.eup %3447 }
 0x11e   : > { %v888_v56 = vmul.f32 %v3448_v22, %v4341_v43  ;;  %v3450_v13 = vpop.eup %3449  ;;  %v4492_v6 = vmul.f32 %v752_v49, %v4180_v12 }
 0x11f   : > { %v3452_v0 = vpop.eup %3451  ;;  %v750_v43 = vmul.f32 %v3450_v13, %v4350_v41  ;;  %v6368_v41 = vunpack.c.h.bf16 %v4206_v54 }
 0x120   : > { %6363 = vst [vmem:[#allocation35_spill] sm:$0xff] %v4492_v6  ;;  %v4497_v28 = vmul.f32 %v888_v56, %v4185_v15  ;;  %v1577_v12 = vmul.f32 %v6365_v42, %v4492_v6  ;;  %v1581_v49 = vmul.f32 %v6366_v51, %v4492_v6  ;;  %v886_v20 = vmul.f32 %v3452_v0, %v4354_v7 }
 0x121   : > { %v6367_v15 = vunpack.c.h.bf16 %v4215_v61  ;;  %v4519_v42 = vmul.f32 %v750_v43, %v4190_v18  ;;  %v6371_v51 = vunpack.c.h.bf16 %v4218_v62  ;;  %v6375_v18 = vunpack.c.l.bf16 %v4200_v47 }
 0x122   : > { %6364 = vst [vmem:[#allocation36_spill] sm:$0xff] %v4497_v28  ;;  %v1705_v13 = vmul.f32 %v6368_v41, %v4497_v28  ;;  %v1709_v22 = vmul.f32 %v6369_v58, %v4497_v28  ;;  %v1805_v7 = vpack.c.bf16 %v1581_v49, %v1577_v12  ;;  %v4525_v0 = vmul.f32 %v886_v20, %v4194_v21 }
 0x123   : > { %v1569_v56 = vmul.f32 %v6367_v15, %v4492_v6  ;;  %6370 = vst [vmem:[#allocation37_spill] sm:$0xff] %v4519_v42  ;;  %v1573_v45 = vmul.f32 %v6371_v51, %v4492_v6  ;;  %v6373_v15 = vunpack.c.h.bf16 %v4221_v63  ;;  %v6374_v41 = vunpack.c.h.bf16 %v4225_v3 }
 0x124   : > { %6372 = vst [vmem:[#allocation38_spill] sm:$0xff] %v4525_v0  ;;  %v1869_v35 = vpack.c.bf16 %v1709_v22, %v1705_v13  ;;  %v1576_v43 = vmul.f32 %v6375_v18, %v4519_v42  ;;  %v6376_v12 = vunpack.c.l.bf16 %v4203_v48  ;;  %2020 = vmatprep.subr.bf16.mxu0 %v1805_v7  ;;  %v6377_v20 = vunpack.c.l.bf16 %v4206_v54 }
 0x125   : > { %v1697_v44 = vmul.f32 %v6373_v15, %v4497_v28  ;;  %v1701_v58 = vmul.f32 %v6374_v41, %v4497_v28  ;;  %v1801_v21 = vpack.c.bf16 %v1573_v45, %v1569_v56  ;;  %v6378_v15 = vunpack.c.l.bf16 %v4209_v55 }
 0x126   : > { %v1580_v49 = vmul.f32 %v6376_v12, %v4519_v42  ;;  %v1704_v51 = vmul.f32 %v6377_v20, %v4525_v0  ;;  %v6379_v22 = vunpack.c.l.bf16 %v4215_v61  ;;  %2093 = vmatprep.subr.bf16.mxu1 %v1869_v35  ;;  %v6380_v48 = vunpack.c.l.bf16 %v4218_v62 }
 0x127   : > { %v1708_v29 = vmul.f32 %v6378_v15, %v4525_v0  ;;  %v1865_v41 = vpack.c.bf16 %v1701_v58, %v1697_v44  ;;  %v6381_v54 = vunpack.c.l.bf16 %v4221_v63  ;;  %v6382_v55 = vunpack.c.l.bf16 %v4225_v3  ;;  %v4558_v44 = vld [vmem:[%s4165_s11 + $0x170] sm:$0xff]  ;;  %v4560_v58 = vpop.eup %3453 }
 0x128   : > { %v1568_v47 = vmul.f32 %v6379_v22, %v4519_v42  ;;  %v1804_v13 = vpack.c.bf16 %v1580_v49, %v1576_v43  ;;  %v1572_v45 = vmul.f32 %v6380_v48, %v4519_v42  ;;  %v6383_v35 = vunpack.c.h.bf16 %v4232_v8  ;;  %v4578_v22 = vld [vmem:[%s4165_s11 + $0x360] sm:$0xff] }
 0x129   : > { %v1696_v56 = vmul.f32 %v6381_v54, %v4525_v0  ;;  %v1700_v7 = vmul.f32 %v6382_v55, %v4525_v0  ;;  %v1868_v61 = vpack.c.bf16 %v1708_v29, %v1704_v51  ;;  %v6384_v62 = vunpack.c.h.bf16 %v4235_v9 }
 0x12a   : > { %v1561_v18 = vmul.f32 %v6383_v35, %v4492_v6  ;;  %v6385_v63 = vunpack.c.h.bf16 %v4241_v14  ;;  %2021 = vmatpush1.bf16.msra.mxu0 %v1804_v13  ;;  %v1800_v3 = vpack.c.bf16 %v1572_v45, %v1568_v47  ;;  %v6386_v20 = vunpack.c.h.bf16 %v4244_v16 }
 0x12b   : > { %v1565_v43 = vmul.f32 %v6384_v62, %v4492_v6  ;;  %v1864_v49 = vpack.c.bf16 %v1700_v7, %v1696_v56  ;;  %v6387_v29 = vunpack.c.l.bf16 %v4232_v8  ;;  %2094 = vmatpush1.bf16.msra.mxu1 %v1868_v61  ;;  %2022 = vmatprep.subr.bf16.mxu0 %v1801_v21  ;;  %v6388_v54 = vunpack.c.l.bf16 %v4235_v9  ;;  %v4587_v56 = vpop.eup %3455 }
 0x12c   : > { %v1689_v12 = vmul.f32 %v6385_v63, %v4497_v28  ;;  %v1693_v15 = vmul.f32 %v6386_v20, %v4497_v28  ;;  %v6389_v47 = vunpack.c.l.bf16 %v4241_v14  ;;  %v1357_v45 = vunpack.c.h.bf16 %v4558_v44  ;;  %2095 = vmatprep.subr.bf16.mxu1 %v1865_v41 }
 0x12d   : > { %v1560_v51 = vmul.f32 %v6387_v29, %v4519_v42  ;;  %v1797_v48 = vpack.c.bf16 %v1565_v43, %v1561_v18  ;;  %v1564_v55 = vmul.f32 %v6388_v54, %v4519_v42  ;;  %v6390_v7 = vunpack.c.l.bf16 %v4244_v16  ;;  %v4598_v18 = vpop.eup %3457 }
 0x12e   : > { %v1688_v13 = vmul.f32 %v6389_v47, %v4525_v0  ;;  %v1861_v8 = vpack.c.bf16 %v1693_v15, %v1689_v12  ;;  %v6391_v9 = vunpack.c.h.bf16 %v4247_v17  ;;  %v6392_v14 = vunpack.c.h.bf16 %v4253_v23  ;;  %v4610_v15 = vpop.eup %3459  ;;  %2023 = vmatpush1.bf16.msra.mxu0 %v1800_v3 }
 0x12f   : > { %v1692_v21 = vmul.f32 %v6390_v7, %v4525_v0  ;;  %v6393_v41 = vunpack.c.h.bf16 %v4256_v24  ;;  %v6394_v43 = vunpack.c.h.bf16 %v4259_v25  ;;  %v6395_v63 = vunpack.c.l.bf16 %v4247_v17  ;;  %2096 = vmatpush1.bf16.msra.mxu1 %v1864_v49  ;;  %2024 = vmatprep.subr.bf16.mxu0 %v1797_v48 }
 0x130   : > { %v1553_v61 = vmul.f32 %v6391_v9, %v4492_v6  ;;  %v1557_v35 = vmul.f32 %v6392_v14, %v4492_v6  ;;  %v1796_v29 = vpack.c.bf16 %v1564_v55, %v1560_v51  ;;  %v6396_v47 = vunpack.c.l.bf16 %v4253_v23  ;;  %2097 = vmatprep.subr.bf16.mxu1 %v1861_v8 }
 0x131   : > { %v1681_v62 = vmul.f32 %v6393_v41, %v4497_v28  ;;  %v1685_v16 = vmul.f32 %v6394_v43, %v4497_v28  ;;  %v1552_v12 = vmul.f32 %v6395_v63, %v4519_v42  ;;  %v1860_v54 = vpack.c.bf16 %v1692_v21, %v1688_v13  ;;  %v644_v41 = vld [vmem:[%s4173_s20 + $0x18] sm:$0xff] }
 0x132   : > { %v1556_v7 = vmul.f32 %v6396_v47, %v4519_v42  ;;  %v6397_v9 = vunpack.c.l.bf16 %v4256_v24  ;;  %v660_v43 = vld [vmem:[%s4167_s1 + $0x18] sm:$0xff]  ;;  %v1793_v17 = vpack.c.bf16 %v1557_v35, %v1553_v61  ;;  %v6398_v63 = vunpack.c.l.bf16 %v4259_v25  ;;  %2025 = vmatpush1.bf16.msra.mxu0 %v1796_v29 }
 0x133   : > { %v6399_v3 = vunpack.c.h.bf16 %v4266_v30  ;;  %v799_v23 = vrot.slane %v4560_v58, 4  ;;  %v1857_v55 = vpack.c.bf16 %v1685_v16, %v1681_v62  ;;  %v6400_v24 = vunpack.c.h.bf16 %v4269_v31  ;;  %2098 = vmatpush1.bf16.msra.mxu1 %v1860_v54  ;;  %v6411_v54 = vld [vmem:[#allocation29_spill] sm:$0xff] }
 0x134   : > { %v1680_v14 = vmul.f32 %v6397_v9, %v4525_v0  ;;  %v1684_v20 = vmul.f32 %v6398_v63, %v4525_v0  ;;  %v6401_v49 = vunpack.c.h.bf16 %v4278_v38  ;;  %v6402_v25 = vunpack.c.h.bf16 %v4281_v39  ;;  %2026 = vmatprep.subr.bf16.mxu0 %v1793_v17 }
 0x135   : > { %v1545_v51 = vmul.f32 %v6399_v3, %v4492_v6  ;;  %v1549_v13 = vmul.f32 %v6400_v24, %v4492_v6  ;;  %v1792_v61 = vpack.c.bf16 %v1556_v7, %v1552_v12  ;;  %v935_v47 = vrot.slane %v4587_v56, 4  ;;  %2099 = vmatprep.subr.bf16.mxu1 %v1857_v55 }
 0x136   : > { %v1673_v48 = vmul.f32 %v6401_v49, %v4497_v28  ;;  %v1677_v21 = vmul.f32 %v6402_v25, %v4497_v28  ;;  %v1856_v35 = vpack.c.bf16 %v1684_v20, %v1680_v14  ;;  %v4637_v9 = vmul.f32 %v660_v43, %v644_v41  ;;  %v6409_v43 = vld [vmem:[#allocation28_spill] sm:$0xff] }
 0x137   : > { %v6403_v8 = vunpack.c.l.bf16 %v4266_v30  ;;  %v6404_v16 = vunpack.c.l.bf16 %v4269_v31  ;;  %v6405_v3 = vunpack.c.l.bf16 %v4278_v38  ;;  %v6406_v12 = vunpack.c.l.bf16 %v4281_v39  ;;  %2027 = vmatpush1.bf16.msra.mxu0 %v1792_v61 }
 0x138   : > { %v1789_v7 = vpack.c.bf16 %v1549_v13, %v1545_v51  ;;  %v6407_v29 = vunpack.c.h.bf16 %v4317_v53  ;;  %v6408_v14 = vunpack.c.h.bf16 %v4325_v37  ;;  %v793_v41 = vrot.slane %v4598_v18, 4  ;;  %2100 = vmatpush1.bf16.msra.mxu1 %v1856_v35 }
 0x139   : > { %v1544_v62 = vmul.f32 %v6403_v8, %v4519_v42  ;;  %v1548_v63 = vmul.f32 %v6404_v16, %v4519_v42  ;;  %v1672_v24 = vmul.f32 %v6405_v3, %v4525_v0  ;;  %v1676_v20 = vmul.f32 %v6406_v12, %v4525_v0 }
 0x13a   : > { %v1537_v30 = vmul.f32 %v6407_v29, %v4492_v6  ;;  %v1541_v31 = vmul.f32 %v6408_v14, %v4492_v6  ;;  %v1853_v38 = vpack.c.bf16 %v1677_v21, %v1673_v48  ;;  %v6410_v49 = vunpack.c.h.bf16 %v6409_v43  ;;  %2028 = vmatprep.subr.bf16.mxu0 %v1789_v7 }
 0x13b   : > { %v6412_v17 = vunpack.c.h.bf16 %v6411_v54  ;;  %v6413_v13 = vunpack.c.l.bf16 %v4317_v53  ;;  %v6414_v8 = vunpack.c.l.bf16 %v4325_v37  ;;  %v6415_v55 = vunpack.c.l.bf16 %v6409_v43 }
 0x13c   : > { %v1665_v39 = vmul.f32 %v6410_v49, %v4497_v28  ;;  %v6416_v21 = vunpack.c.l.bf16 %v6411_v54  ;;  %v6417_v12 = vunpack.c.h.bf16 %v4365_v11  ;;  %v1788_v53 = vpack.c.bf16 %v1548_v63, %v1544_v62  ;;  %v6418_v49 = vld [vmem:[#allocation30_spill] sm:$0xff]  ;;  %2101 = vmatprep.subr.bf16.mxu1 %v1853_v38 }
 0x13d   : > { %v1669_v51 = vmul.f32 %v6412_v17, %v4497_v28  ;;  %v1536_v25 = vmul.f32 %v6413_v13, %v4519_v42  ;;  %v1540_v16 = vmul.f32 %v6414_v8, %v4519_v42  ;;  %v1664_v48 = vmul.f32 %v6415_v55, %v4525_v0 }
 0x13e   : > { %v1668_v3 = vmul.f32 %v6416_v21, %v4525_v0  ;;  %v1529_v29 = vmul.f32 %v6417_v12, %v4492_v6  ;;  %v1852_v14 = vpack.c.bf16 %v1676_v20, %v1672_v24  ;;  %v6419_v37 = vunpack.c.h.bf16 %v6418_v49  ;;  %v4702_v12 = vld [vmem:[%s4165_s11 + $0x370] sm:$0xff]  ;;  %2029 = vmatpush1.bf16.msra.mxu0 %v1788_v53  ;;  %v4719_v53 = vld [vmem:[%s4173_s20 + $0x58] sm:$0xff] }
 0x13f   : > { %v6420_v43 = vunpack.c.h.bf16 %v4372_v4  ;;  %v1785_v54 = vpack.c.bf16 %v1541_v31, %v1537_v30  ;;  %v6421_v8 = vunpack.c.h.bf16 %v4375_v10  ;;  %v6422_v61 = vunpack.c.l.bf16 %v4365_v11 }
 0x140   : > { %v1533_v17 = vmul.f32 %v6419_v37, %v4492_v6  ;;  %v929_v63 = vrot.slane %v4610_v15, 4  ;;  %v1849_v24 = vpack.c.bf16 %v1669_v51, %v1665_v39  ;;  %v6423_v20 = vunpack.c.l.bf16 %v6418_v49  ;;  %2102 = vmatpush1.bf16.msra.mxu1 %v1852_v14 }
 0x141   : > { %v1657_v13 = vmul.f32 %v6420_v43, %v4497_v28  ;;  %v1661_v55 = vmul.f32 %v6421_v8, %v4497_v28  ;;  %v1528_v62 = vmul.f32 %v6422_v61, %v4519_v42  ;;  %v6424_v35 = vunpack.c.l.bf16 %v4372_v4  ;;  %2030 = vmatprep.subr.bf16.mxu0 %v1785_v54 }
 0x142   : > { %v1532_v21 = vmul.f32 %v6423_v20, %v4519_v42  ;;  %v6425_v30 = vunpack.c.l.bf16 %v4375_v10  ;;  %v1784_v11 = vpack.c.bf16 %v1540_v16, %v1536_v25  ;;  %v1848_v37 = vpack.c.bf16 %v1668_v3, %v1664_v48  ;;  %2103 = vmatprep.subr.bf16.mxu1 %v1849_v24 }
 0x143   : > { %v1656_v7 = vmul.f32 %v6424_v35, %v4525_v0  ;;  %v1781_v38 = vpack.c.bf16 %v1533_v17, %v1529_v29  ;;  %v707_v39 = vrot.slane %v4637_v9, 4  ;;  %v1845_v51 = vpack.c.bf16 %v1661_v55, %v1657_v13  ;;  %v668_v17 = vld [vmem:[%s4167_s1 + $0x58] sm:$0xff] }
 0x144   : > { %v1660_v31 = vmul.f32 %v6425_v30, %v4525_v0  ;;  %v6426_v49 = vunpack.c.h.bf16 %v4382_v52  ;;  %v6427_v43 = vunpack.c.h.bf16 %v4385_v40  ;;  %v6428_v8 = vunpack.c.h.bf16 %v4390_v46  ;;  %2031 = vmatpush1.bf16.msra.mxu0 %v1784_v11  ;;  %2104 = vmatpush1.bf16.msra.mxu1 %v1848_v37 }
 0x145   : > { %v1780_v25 = vpack.c.bf16 %v1532_v21, %v1528_v62  ;;  %v6429_v48 = vunpack.c.h.bf16 %v4393_v59  ;;  %v1485_v29 = vunpack.c.h.bf16 %v4702_v12  ;;  %v6430_v13 = vunpack.c.l.bf16 %v4382_v52  ;;  %2032 = vmatprep.subr.bf16.mxu0 %v1781_v38  ;;  %2105 = vmatprep.subr.bf16.mxu1 %v1845_v51  ;;  %v4750_v38 = vld [vmem:[%s4173_s20 + $0x50] sm:$0xff] }
 0x146   : > { %v1521_v4 = vmul.f32 %v6426_v49, %v4492_v6  ;;  %v1525_v10 = vmul.f32 %v6427_v43, %v4492_v6  ;;  %v1649_v61 = vmul.f32 %v6428_v8, %v4497_v28  ;;  %v1844_v16 = vpack.c.bf16 %v1660_v31, %v1656_v7  ;;  %v4746_v8 = vld [vmem:[%s4173_s20 + $0x10] sm:$0xff] }
 0x147   : > { %v1653_v3 = vmul.f32 %v6429_v48, %v4497_v28  ;;  %v1520_v55 = vmul.f32 %v6430_v13, %v4519_v42  ;;  %v6431_v14 = vunpack.c.l.bf16 %v4385_v40  ;;  %v800_v62 = vadd.f32 %v4560_v58, %v799_v23  ;;  %v659_v48 = vld [vmem:[%s4167_s1 + $0x10] sm:$0xff] }
 0x148   : > { %v936_v20 = vadd.f32 %v4587_v56, %v935_v47  ;;  %v6432_v21 = vunpack.c.l.bf16 %v4390_v46  ;;  %v794_v24 = vadd.f32 %v4598_v18, %v793_v41  ;;  %v930_v7 = vadd.f32 %v4610_v15, %v929_v63  ;;  %2033 = vmatpush1.bf16.msra.mxu0 %v1780_v25  ;;  %2106 = vmatpush1.bf16.msra.mxu1 %v1844_v16 }
 0x149   : > { %v1524_v54 = vmul.f32 %v6431_v14, %v4519_v42  ;;  %v708_v52 = vmax.f32 %v4637_v9, %v707_v39  ;;  %v6433_v40 = vunpack.c.l.bf16 %v4393_v59  ;;  %v801_v23 = vrot.slane %v800_v62, 2 }
 0x14a   : > { %v1648_v35 = vmul.f32 %v6432_v21, %v4525_v0  ;;  %v937_v31 = vrot.slane %v936_v20, 2  ;;  %v4742_v47 = vmul.f32 %v668_v17, %v4719_v53  ;;  %v1777_v46 = vpack.c.bf16 %v1525_v10, %v1521_v4  ;;  %v667_v4 = vld [vmem:[%s4167_s1 + $0x50] sm:$0xff] }
 0x14b   : > { %v1652_v30 = vmul.f32 %v6433_v40, %v4525_v0  ;;  %v795_v41 = vrot.slane %v794_v24, 2  ;;  %v931_v63 = vrot.slane %v930_v7, 2  ;;  %v709_v39 = vrot.slane %v708_v52, 2  ;;  %v5236_v0 = vld [vmem:[%s4165_s11 + $0x208] sm:$0xff] }
 0x14c   : > { %v1841_v11 = vpack.c.bf16 %v1653_v3, %v1649_v61  ;;  %v802_v49 = vadd.f32 %v801_v23, %v800_v62  ;;  %v938_v59 = vadd.f32 %v937_v31, %v936_v20  ;;  %v843_v43 = vrot.slane %v4742_v47, 4  ;;  %2034 = vmatprep.subr.bf16.mxu0 %v1777_v46  ;;  %v4764_v23 = vld [vmem:[%s4165_s11 + $0x140] sm:$0xff]  ;;  %v4767_v31 = vld [vmem:[%s4165_s11 + $0x150] sm:$0xff] }
 0x14d   : > { %v1776_v13 = vpack.c.bf16 %v1524_v54, %v1520_v55  ;;  %v796_v17 = vadd.f32 %v795_v41, %v794_v24  ;;  %v932_v14 = vadd.f32 %v931_v63, %v930_v7  ;;  %v710_v37 = vmax.f32 %v708_v52, %v709_v39 }
 0x14e   : > { %v1840_v10 = vpack.c.bf16 %v1652_v30, %v1648_v35  ;;  %v803_v21 = vrot.slane %v802_v49, 1  ;;  %v939_v40 = vrot.slane %v938_v59, 1  ;;  %v844_v51 = vmax.f32 %v4742_v47, %v843_v43  ;;  %2107 = vmatprep.subr.bf16.mxu1 %v1841_v11  ;;  %v4773_v11 = vld [vmem:[%s4165_s11 + $0x340] sm:$0xff] }
 0x14f   : > { %v797_v61 = vrot.slane %v796_v17, 1  ;;  %v933_v3 = vrot.slane %v932_v14, 1  ;;  %v711_v62 = vrot.slane %v710_v37, 1  ;;  %v4755_v55 = vmul.f32 %v659_v48, %v4746_v8  ;;  %2035 = vmatpush1.bf16.msra.mxu0 %v1776_v13 }
 0x150   : > { %v804_v54 = vadd.f32 %v803_v21, %v802_v49  ;;  %v940_v20 = vadd.f32 %v939_v40, %v938_v59  ;;  %v845_v24 = vrot.slane %v844_v51, 2  ;;  %v4758_v25 = vmul.f32 %v667_v4, %v4750_v38  ;;  %2108 = vmatpush1.bf16.msra.mxu1 %v1840_v10  ;;  %v4776_v49 = vld [vmem:[%s4165_s11 + $0x350] sm:$0xff]  ;;  %v4783_v4 = vld [vmem:[%s4165_s11 + $0x120] sm:$0xff] }
 0x151   : > { %v798_v35 = vadd.f32 %v797_v61, %v796_v17  ;;  %v934_v16 = vadd.f32 %v933_v3, %v932_v14  ;;  %v701_v52 = vrot.slane %v4755_v55, 4  ;;  %v712_v43 = vmax.f32 %v710_v37, %v711_v62  ;;  %v4791_v37 = vld [vmem:[%s4165_s11 + $0x320] sm:$0xff]  ;;  %v4826_v14 = vld [vmem:[%s4165_s11 + $0xe8] sm:$0xff] }
 0x152   : > { %3461 = vrcp.f32 %v804_v54  ;;  %v846_v46 = vmax.f32 %v844_v51, %v845_v24  ;;  %v837_v41 = vrot.slane %v4758_v25, 4  ;;  %v4788_v51 = vld [vmem:[%s4165_s11 + $0x130] sm:$0xff]  ;;  %v6454_v7 = vunpack.c.l.bf16 %v4416_v32 }
 0x153   : > { %3463 = vrcp.f32 %v940_v20  ;;  %v702_v59 = vmax.f32 %v4755_v55, %v701_v52  ;;  %v4797_v24 = vld [vmem:[%s4165_s11 + $0x330] sm:$0xff]  ;;  %v716_v40 = vsub.f32 %v4637_v9, %v712_v43  ;;  %v4811_v20 = vld [vmem:[%s4165_s11 + $0x300] sm:$0xff]  ;;  %v4829_v9 = vld [vmem:[%s4165_s11 + $0xf8] sm:$0xff] }
 0x154   : > { %3465 = vrcp.f32 %v798_v35  ;;  %v847_v48 = vrot.slane %v846_v46, 1  ;;  %v838_v13 = vmax.f32 %v4758_v25, %v837_v41  ;;  %v4802_v41 = vld [vmem:[%s4165_s11 + $0x100] sm:$0xff]  ;;  %v4808_v54 = vld [vmem:[%s4165_s11 + $0x110] sm:$0xff] }
 0x155   : > { %3467 = vrcp.f32 %v934_v16  ;;  %v703_v10 = vrot.slane %v702_v59, 2  ;;  %v4818_v43 = vld [vmem:[%s4165_s11 + $0x310] sm:$0xff]  ;;  %v723_v52 = vmul.f32 1.442695, %v716_v40  ;;  %v4838_v40 = vld [vmem:[%s4165_s11 + $0x2e8] sm:$0xff] }
 0x156   : > { %v848_v61 = vmax.f32 %v846_v46, %v847_v48  ;;  %v839_v3 = vrot.slane %v838_v13, 2 }
 0x157   : > { %v704_v35 = vmax.f32 %v702_v59, %v703_v10  ;;  %3469 = vpow2.f32 %v723_v52  ;;  %v6435_v52 = vld [vmem:[#allocation26_spill] sm:$0xff] }
 0x158   : > { %v840_v46 = vmax.f32 %v838_v13, %v839_v3  ;;  %v852_v59 = vsub.f32 %v4742_v47, %v848_v61  ;;  %v4845_v3 = vld [vmem:[%s4165_s11 + $0x2f8] sm:$0xff] }
 0x159   : > { %v705_v10 = vrot.slane %v704_v35, 1 }
 0x15a   : > { %v841_v13 = vrot.slane %v840_v46, 1  ;;  %v859_v62 = vmul.f32 1.442695, %v852_v59  ;;  %v3517_v59 = vld [vmem:[%s4173_s20 + $0x28] sm:$0xff] }
 0x15b   : > { %v706_v21 = vmax.f32 %v704_v35, %v705_v10 }
 0x15c   : > { %v842_v16 = vmax.f32 %v840_v46, %v841_v13  ;;  %3471 = vpow2.f32 %v859_v62  ;;  %v6448_v46 = vld [vmem:[#allocation31_spill] sm:$0xff] }
 0x15d   : > { %v715_v39 = vsub.f32 %v4755_v55, %v706_v21 }
 0x15e   : > { %v851_v47 = vsub.f32 %v4758_v25, %v842_v16 }
 0x15f   : > { %v3462_v48 = vpop.eup %3461  ;;  %v721_v55 = vmul.f32 1.442695, %v715_v39 }
 0x160   : > { %v3464_v21 = vpop.eup %3463  ;;  %v820_v10 = vmul.f32 %v3462_v48, %v4560_v58  ;;  %v857_v35 = vmul.f32 1.442695, %v851_v47  ;;  %v6437_v47 = vunpack.c.h.bf16 %v4398_v2 }
 0x161   : > { %v3466_v17 = vpop.eup %3465  ;;  %v956_v25 = vmul.f32 %v3464_v21, %v4587_v56  ;;  %3473 = vpow2.f32 %v721_v55  ;;  %v6441_v55 = vunpack.c.h.bf16 %v4416_v32 }
 0x162   : > { %v3468_v13 = vpop.eup %3467  ;;  %v4853_v63 = vmul.f32 %v3517_v59, %v820_v10  ;;  %v818_v39 = vmul.f32 %v3466_v17, %v4598_v18  ;;  %3475 = vpow2.f32 %v857_v35  ;;  %v6438_v10 = vunpack.c.h.bf16 %v4404_v5  ;;  %v6439_v18 = vld [vmem:[#allocation27_spill] sm:$0xff] }
 0x163   : > { %v4858_v48 = vmul.f32 %v956_v25, %v6435_v52  ;;  %v954_v56 = vmul.f32 %v3468_v13, %v4610_v15  ;;  %v6442_v15 = vunpack.c.h.bf16 %v4407_v1  ;;  %v6443_v35 = vunpack.c.h.bf16 %v4410_v27 }
 0x164   : > { %6434 = vst [vmem:[#allocation28_spill] sm:$0xff] %v4853_v63  ;;  %v1641_v21 = vmul.f32 %v6437_v47, %v4853_v63  ;;  %v1645_v59 = vmul.f32 %v6438_v10, %v4853_v63  ;;  %v4869_v17 = vmul.f32 %v818_v39, %v6439_v18  ;;  %v1633_v25 = vmul.f32 %v6441_v55, %v4853_v63  ;;  %v3518_v47 = vld [vmem:[%s4173_s20 + $0x60] sm:$0xff] }
 0x165   : > { %6436 = vst [vmem:[#allocation29_spill] sm:$0xff] %v4858_v48  ;;  %v1769_v13 = vmul.f32 %v6442_v15, %v4858_v48  ;;  %v1773_v52 = vmul.f32 %v6443_v35, %v4858_v48  ;;  %v4881_v58 = vmul.f32 %v3518_v47, %v954_v56  ;;  %v6445_v39 = vunpack.c.h.bf16 %v4427_v34 }
 0x166   : > { %6440 = vst [vmem:[#allocation30_spill] sm:$0xff] %v4869_v17  ;;  %v1837_v18 = vpack.c.bf16 %v1645_v59, %v1641_v21  ;;  %v6446_v55 = vunpack.c.l.bf16 %v4398_v2  ;;  %v6447_v15 = vunpack.c.l.bf16 %v4404_v5  ;;  %v6449_v35 = vunpack.c.h.bf16 %v6448_v46 }
 0x167   : > { %6444 = vst [vmem:[#allocation26_spill] sm:$0xff] %v4881_v58  ;;  %v1637_v10 = vmul.f32 %v6445_v39, %v4853_v63  ;;  %v1901_v30 = vpack.c.bf16 %v1773_v52, %v1769_v13  ;;  %v6450_v56 = vunpack.c.l.bf16 %v4407_v1  ;;  %v6451_v21 = vunpack.c.l.bf16 %v4410_v27  ;;  %v4911_v52 = vld [vmem:[%s4165_s11 + $0xc8] sm:$0xff] }
 0x168   : > { %v1640_v16 = vmul.f32 %v6446_v55, %v4869_v17  ;;  %v1644_v62 = vmul.f32 %v6447_v15, %v4869_v17  ;;  %v1761_v61 = vmul.f32 %v6449_v35, %v4858_v48  ;;  %2036 = vmatprep.subr.bf16.mxu0 %v1837_v18  ;;  %v6452_v55 = vld [vmem:[#allocation32_spill] sm:$0xff]  ;;  %v1632_v35 = vmul.f32 %v6454_v7, %v4869_v17  ;;  %v6458_v18 = vld [vmem:[#allocation33_spill] sm:$0xff] }
 0x169   : > { %v1768_v47 = vmul.f32 %v6450_v56, %v4881_v58  ;;  %v1772_v59 = vmul.f32 %v6451_v21, %v4881_v58  ;;  %v1833_v39 = vpack.c.bf16 %v1637_v10, %v1633_v25  ;;  %v6453_v5 = vunpack.c.h.bf16 %v6452_v55  ;;  %2109 = vmatprep.subr.bf16.mxu1 %v1901_v30 }
 0x16a   : > { %v1836_v2 = vpack.c.bf16 %v1644_v62, %v1640_v16  ;;  %v6455_v13 = vunpack.c.l.bf16 %v4427_v34  ;;  %v6456_v25 = vunpack.c.l.bf16 %v6448_v46  ;;  %v6457_v62 = vunpack.c.l.bf16 %v6452_v55 }
 0x16b   : > { %v1765_v15 = vmul.f32 %v6453_v5, %v4858_v48  ;;  %v1900_v27 = vpack.c.bf16 %v1772_v59, %v1768_v47  ;;  %v6459_v32 = vunpack.c.h.bf16 %v6458_v18  ;;  %v6460_v21 = vunpack.c.h.bf16 %v4450_v36 }
 0x16c   : > { %v1636_v1 = vmul.f32 %v6455_v13, %v4869_v17  ;;  %v1760_v16 = vmul.f32 %v6456_v25, %v4881_v58  ;;  %v1764_v10 = vmul.f32 %v6457_v62, %v4881_v58  ;;  %2037 = vmatpush2.bf16.msra.mxu0 %v1836_v2  ;;  %v6461_v47 = vunpack.c.h.bf16 %v4453_v60  ;;  %v4944_v62 = vpop.eup %3469 }
 0x16d   : > { %v1625_v7 = vmul.f32 %v6459_v32, %v4853_v63  ;;  %v1897_v56 = vpack.c.bf16 %v1765_v15, %v1761_v61  ;;  %v1629_v30 = vmul.f32 %v6460_v21, %v4853_v63  ;;  %2110 = vmatpush2.bf16.msra.mxu1 %v1900_v27  ;;  %2038 = vmatprep.subr.bf16.mxu0 %v1833_v39  ;;  %v6462_v55 = vunpack.c.h.bf16 %v4456_v33  ;;  %v4955_v21 = vpop.eup %3471  ;;  %v3401_v15 = vld [vmem:[#allocation12 + $0x44] ss:$16 sps:$4 sm:$0xff]  }
 0x16e   : > { %v1832_v34 = vpack.c.bf16 %v1636_v1, %v1632_v35  ;;  %v1753_v46 = vmul.f32 %v6461_v47, %v4858_v48  ;;  %v1896_v59 = vpack.c.bf16 %v1764_v10, %v1760_v16  ;;  %v6463_v2 = vunpack.c.l.bf16 %v6458_v18  ;;  %v6470_v47 = vld [vmem:[#allocation34_spill] sm:$0xff] }
 0x16f   : > { %v1757_v5 = vmul.f32 %v6462_v55, %v4858_v48  ;;  %2111 = vmatprep.subr.bf16.mxu1 %v1897_v56  ;;  %v1829_v35 = vpack.c.bf16 %v1629_v30, %v1625_v7  ;;  %v6464_v13 = vunpack.c.l.bf16 %v4450_v36  ;;  %v6465_v39 = vunpack.c.l.bf16 %v4453_v60 }
 0x170   : > { %v1624_v61 = vmul.f32 %v6463_v2, %v4869_v17  ;;  %v6466_v25 = vunpack.c.l.bf16 %v4456_v33  ;;  %v6467_v18 = vunpack.c.h.bf16 %v4461_v19  ;;  %v6468_v7 = vunpack.c.h.bf16 %v4466_v26  ;;  %2039 = vmatpush2.bf16.msra.mxu0 %v1832_v34 }
 0x171   : > { %v1628_v1 = vmul.f32 %v6464_v13, %v4869_v17  ;;  %v1752_v27 = vmul.f32 %v6465_v39, %v4881_v58  ;;  %v1893_v10 = vpack.c.bf16 %v1757_v5, %v1753_v46  ;;  %v6469_v56 = vunpack.c.h.bf16 %v4469_v50  ;;  %v4964_v13 = vld [vmem:[%s4165_s11 + $0xd8] sm:$0xff]  ;;  %v4966_v39 = vpop.eup %3473  ;;  %2112 = vmatpush2.bf16.msra.mxu1 %v1896_v59  ;;  %2040 = vmatprep.subr.bf16.mxu0 %v1829_v35 }
 0x172   : > { %v1756_v16 = vmul.f32 %v6466_v25, %v4881_v58  ;;  %v1617_v32 = vmul.f32 %v6467_v18, %v4853_v63  ;;  %v1621_v36 = vmul.f32 %v6468_v7, %v4853_v63  ;;  %v6471_v46 = vunpack.c.h.bf16 %v6470_v47 }
 0x173   : > { %v1745_v60 = vmul.f32 %v6469_v56, %v4858_v48  ;;  %v1828_v33 = vpack.c.bf16 %v1628_v1, %v1624_v61  ;;  %v6472_v5 = vunpack.c.l.bf16 %v4461_v19  ;;  %v6473_v34 = vunpack.c.l.bf16 %v4466_v26  ;;  %v4975_v19 = vpop.eup %3475  ;;  %2113 = vmatprep.subr.bf16.mxu1 %v1893_v10 }
 0x174   : > { %v1892_v30 = vpack.c.bf16 %v1756_v16, %v1752_v27  ;;  %v1749_v55 = vmul.f32 %v6471_v46, %v4858_v48  ;;  %v1825_v25 = vpack.c.bf16 %v1621_v36, %v1617_v32  ;;  %v6474_v1 = vunpack.c.l.bf16 %v4469_v50  ;;  %v3403_v16 = vld [vmem:[#allocation12 + $0x4c] ss:$16 sps:$4 sm:$0xff]  }
 0x175   : > { %v1616_v2 = vmul.f32 %v6472_v5, %v4869_v17  ;;  %v1620_v61 = vmul.f32 %v6473_v34, %v4869_v17  ;;  %v6475_v59 = vunpack.c.l.bf16 %v6470_v47  ;;  %v6476_v32 = vunpack.c.h.bf16 %v4486_v57  ;;  %2041 = vmatpush2.bf16.msra.mxu0 %v1828_v33  ;;  %v3400_v47 = vld [vmem:[#allocation12 + $0x28] ss:$16 sps:$4 sm:$0xff]  }
 0x176   : > { %v1744_v27 = vmul.f32 %v6474_v1, %v4881_v58  ;;  %v1889_v18 = vpack.c.bf16 %v1749_v55, %v1745_v60  ;;  %v1613_v50 = vmul.f32 %v1357_v45, %v4853_v63  ;;  %v6477_v7 = vunpack.c.h.bf16 %v4578_v22  ;;  %2114 = vmatpush2.bf16.msra.mxu1 %v1892_v30  ;;  %2042 = vmatprep.subr.bf16.mxu0 %v1825_v25 }
 0x177   : > { %v1748_v35 = vmul.f32 %v6475_v59, %v4881_v58  ;;  %v1609_v26 = vmul.f32 %v6476_v32, %v4853_v63  ;;  %v1741_v10 = vmul.f32 %v1485_v29, %v4858_v48  ;;  %v6478_v56 = vunpack.c.l.bf16 %v4486_v57  ;;  %v5003_v59 = vld [vmem:[%s4165_s11 + $0x2c8] sm:$0xff] }
 0x178   : > { %v1737_v36 = vmul.f32 %v6477_v7, %v4858_v48  ;;  %v1824_v46 = vpack.c.bf16 %v1620_v61, %v1616_v2  ;;  %v6479_v45 = vunpack.c.l.bf16 %v4558_v44  ;;  %v6480_v34 = vunpack.c.l.bf16 %v4578_v22  ;;  %2115 = vmatprep.subr.bf16.mxu1 %v1889_v18  ;;  %v5205_v18 = vld [vmem:[%s4165_s11 + $0x28] sm:$0xff] }
 0x179   : > { %v1608_v60 = vmul.f32 %v6478_v56, %v4869_v17  ;;  %v1888_v55 = vpack.c.bf16 %v1748_v35, %v1744_v27  ;;  %v1821_v29 = vpack.c.bf16 %v1613_v50, %v1609_v26  ;;  %v6481_v57 = vunpack.c.l.bf16 %v4702_v12 }
 0x17a   : > { %v1612_v5 = vmul.f32 %v6479_v45, %v4869_v17  ;;  %v1736_v1 = vmul.f32 %v6480_v34, %v4881_v58  ;;  %v6482_v33 = vunpack.c.h.bf16 %v4764_v23  ;;  %v1885_v61 = vpack.c.bf16 %v1741_v10, %v1737_v36  ;;  %2043 = vmatpush2.bf16.msra.mxu0 %v1824_v46 }
 0x17b   : > { %v1740_v32 = vmul.f32 %v6481_v57, %v4881_v58  ;;  %v6483_v22 = vunpack.c.h.bf16 %v4767_v31  ;;  %v6484_v30 = vunpack.c.h.bf16 %v4773_v11  ;;  %v6485_v12 = vunpack.c.h.bf16 %v4776_v49  ;;  %2116 = vmatpush2.bf16.msra.mxu1 %v1888_v55  ;;  %2044 = vmatprep.subr.bf16.mxu0 %v1821_v29 }
 0x17c   : > { %v1601_v2 = vmul.f32 %v6482_v33, %v4853_v63  ;;  %v1820_v26 = vpack.c.bf16 %v1612_v5, %v1608_v60  ;;  %v6486_v7 = vunpack.c.l.bf16 %v4764_v23  ;;  %v6487_v10 = vunpack.c.l.bf16 %v4767_v31  ;;  %2117 = vmatprep.subr.bf16.mxu1 %v1885_v61 }
 0x17d   : > { %v1605_v27 = vmul.f32 %v6483_v22, %v4853_v63  ;;  %v1729_v25 = vmul.f32 %v6484_v30, %v4858_v48  ;;  %v1733_v35 = vmul.f32 %v6485_v12, %v4858_v48  ;;  %v1884_v50 = vpack.c.bf16 %v1740_v32, %v1736_v1 }
 0x17e   : > { %v1600_v56 = vmul.f32 %v6486_v7, %v4869_v17  ;;  %v1604_v45 = vmul.f32 %v6487_v10, %v4869_v17  ;;  %v6488_v34 = vunpack.c.l.bf16 %v4773_v11  ;;  %v6489_v60 = vunpack.c.l.bf16 %v4776_v49  ;;  %2045 = vmatpush2.bf16.msra.mxu0 %v1820_v26 }
 0x17f   : > { %v1817_v36 = vpack.c.bf16 %v1605_v27, %v1601_v2  ;;  %v6490_v23 = vunpack.c.h.bf16 %v4783_v4  ;;  %v6491_v46 = vunpack.c.h.bf16 %v4788_v51  ;;  %v6492_v31 = vunpack.c.h.bf16 %v4791_v37  ;;  %2118 = vmatpush2.bf16.msra.mxu1 %v1884_v50 }
 0x180   : > { %v1728_v57 = vmul.f32 %v6488_v34, %v4881_v58  ;;  %v1732_v5 = vmul.f32 %v6489_v60, %v4881_v58  ;;  %v743_v11 = vrot.slane %v4944_v62, 4  ;;  %v1881_v2 = vpack.c.bf16 %v1733_v35, %v1729_v25 }
 0x181   : > { %v1593_v1 = vmul.f32 %v6490_v23, %v4853_v63  ;;  %v1597_v32 = vmul.f32 %v6491_v46, %v4853_v63  ;;  %v1721_v33 = vmul.f32 %v6492_v31, %v4858_v48  ;;  %v6493_v49 = vunpack.c.h.bf16 %v4797_v24  ;;  %2046 = vmatprep.subr.bf16.mxu0 %v1817_v36 }
 0x182   : > { %v6494_v29 = vunpack.c.l.bf16 %v4783_v4  ;;  %v6495_v27 = vunpack.c.l.bf16 %v4788_v51  ;;  %v6496_v12 = vunpack.c.l.bf16 %v4791_v37  ;;  %v6497_v61 = vunpack.c.l.bf16 %v4797_v24  ;;  %2119 = vmatprep.subr.bf16.mxu1 %v1881_v2 }
 0x183   : > { %v1725_v55 = vmul.f32 %v6493_v49, %v4858_v48  ;;  %v879_v35 = vrot.slane %v4955_v21, 4  ;;  %v737_v10 = vrot.slane %v4966_v39, 4  ;;  %v1816_v34 = vpack.c.bf16 %v1604_v45, %v1600_v56  ;;  %v5213_v49 = vld [vmem:[%s4165_s11 + $0x228] sm:$0xff] }
 0x184   : > { %v1592_v22 = vmul.f32 %v6494_v29, %v4869_v17  ;;  %v1596_v30 = vmul.f32 %v6495_v27, %v4869_v17  ;;  %v1720_v7 = vmul.f32 %v6496_v12, %v4881_v58  ;;  %v1724_v25 = vmul.f32 %v6497_v61, %v4881_v58 }
 0x185   : > { %v6498_v4 = vunpack.c.h.bf16 %v4802_v41  ;;  %v6499_v51 = vunpack.c.h.bf16 %v4808_v54  ;;  %v873_v37 = vrot.slane %v4975_v19, 4  ;;  %v1880_v24 = vpack.c.bf16 %v1732_v5, %v1728_v57  ;;  %2047 = vmatpush2.bf16.msra.mxu0 %v1816_v34 }
 0x186   : > { %v1813_v46 = vpack.c.bf16 %v1597_v32, %v1593_v1  ;;  %v1877_v31 = vpack.c.bf16 %v1725_v55, %v1721_v33  ;;  %v1812_v26 = vpack.c.bf16 %v1596_v30, %v1592_v22  ;;  %v1876_v56 = vpack.c.bf16 %v1724_v25, %v1720_v7  ;;  %v5082_v32 = vld [vmem:[%s4165_s11 + $0x2d8] sm:$0xff] }
 0x187   : > { %v1585_v60 = vmul.f32 %v6498_v4, %v4853_v63  ;;  %v1589_v23 = vmul.f32 %v6499_v51, %v4853_v63  ;;  %v6500_v45 = vunpack.c.h.bf16 %v4811_v20  ;;  %v6501_v27 = vunpack.c.h.bf16 %v4818_v43  ;;  %2120 = vmatpush2.bf16.msra.mxu1 %v1880_v24  ;;  %v5104_v24 = vld [vmem:[%s4165_s11 + $0x2a8] sm:$0xff]  ;;  %v3399_v4 = vld [vmem:[#allocation12 + $0x20] ss:$16 sps:$4 sm:$0xff]   ;;  %v5223_v63 = vld [vmem:[%s4165_s11 + $0x238] sm:$0xff] }
 0x188   : > { %v6502_v50 = vunpack.c.l.bf16 %v4802_v41  ;;  %v744_v57 = vadd.f32 %v4944_v62, %v743_v11  ;;  %v880_v5 = vadd.f32 %v4955_v21, %v879_v35  ;;  %v738_v1 = vadd.f32 %v4966_v39, %v737_v10  ;;  %v5092_v11 = vld [vmem:[%s4165_s11 + $0xa8] sm:$0xff]  ;;  %2048 = vmatprep.subr.bf16.mxu0 %v1813_v46  ;;  %2121 = vmatprep.subr.bf16.mxu1 %v1877_v31 }
 0x189   : > { %v1713_v29 = vmul.f32 %v6500_v45, %v4858_v48  ;;  %v1717_v12 = vmul.f32 %v6501_v27, %v4858_v48  ;;  %v1809_v33 = vpack.c.bf16 %v1589_v23, %v1585_v60  ;;  %v6503_v2 = vunpack.c.l.bf16 %v4808_v54  ;;  %v5098_v54 = vld [vmem:[%s4165_s11 + $0xb8] sm:$0xff]  ;;  %2049 = vmatpush2.bf16.msra.mxu0 %v1812_v26  ;;  %v5112_v26 = vld [vmem:[%s4165_s11 + $0x88] sm:$0xff] }
 0x18a   : > { %v1584_v36 = vmul.f32 %v6502_v50, %v4869_v17  ;;  %v6504_v22 = vunpack.c.l.bf16 %v4811_v20  ;;  %v874_v30 = vadd.f32 %v4975_v19, %v873_v37  ;;  %v6505_v7 = vunpack.c.l.bf16 %v4818_v43  ;;  %v3389_v50 = vld [vmem:[#allocation12] ss:$16 sps:$4 sm:$0xff]   ;;  %v5271_v48 = vld [vmem:[#allocation12 + $0x6c] ss:$16 sps:$4 sm:$0xff]  }
 0x18b   : > { %v1588_v55 = vmul.f32 %v6503_v2, %v4869_v17  ;;  %v745_v25 = vrot.slane %v744_v57, 2  ;;  %v881_v35 = vrot.slane %v880_v5, 2  ;;  %v739_v10 = vrot.slane %v738_v1, 2  ;;  %2122 = vmatpush2.bf16.msra.mxu1 %v1876_v56  ;;  %2050 = vmatprep.subr.bf16.mxu0 %v1809_v33  ;;  %v5118_v56 = vld [vmem:[%s4165_s11 + $0x98] sm:$0xff]  ;;  %v5157_v43 = vld [vmem:[%s4173_s20 + $0x70] sm:$0xff] }
 0x18c   : > { %v1712_v41 = vmul.f32 %v6504_v22, %v4881_v58  ;;  %v1716_v61 = vmul.f32 %v6505_v7, %v4881_v58  ;;  %v1873_v20 = vpack.c.bf16 %v1717_v12, %v1713_v29  ;;  %v875_v34 = vrot.slane %v874_v30, 2  ;;  %v5109_v29 = vld [vmem:[%s4165_s11 + $0x2b8] sm:$0xff]  ;;  %6507 = vst [vmem:[#allocation31_spill] sm:$0xff] %v5157_v43  ;;  %v5176_v22 = vld [vmem:[%s4165_s11 + $0x48] sm:$0xff] }
 0x18d   : > { %v746_v51 = vadd.f32 %v745_v25, %v744_v57  ;;  %v882_v23 = vadd.f32 %v881_v35, %v880_v5  ;;  %v740_v37 = vadd.f32 %v739_v10, %v738_v1  ;;  %v1808_v46 = vpack.c.bf16 %v1588_v55, %v1584_v36  ;;  %v5121_v33 = vld [vmem:[%s4173_s20 + $0x38] sm:$0xff]  ;;  %v5126_v10 = vld [vmem:[%s4165_s11 + $0x288] sm:$0xff] }
 0x18e   : > { %v876_v45 = vadd.f32 %v875_v34, %v874_v30  ;;  %v1872_v12 = vpack.c.bf16 %v1716_v61, %v1712_v41  ;;  %2123 = vmatprep.subr.bf16.mxu1 %v1873_v20  ;;  %v664_v41 = vld [vmem:[%s4167_s1 + $0x38] sm:$0xff]  ;;  %v5161_v35 = vld [vmem:[%s4165_s11 + $0x268] sm:$0xff] }
 0x18f   : > { %v747_v57 = vrot.slane %v746_v51, 1  ;;  %v883_v5 = vrot.slane %v882_v23, 1  ;;  %v741_v1 = vrot.slane %v740_v37, 1  ;;  %v3392_v30 = vld [vmem:[#allocation12 + $0x8] ss:$16 sps:$4 sm:$0xff]   ;;  %2051 = vmatpush2.bf16.msra.mxu0 %v1808_v46  ;;  %v663_v46 = vld [vmem:[%s4167_s1 + $0x30] sm:$0xff] }
 0x190   : > { %v877_v36 = vrot.slane %v876_v45, 1  ;;  %v5129_v20 = vld [vmem:[%s4165_s11 + $0x298] sm:$0xff]  ;;  %2124 = vmatpush2.bf16.msra.mxu1 %v1872_v12 }
 0x191   : > { %v748_v7 = vadd.f32 %v747_v57, %v746_v51  ;;  %v884_v61 = vadd.f32 %v883_v5, %v882_v23  ;;  %v742_v25 = vadd.f32 %v741_v1, %v740_v37  ;;  %v5135_v51 = vld [vmem:[%s4173_s20 + $0x78] sm:$0xff]  ;;  %v3395_v37 = vld [vmem:[#allocation12 + $0x24] ss:$16 sps:$4 sm:$0xff]   ;;  %v5147_v1 = vmul.f32 %v664_v41, %v5121_v33 }
 0x192   : > { %v878_v34 = vadd.f32 %v877_v36, %v876_v45  ;;  %v672_v23 = vld [vmem:[%s4167_s1 + $0x78] sm:$0xff]  ;;  %v5141_v45 = vld [vmem:[%s4165_s11 + $0x68] sm:$0xff]  ;;  %v5153_v57 = vld [vmem:[%s4173_s20 + $0x30] sm:$0xff]  ;;  %2053 = vmatmul.mubr.bf16.vlgmr.msra.gmra.mxu0 %v3389_v50 }
 0x193   : > { %3477 = vrcp.f32 %v748_v7  ;;  %v5144_v5 = vld [vmem:[%s4165_s11 + $0x78] sm:$0xff]  ;;  %6506 = vst [vmem:[#allocation27_spill] sm:$0xff] %v5153_v57  ;;  %v775_v31 = vrot.slane %v5147_v1, 4  ;;  %v5168_v12 = vmul.f32 %v672_v23, %v5135_v51  ;;  %v671_v7 = vld [vmem:[%s4167_s1 + $0x70] sm:$0xff]  ;;  %2126 = vmatmul.mubr.bf16.vlgmr.msra.gmra.mxu1 %v3392_v30  ;;  %2062 = vmatprep.mubr.bf16.mxu0 %v3395_v37 }
 0x194   : > { %v3397_v36 = vld [vmem:[#allocation12 + $0x2c] ss:$16 sps:$4 sm:$0xff]   ;;  %3479 = vrcp.f32 %v884_v61  ;;  %v5190_v41 = vmul.f32 %v671_v7, %v5157_v43 }
 0x195   : > { %3481 = vrcp.f32 %v742_v25  ;;  %v5164_v61 = vld [vmem:[%s4165_s11 + $0x278] sm:$0xff]  ;;  %v776_v23 = vmax.f32 %v5147_v1, %v775_v31  ;;  %v911_v30 = vrot.slane %v5168_v12, 4  ;;  %2135 = vmatprep.mubr.bf16.mxu1 %v3397_v36  ;;  %v5194_v31 = vld [vmem:[%s4165_s11 + $0x248] sm:$0xff] }
 0x196   : > { %3483 = vrcp.f32 %v878_v34  ;;  %v5179_v2 = vld [vmem:[%s4165_s11 + $0x58] sm:$0xff]  ;;  %v5184_v34 = vmul.f32 %v663_v46, %v5153_v57  ;;  %v905_v50 = vrot.slane %v5190_v41, 4 }
 0x197   : > { %v5197_v36 = vld [vmem:[%s4165_s11 + $0x258] sm:$0xff]  ;;  %v777_v27 = vrot.slane %v776_v23, 2  ;;  %v912_v46 = vmax.f32 %v5168_v12, %v911_v30 }
 0x198   : > { %v769_v55 = vrot.slane %v5184_v34, 4  ;;  %v5210_v30 = vld [vmem:[%s4165_s11 + $0x38] sm:$0xff]  ;;  %v906_v28 = vmax.f32 %v5190_v41, %v905_v50 }
 0x199   : > { %v778_v44 = vmax.f32 %v776_v23, %v777_v27  ;;  %v913_v25 = vrot.slane %v912_v46, 2  ;;  %v5226_v27 = vld [vmem:[%s4165_s11 + $0x8] sm:$0xff]  ;;  %v5233_v50 = vld [vmem:[%s4165_s11 + $0x18] sm:$0xff] }
 0x19a   : > { %v770_v37 = vmax.f32 %v5184_v34, %v769_v55  ;;  %2063 = vmatmul.mubr.bf16.gmra.mxu0 %v3399_v4  ;;  %v907_v43 = vrot.slane %v906_v28, 2  ;;  %v5253_v57 = vld [vmem:[#allocation12 + $0x48] ss:$16 sps:$4 sm:$0xff]  }
 0x19b   : > { %v779_v55 = vrot.slane %v778_v44, 1  ;;  %v914_v23 = vmax.f32 %v912_v46, %v913_v25  ;;  %2136 = vmatmul.mubr.bf16.gmra.mxu1 %v3400_v47  ;;  %2072 = vmatprep.mubr.bf16.mxu0 %v3401_v15 }
 0x19c   : > { %v771_v42 = vrot.slane %v770_v37, 2  ;;  %2145 = vmatprep.mubr.bf16.mxu1 %v3403_v16  ;;  %v5247_v16 = vld [vmem:[#allocation12 + $0x40] ss:$16 sps:$4 sm:$0xff]  }
 0x19d   : > { %v780_v60 = vmax.f32 %v778_v44, %v779_v55  ;;  %v915_v17 = vrot.slane %v914_v23, 1 }
 0x19f   : > { %v784_v44 = vsub.f32 %v5147_v1, %v780_v60  ;;  %v5245_v55 = vmax.f32 %v914_v23, %v915_v17  ;;  %v5259_v60 = vmax.f32 %v770_v37, %v771_v42  ;;  %v5261_v1 = vmax.f32 %v906_v28, %v907_v43  ;;  %v5263_v23 = vld [vmem:[#allocation12 + $0x64] ss:$16 sps:$4 sm:$0xff]  }
 0x1a0   : > { %v3478_v4 = vpop.eup %3477  ;;  %v6511_v28 = vunpack.c.h.bf16 %v4829_v9  ;;  %v6514_v37 = vunpack.c.h.bf16 %v4838_v40 }
 0x1a1   : > { %v3480_v15 = vpop.eup %3479  ;;  %v756_v6 = vmul.f32 %v3478_v4, %v4944_v62  ;;  %v3519_v4 = vld [vmem:[%s4173_s20 + $0x18] sm:$0xff]  ;;  %v791_v46 = vmul.f32 1.442695, %v784_v44 }
 0x1a2   : > { %v3482_v7 = vpop.eup %3481  ;;  %v892_v25 = vmul.f32 %v3480_v15, %v4955_v21  ;;  %2073 = vmatmul.mubr.bf16.gmra.mxu0 %v5247_v16 }
 0x1a3   : > { %v3484_v62 = vpop.eup %3483  ;;  %v5256_v58 = vmul.f32 %v3519_v4, %v756_v6  ;;  %v754_v17 = vmul.f32 %v3482_v7, %v4966_v39  ;;  %v6510_v6 = vunpack.c.h.bf16 %v4826_v14  ;;  %2146 = vmatmul.mubr.bf16.gmra.mxu1 %v5253_v57  ;;  %2082 = vmatprep.mubr.bf16.mxu0 %v5263_v23  ;;  %3485 = vpow2.f32 %v791_v46 }
 0x1a4   : > { %v5266_v21 = vmul.f32 %v892_v25, %v4719_v53  ;;  %v890_v15 = vmul.f32 %v3484_v62, %v4975_v19  ;;  %v6513_v53 = vunpack.c.h.bf16 %v4911_v52  ;;  %v6515_v25 = vunpack.c.h.bf16 %v4845_v3  ;;  %2155 = vmatprep.mubr.bf16.mxu1 %v5271_v48 }
 0x1a5   : > { %6508 = vst [vmem:[#allocation32_spill] sm:$0xff] %v5256_v58  ;;  %v1579_v42 = vmul.f32 %v6510_v6, %v5256_v58  ;;  %v1583_v39 = vmul.f32 %v6511_v28, %v5256_v58  ;;  %v5280_v43 = vmul.f32 %v754_v17, %v4746_v8  ;;  %v6517_v8 = vunpack.c.h.bf16 %v4964_v13 }
 0x1a6   : > { %6509 = vst [vmem:[#allocation33_spill] sm:$0xff] %v5266_v21  ;;  %v1571_v19 = vmul.f32 %v6513_v53, %v5256_v58  ;;  %v1707_v7 = vmul.f32 %v6514_v37, %v5266_v21  ;;  %v1711_v44 = vmul.f32 %v6515_v25, %v5266_v21  ;;  %v5293_v62 = vmul.f32 %v890_v15, %v4750_v38 }
 0x1a7   : > { %6512 = vst [vmem:[#allocation34_spill] sm:$0xff] %v5280_v43  ;;  %v1575_v4 = vmul.f32 %v6517_v8, %v5256_v58  ;;  %v1807_v17 = vpack.c.bf16 %v1583_v39, %v1579_v42  ;;  %v6518_v6 = vunpack.c.l.bf16 %v4826_v14  ;;  %v6519_v53 = vunpack.c.l.bf16 %v4829_v9 }
 0x1a8   : > { %6516 = vst [vmem:[#allocation39_spill] sm:$0xff] %v5293_v62  ;;  %v6520_v25 = vunpack.c.h.bf16 %v5003_v59  ;;  %v1871_v15 = vpack.c.bf16 %v1711_v44, %v1707_v7  ;;  %v6521_v8 = vunpack.c.l.bf16 %v4838_v40  ;;  %v6522_v42 = vunpack.c.l.bf16 %v4845_v3 }
 0x1a9   : > { %v1578_v28 = vmul.f32 %v6518_v6, %v5280_v43  ;;  %v1582_v37 = vmul.f32 %v6519_v53, %v5280_v43  ;;  %v1803_v39 = vpack.c.bf16 %v1575_v4, %v1571_v19  ;;  %2166 = vmatprep.subr.bf16.mxu0 %v1807_v17  ;;  %v6523_v6 = vunpack.c.h.bf16 %v5082_v32 }
 0x1aa   : > { %v1699_v38 = vmul.f32 %v6520_v25, %v5266_v21  ;;  %v1706_v47 = vmul.f32 %v6521_v8, %v5293_v62  ;;  %v1710_v14 = vmul.f32 %v6522_v42, %v5293_v62  ;;  %v6524_v7 = vunpack.c.l.bf16 %v4911_v52  ;;  %2239 = vmatprep.subr.bf16.mxu1 %v1871_v15  ;;  %v5334_v52 = vld [vmem:[#allocation12 + $0x60] ss:$16 sps:$4 sm:$0xff]  }
 0x1ab   : > { %v1806_v9 = vpack.c.bf16 %v1582_v37, %v1578_v28  ;;  %v1703_v53 = vmul.f32 %v6523_v6, %v5266_v21  ;;  %v6525_v40 = vunpack.c.l.bf16 %v4964_v13  ;;  %v6526_v19 = vunpack.c.l.bf16 %v5003_v59  ;;  %2083 = vmatmul.mubr.bf16.gmra.mxu0 %v5334_v52 }
 0x1ac   : > { %v1570_v44 = vmul.f32 %v6524_v7, %v5280_v43  ;;  %v1870_v3 = vpack.c.bf16 %v1710_v14, %v1706_v47  ;;  %v6527_v17 = vunpack.c.l.bf16 %v5082_v32  ;;  %v6528_v37 = vunpack.c.h.bf16 %v5092_v11 }
 0x1ad   : > { %v1574_v25 = vmul.f32 %v6525_v40, %v5280_v43  ;;  %v1698_v4 = vmul.f32 %v6526_v19, %v5293_v62  ;;  %2167 = vmatpush1.bf16.msra.mxu0 %v1806_v9  ;;  %v1867_v42 = vpack.c.bf16 %v1703_v53, %v1699_v38  ;;  %v6529_v47 = vunpack.c.h.bf16 %v5098_v54 }
 0x1ae   : > { %v1702_v28 = vmul.f32 %v6527_v17, %v5293_v62  ;;  %v1563_v8 = vmul.f32 %v6528_v37, %v5256_v58  ;;  %v6530_v59 = vunpack.c.h.bf16 %v5104_v24  ;;  %2240 = vmatpush1.bf16.msra.mxu1 %v1870_v3  ;;  %2168 = vmatprep.subr.bf16.mxu0 %v1803_v39  ;;  %v6531_v6 = vunpack.c.h.bf16 %v5109_v29 }
 0x1af   : > { %v1802_v13 = vpack.c.bf16 %v1574_v25, %v1570_v44  ;;  %v1567_v15 = vmul.f32 %v6529_v47, %v5256_v58  ;;  %v6532_v9 = vunpack.c.l.bf16 %v5092_v11  ;;  %2241 = vmatprep.subr.bf16.mxu1 %v1867_v42  ;;  %v6533_v44 = vunpack.c.l.bf16 %v5098_v54 }
 0x1b0   : > { %v1691_v14 = vmul.f32 %v6530_v59, %v5266_v21  ;;  %v1866_v32 = vpack.c.bf16 %v1702_v28, %v1698_v4  ;;  %v1695_v7 = vmul.f32 %v6531_v6, %v5266_v21  ;;  %v6534_v25 = vunpack.c.l.bf16 %v5104_v24  ;;  %v5367_v24 = vld [vmem:[#allocation12 + $0x68] ss:$16 sps:$4 sm:$0xff]  }
 0x1b1   : > { %v1562_v38 = vmul.f32 %v6532_v9, %v5280_v43  ;;  %v1799_v53 = vpack.c.bf16 %v1567_v15, %v1563_v8  ;;  %v1566_v40 = vmul.f32 %v6533_v44, %v5280_v43  ;;  %v6535_v3 = vunpack.c.l.bf16 %v5109_v29  ;;  %2169 = vmatpush1.bf16.msra.mxu0 %v1802_v13  ;;  %2156 = vmatmul.mubr.bf16.gmra.mxu1 %v5367_v24 }
 0x1b2   : > { %v1690_v39 = vmul.f32 %v6534_v25, %v5293_v62  ;;  %v1863_v4 = vpack.c.bf16 %v1695_v7, %v1691_v14  ;;  %v6536_v11 = vunpack.c.h.bf16 %v5112_v26  ;;  %v6537_v46 = vunpack.c.h.bf16 %v5118_v56  ;;  %2242 = vmatpush1.bf16.msra.mxu1 %v1866_v32 }
 0x1b3   : > { %v1694_v19 = vmul.f32 %v6535_v3, %v5293_v62  ;;  %v6538_v54 = vunpack.c.h.bf16 %v5126_v10  ;;  %v1798_v29 = vpack.c.bf16 %v1566_v40, %v1562_v38  ;;  %v6539_v42 = vunpack.c.h.bf16 %v5129_v20  ;;  %2170 = vmatprep.subr.bf16.mxu0 %v1799_v53 }
 0x1b4   : > { %v1555_v17 = vmul.f32 %v6536_v11, %v5256_v58  ;;  %v1559_v28 = vmul.f32 %v6537_v46, %v5256_v58  ;;  %v6540_v15 = vunpack.c.l.bf16 %v5112_v26  ;;  %v6541_v6 = vunpack.c.l.bf16 %v5118_v56  ;;  %2243 = vmatprep.subr.bf16.mxu1 %v1863_v4 }
 0x1b5   : > { %v1683_v37 = vmul.f32 %v6538_v54, %v5266_v21  ;;  %v1862_v8 = vpack.c.bf16 %v1694_v19, %v1690_v39  ;;  %v1687_v47 = vmul.f32 %v6539_v42, %v5266_v21  ;;  %v6542_v13 = vunpack.c.l.bf16 %v5126_v10  ;;  %2171 = vmatpush1.bf16.msra.mxu0 %v1798_v29 }
 0x1b6   : > { %v1554_v59 = vmul.f32 %v6540_v15, %v5280_v43  ;;  %v1795_v14 = vpack.c.bf16 %v1559_v28, %v1555_v17  ;;  %v1558_v7 = vmul.f32 %v6541_v6, %v5280_v43  ;;  %v6543_v38 = vsub.f32 %v5168_v12, %v5245_v55 }
 0x1b7   : > { %v1682_v9 = vmul.f32 %v6542_v13, %v5293_v62  ;;  %v1859_v40 = vpack.c.bf16 %v1687_v47, %v1683_v37  ;;  %v6544_v26 = vunpack.c.l.bf16 %v5129_v20  ;;  %v6545_v53 = vunpack.c.h.bf16 %v5141_v45  ;;  %2244 = vmatpush1.bf16.msra.mxu1 %v1862_v8 }
 0x1b8   : > { %v927_v44 = vmul.f32 1.442695, %v6543_v38  ;;  %v6546_v56 = vunpack.c.h.bf16 %v5144_v5  ;;  %v6547_v10 = vunpack.c.h.bf16 %v5161_v35  ;;  %v6548_v12 = vunpack.c.h.bf16 %v5164_v61  ;;  %2172 = vmatprep.subr.bf16.mxu0 %v1795_v14 }
 0x1b9   : > { %v1686_v32 = vmul.f32 %v6544_v26, %v5293_v62  ;;  %v1547_v25 = vmul.f32 %v6545_v53, %v5256_v58  ;;  %v6549_v20 = vunpack.c.l.bf16 %v5141_v45  ;;  %v773_v4 = vrot.slane %v5259_v60, 1  ;;  %2245 = vmatprep.subr.bf16.mxu1 %v1859_v40  ;;  %v3520_v26 = vld [vmem:[#allocation12 + $0x4] ss:$16 sps:$4 sm:$0xff]  }
 0x1ba   : > { %v1551_v39 = vmul.f32 %v6546_v56, %v5256_v58  ;;  %v1675_v3 = vmul.f32 %v6547_v10, %v5266_v21  ;;  %v1679_v55 = vmul.f32 %v6548_v12, %v5266_v21  ;;  %v1794_v11 = vpack.c.bf16 %v1558_v7, %v1554_v59  ;;  %v1203_v7 = vld [vmem:[%s4165_s11 + $0x218] sm:$0xff]  ;;  %2198 = vmatprep.mubr.bf16.mxu0 %v3520_v26 }
 0x1bb   : > { %v1546_v19 = vmul.f32 %v6549_v20, %v5280_v43  ;;  %v1858_v17 = vpack.c.bf16 %v1686_v32, %v1682_v9  ;;  %v6550_v46 = vunpack.c.l.bf16 %v5144_v5  ;;  %v6551_v54 = vunpack.c.l.bf16 %v5161_v35 }
 0x1bc   : > { %v1791_v45 = vpack.c.bf16 %v1551_v39, %v1547_v25  ;;  %v6552_v42 = vunpack.c.l.bf16 %v5164_v61  ;;  %v6553_v29 = vunpack.c.h.bf16 %v5176_v22  ;;  %3487 = vpow2.f32 %v927_v44  ;;  %2173 = vmatpush1.bf16.msra.mxu0 %v1794_v11  ;;  %v5445_v11 = vpop.eup %3485 }
 0x1bd   : > { %v1550_v28 = vmul.f32 %v6550_v46, %v5280_v43  ;;  %v1674_v37 = vmul.f32 %v6551_v54, %v5293_v62  ;;  %v1855_v59 = vpack.c.bf16 %v1679_v55, %v1675_v3  ;;  %v6554_v5 = vunpack.c.h.bf16 %v5179_v2  ;;  %2246 = vmatpush1.bf16.msra.mxu1 %v1858_v17 }
 0x1be   : > { %v1678_v47 = vmul.f32 %v6552_v42, %v5293_v62  ;;  %v1539_v15 = vmul.f32 %v6553_v29, %v5256_v58  ;;  %v6555_v35 = vunpack.c.h.bf16 %v5194_v31  ;;  %v6556_v14 = vunpack.c.h.bf16 %v5197_v36  ;;  %2174 = vmatprep.subr.bf16.mxu0 %v1791_v45 }
 0x1bf   : > { %v1543_v6 = vmul.f32 %v6554_v5, %v5256_v58  ;;  %v1790_v13 = vpack.c.bf16 %v1550_v28, %v1546_v19  ;;  %v6557_v38 = vunpack.c.l.bf16 %v5176_v22  ;;  %v909_v40 = vrot.slane %v5261_v1, 1  ;;  %2247 = vmatprep.subr.bf16.mxu1 %v1855_v59 }
 0x1c0   : > { %v1667_v8 = vmul.f32 %v6555_v35, %v5266_v21  ;;  %v1671_v61 = vmul.f32 %v6556_v14, %v5266_v21  ;;  %v1854_v9 = vpack.c.bf16 %v1678_v47, %v1674_v37  ;;  %v6558_v25 = vunpack.c.l.bf16 %v5179_v2 }
 0x1c1   : > { %v1538_v44 = vmul.f32 %v6557_v38, %v5280_v43  ;;  %v1787_v32 = vpack.c.bf16 %v1543_v6, %v1539_v15  ;;  %v6559_v39 = vunpack.c.l.bf16 %v5194_v31  ;;  %v6560_v22 = vunpack.c.l.bf16 %v5197_v36  ;;  %v3521_v6 = vld [vmem:[#allocation12 + $0xc] ss:$16 sps:$4 sm:$0xff]   ;;  %2175 = vmatpush1.bf16.msra.mxu0 %v1790_v13 }
 0x1c2   : > { %v1851_v53 = vpack.c.bf16 %v1671_v61, %v1667_v8  ;;  %v1542_v56 = vmul.f32 %v6558_v25, %v5280_v43  ;;  %v6561_v12 = vunpack.c.h.bf16 %v5205_v18  ;;  %v6562_v20 = vunpack.c.h.bf16 %v5210_v30  ;;  %2271 = vmatprep.mubr.bf16.mxu1 %v3521_v6  ;;  %2248 = vmatpush1.bf16.msra.mxu1 %v1854_v9 }
 0x1c3   : > { %v1666_v10 = vmul.f32 %v6559_v39, %v5293_v62  ;;  %v1670_v3 = vmul.f32 %v6560_v22, %v5293_v62  ;;  %v1399_v2 = vunpack.c.h.bf16 %v1203_v7  ;;  %v6563_v31 = vunpack.c.h.bf16 %v5213_v49  ;;  %2176 = vmatprep.subr.bf16.mxu0 %v1787_v32 }
 0x1c4   : > { %v1531_v55 = vmul.f32 %v6561_v12, %v5256_v58  ;;  %v1535_v19 = vmul.f32 %v6562_v20, %v5256_v58  ;;  %v6564_v36 = vunpack.c.h.bf16 %v5223_v63  ;;  %v6565_v28 = vunpack.c.l.bf16 %v5205_v18  ;;  %2249 = vmatprep.subr.bf16.mxu1 %v1851_v53 }
 0x1c5   : > { %v1659_v17 = vmul.f32 %v6563_v31, %v5266_v21  ;;  %v6566_v37 = vunpack.c.l.bf16 %v5210_v30  ;;  %v6567_v42 = vunpack.c.l.bf16 %v5213_v49  ;;  %v6568_v29 = vunpack.c.l.bf16 %v5223_v63 }
 0x1c6   : > { %v1663_v46 = vmul.f32 %v6564_v36, %v5266_v21  ;;  %v1530_v54 = vmul.f32 %v6565_v28, %v5280_v43  ;;  %v774_v59 = vmax.f32 %v5259_v60, %v773_v4  ;;  %v910_v5 = vmax.f32 %v5261_v1, %v909_v40 }
 0x1c7   : > { %v1534_v45 = vmul.f32 %v6566_v37, %v5280_v43  ;;  %v1658_v47 = vmul.f32 %v6567_v42, %v5293_v62  ;;  %v1662_v15 = vmul.f32 %v6568_v29, %v5293_v62  ;;  %v1786_v18 = vpack.c.bf16 %v1542_v56, %v1538_v44  ;;  %v633_v37 = vld [vmem:[%s6271_s9 + $0x20] sm:$0xff]  ;;  %v634_v29 = vld [vmem:[%s6271_s9 + $0x28] sm:$0xff] }
 0x1c8   : > { %v6569_v30 = vunpack.c.h.bf16 %v5226_v27  ;;  %v6570_v49 = vunpack.c.h.bf16 %v5233_v50  ;;  %v1394_v14 = vunpack.c.l.bf16 %v5236_v0  ;;  %v1850_v63 = vpack.c.bf16 %v1670_v3, %v1666_v10 }
 0x1c9   : > { %v1783_v60 = vpack.c.bf16 %v1535_v19, %v1531_v55  ;;  %v1398_v4 = vunpack.c.l.bf16 %v1203_v7  ;;  %v811_v1 = vrot.slane %v5445_v11, 4  ;;  %v1847_v61 = vpack.c.bf16 %v1663_v46, %v1659_v17  ;;  %2177 = vmatpush1.bf16.msra.mxu0 %v1786_v18 }
 0x1ca   : > { %v1523_v35 = vmul.f32 %v6569_v30, %v5256_v58  ;;  %v1527_v8 = vmul.f32 %v6570_v49, %v5256_v58  ;;  %v1782_v13 = vpack.c.bf16 %v1534_v45, %v1530_v54  ;;  %v6571_v38 = vunpack.c.h.bf16 %v5236_v0  ;;  %2250 = vmatpush1.bf16.msra.mxu1 %v1850_v63  ;;  %v635_v54 = vld [vmem:[%s6271_s9 + $0x30] sm:$0xff]  ;;  %v5526_v49 = vld [vmem:[%s4165_s11 + $0x1e8] sm:$0xff] }
 0x1cb   : > { %v1655_v40 = vmul.f32 %v1399_v2, %v5266_v21  ;;  %v1846_v26 = vpack.c.bf16 %v1662_v15, %v1658_v47  ;;  %v812_v25 = vadd.f32 %v5445_v11, %v811_v1  ;;  %v783_v9 = vsub.f32 %v5184_v34, %v774_v59  ;;  %2178 = vmatprep.subr.bf16.mxu0 %v1783_v60  ;;  %v636_v47 = vld [vmem:[%s6271_s9 + $0x38] sm:$0xff]  ;;  %v5518_v30 = vld [vmem:[%s6271_s9 + $0x10] sm:$0xff] }
 0x1cc   : > { %v1651_v44 = vmul.f32 %v6571_v38, %v5266_v21  ;;  %v919_v32 = vsub.f32 %v5190_v41, %v910_v5  ;;  %v1779_v7 = vpack.c.bf16 %v1527_v8, %v1523_v35  ;;  %v6572_v53 = vunpack.c.l.bf16 %v5226_v27  ;;  %v5490_v41 = vpop.eup %3487  ;;  %2251 = vmatprep.subr.bf16.mxu1 %v1847_v61  ;;  %v5523_v35 = vld [vmem:[%s6271_s9 + $0x18] sm:$0xff]  ;;  %v5713_v21 = vld [vmem:[%s4165_s11 + $0x128] sm:$0xff] }
 0x1cd   : > { %v6573_v39 = vunpack.c.l.bf16 %v5233_v50  ;;  %v1650_v10 = vmul.f32 %v1394_v14, %v5293_v62  ;;  %v1654_v22 = vmul.f32 %v1398_v4, %v5293_v62  ;;  %v813_v3 = vrot.slane %v812_v25, 2  ;;  %2179 = vmatpush1.bf16.msra.mxu0 %v1782_v13  ;;  %v5529_v8 = vld [vmem:[%s4165_s11 + $0x1f8] sm:$0xff] }
 0x1ce   : > { %v1522_v56 = vmul.f32 %v6572_v53, %v5280_v43  ;;  %v789_v34 = vmul.f32 1.442695, %v783_v9  ;;  %v925_v12 = vmul.f32 1.442695, %v919_v32  ;;  %v1843_v55 = vpack.c.bf16 %v1655_v40, %v1651_v44  ;;  %2252 = vmatpush1.bf16.msra.mxu1 %v1846_v26  ;;  %2180 = vmatprep.subr.bf16.mxu0 %v1779_v7  ;;  %v5540_v44 = vld [vmem:[%s6271_s9] sm:$0xff]  ;;  %v5545_v40 = vld [vmem:[%s6271_s9 + $0x8] sm:$0xff] }
 0x1cf   : > { %v1526_v0 = vmul.f32 %v6573_v39, %v5280_v43  ;;  %v814_v20 = vadd.f32 %v813_v3, %v812_v25  ;;  %v947_v27 = vrot.slane %v5490_v41, 4  ;;  %v1842_v19 = vpack.c.bf16 %v1654_v22, %v1650_v10  ;;  %v5554_v32 = vld [vmem:[%s4165_s11 + $0x3f8] sm:$0xff] }
 0x1d0   : > { %3489 = vpow2.f32 %v789_v34  ;;  %2253 = vmatprep.subr.bf16.mxu1 %v1843_v55  ;;  %v6313_v42 = vmov 0   ;;  %v1387_v61 = vunpack.c.h.bf16 %v5526_v49  ;;  %v1391_v13 = vunpack.c.h.bf16 %v5529_v8  ;;  %v5567_v55 = vld [vmem:[%s4165_s11 + $0x1c8] sm:$0xff] }
 0x1d1   : > { %v1778_v50 = vpack.c.bf16 %v1526_v0, %v1522_v56  ;;  %3491 = vpow2.f32 %v925_v12  ;;  %v815_v2 = vrot.slane %v814_v20, 1  ;;  %v948_v31 = vadd.f32 %v5490_v41, %v947_v27  ;;  %3376 = vset.pattern.permute.xlu0 %v6313_v42  ;;  %3377 = vset.pattern.permute.xlu1 %v6313_v42  ;;  %v5573_v27 = vld [vmem:[%s4165_s11 + $0x3c8] sm:$0xff] }
 0x1d2   : > { %2254 = vmatpush1.bf16.msra.mxu1 %v1842_v19  ;;  %2579 = vperm.xlu0 %3376, %v635_v54   ;;  %v1519_v34 = vunpack.c.h.bf16 %v5554_v32  ;;  %v5590_v54 = vld [vmem:[%s4165_s11 + $0x1b8] sm:$0xff] }
 0x1d3   : > { %v816_v17 = vadd.f32 %v815_v2, %v814_v20  ;;  %v949_v36 = vrot.slane %v948_v31, 2  ;;  %2181 = vmatpush1.bf16.msra.mxu0 %v1778_v50  ;;  %2569 = vperm.xlu1 %3377, %v633_v37   ;;  %v5570_v20 = vld [vmem:[%s4165_s11 + $0x1d8] sm:$0xff]  ;;  %v5593_v37 = vld [vmem:[%s4165_s11 + $0x3a8] sm:$0xff]  ;;  %v6576_v50 = vld [vmem:[#allocation27_spill] sm:$0xff] }
 0x1d5   : > { %3493 = vrcp.f32 %v816_v17  ;;  %v950_v46 = vadd.f32 %v949_v36, %v948_v31  ;;  %v5580_v31 = vld [vmem:[%s4165_s11 + $0x3d8] sm:$0xff]  ;;  %v5656_v36 = vld [vmem:[%s4165_s11 + $0x348] sm:$0xff] }
 0x1d6   : > { %2584 = vperm.xlu0 %3376, %v636_v47   ;;  %v6578_v47 = vld [vmem:[#allocation31_spill] sm:$0xff] }
 0x1d7   : > { %v951_v28 = vrot.slane %v950_v46, 1  ;;  %2574 = vperm.xlu1 %3377, %v634_v29   ;;  %v1383_v29 = vunpack.c.h.bf16 %v5570_v20 }
 0x1d9   : > { %v952_v45 = vadd.f32 %v951_v28, %v950_v46  ;;  %v1379_v28 = vunpack.c.h.bf16 %v5567_v55 }
 0x1da   : > { %2560 = vperm.xlu0 %3376, %v5518_v30  }
 0x1db   : > { %3495 = vrcp.f32 %v952_v45  ;;  %2564 = vperm.xlu1 %3377, %v5523_v35  }
 0x1dd   : > { %v5508_v15 = vpop.eup %3489 }
 0x1de   : > { %v5510_v59 = vpop.eup %3491  ;;  %v805_v5 = vrot.slane %v5508_v15, 4  ;;  %2552 = vperm.xlu0 %3376, %v5540_v44  }
 0x1df   : > { %v941_v6 = vrot.slane %v5510_v59, 4  ;;  %2556 = vperm.xlu1 %3377, %v5545_v40  }
 0x1e0   : > { %v806_v18 = vadd.f32 %v5508_v15, %v805_v5  ;;  %v5653_v5 = vld [vmem:[%s4165_s11 + $0x158] sm:$0xff] }
 0x1e1   : > { %v942_v14 = vadd.f32 %v5510_v59, %v941_v6  ;;  %v5599_v6 = vld [vmem:[%s4165_s11 + $0x3b8] sm:$0xff] }
 0x1e2   : > { %v807_v63 = vrot.slane %v806_v18, 2  ;;  %v3494_v60 = vpop.eup %3493 }
 0x1e3   : > { %v943_v4 = vrot.slane %v942_v14, 2  ;;  %v824_v1 = vmul.f32 %v3494_v60, %v5445_v11  ;;  %v5551_v11 = vld [vmem:[%s4165_s11 + $0x3e8] sm:$0xff]  ;;  %v1511_v60 = vunpack.c.h.bf16 %v5580_v31 }
 0x1e4   : > { %v808_v38 = vadd.f32 %v807_v63, %v806_v18  ;;  %v1515_v0 = vunpack.c.h.bf16 %v5551_v11  ;;  %v5602_v18 = vld [vmem:[%s4165_s11 + $0x188] sm:$0xff] }
 0x1e5   : > { %v944_v26 = vadd.f32 %v943_v4, %v942_v14  ;;  %v5548_v25 = vmul.f32 %v824_v1, %v5121_v33  ;;  %v1507_v14 = vunpack.c.h.bf16 %v5573_v27  ;;  %v5609_v1 = vld [vmem:[%s4165_s11 + $0x198] sm:$0xff] }
 0x1e6   : > { %v809_v9 = vrot.slane %v808_v38, 1 }
 0x1e7   : > { %6574 = vst [vmem:[#allocation40_spill] sm:$0xff] %v5548_v25  ;;  %v945_v7 = vrot.slane %v944_v26, 1  ;;  %v1643_v53 = vmul.f32 %v1387_v61, %v5548_v25  ;;  %v1647_v56 = vmul.f32 %v1391_v13, %v5548_v25  ;;  %v5612_v61 = vld [vmem:[%s4165_s11 + $0x388] sm:$0xff] }
 0x1e8   : > { %v810_v39 = vadd.f32 %v809_v9, %v808_v38  ;;  %v3496_v33 = vpop.eup %3495  ;;  %v5646_v38 = vld [vmem:[%s4165_s11 + $0x148] sm:$0xff]  ;;  %v6580_v9 = vunpack.c.l.bf16 %v5526_v49 }
 0x1e9   : > { %v946_v10 = vadd.f32 %v945_v7, %v944_v26  ;;  %v1839_v22 = vpack.c.bf16 %v1647_v56, %v1643_v53  ;;  %v960_v3 = vmul.f32 %v3496_v33, %v5490_v41  ;;  %v1375_v26 = vunpack.c.h.bf16 %v5590_v54  ;;  %v5619_v7 = vld [vmem:[%s4165_s11 + $0x398] sm:$0xff]  ;;  %v5622_v53 = vld [vmem:[%s4165_s11 + $0x168] sm:$0xff] }
 0x1ea   : > { %3497 = vrcp.f32 %v810_v39  ;;  %v1499_v56 = vunpack.c.h.bf16 %v5593_v37  ;;  %v1503_v33 = vunpack.c.h.bf16 %v5599_v6  ;;  %v1639_v39 = vmul.f32 %v1383_v29, %v5548_v25 }
 0x1eb   : > { %3499 = vrcp.f32 %v946_v10  ;;  %2182 = vmatprep.subr.bf16.mxu0 %v1839_v22  ;;  %v5564_v12 = vmul.f32 %v960_v3, %v5135_v51  ;;  %v5583_v51 = vld [vmem:[%s4165_s11 + $0x1a8] sm:$0xff]  ;;  %v5629_v10 = vld [vmem:[%s4165_s11 + $0x178] sm:$0xff]  ;;  %v1363_v3 = vunpack.c.h.bf16 %v5602_v18 }
 0x1ec   : > { %v1371_v13 = vunpack.c.h.bf16 %v5583_v51  ;;  %v5632_v22 = vld [vmem:[%s4165_s11 + $0x368] sm:$0xff]  ;;  %v1359_v63 = vunpack.c.h.bf16 %v5629_v10 }
 0x1ed   : > { %6575 = vst [vmem:[#allocation41_spill] sm:$0xff] %v5564_v12  ;;  %v1771_v19 = vmul.f32 %v1515_v0, %v5564_v12  ;;  %v1775_v2 = vmul.f32 %v1519_v34, %v5564_v12  ;;  %v1635_v0 = vmul.f32 %v1379_v28, %v5548_v25  ;;  %v1631_v28 = vmul.f32 %v1375_v26, %v5548_v25 }
 0x1ee   : > { %v6584_v26 = vunpack.c.l.bf16 %v5551_v11  ;;  %v1759_v11 = vmul.f32 %v1503_v33, %v5564_v12 }
 0x1ef   : > { %v1903_v45 = vpack.c.bf16 %v1775_v2, %v1771_v19  ;;  %v1367_v19 = vunpack.c.h.bf16 %v5609_v1 }
 0x1f1   : > { %2255 = vmatprep.subr.bf16.mxu1 %v1903_v45  ;;  %v5639_v45 = vld [vmem:[%s4165_s11 + $0x378] sm:$0xff]  ;;  %v1623_v33 = vmul.f32 %v1367_v19, %v5548_v25  ;;  %v6592_v19 = vunpack.c.h.bf16 %v5612_v61 }
 0x1f7   : > { %v3498_v42 = vpop.eup %3497 }
 0x1f8   : > { %v3500_v4 = vpop.eup %3499  ;;  %v822_v34 = vmul.f32 %v3498_v42, %v5508_v15  ;;  %v1763_v42 = vmul.f32 %v1507_v14, %v5564_v12  ;;  %v1767_v15 = vmul.f32 %v1511_v60, %v5564_v12  ;;  %v6582_v60 = vunpack.c.l.bf16 %v5567_v55 }
 0x1f9   : > { %v958_v41 = vmul.f32 %v3500_v4, %v5510_v59  ;;  %v1835_v59 = vpack.c.bf16 %v1639_v39, %v1635_v0  ;;  %v1627_v4 = vmul.f32 %v1371_v13, %v5548_v25  ;;  %v5694_v13 = vld [vmem:[%s4165_s11 + $0x358] sm:$0xff]  ;;  %v6586_v39 = vunpack.c.l.bf16 %v5573_v27 }
 0x1fa   : > { %v5671_v17 = vmul.f32 %v822_v34, %v6576_v50  ;;  %v6581_v50 = vunpack.c.l.bf16 %v5529_v8  ;;  %v6587_v0 = vunpack.c.l.bf16 %v5580_v31  ;;  %v6588_v31 = vunpack.c.l.bf16 %v5583_v51 }
 0x1fb   : > { %v5677_v46 = vmul.f32 %v958_v41, %v6578_v47  ;;  %v6583_v41 = vunpack.c.l.bf16 %v5570_v20  ;;  %v1831_v2 = vpack.c.bf16 %v1631_v28, %v1627_v4  ;;  %v6590_v28 = vunpack.c.l.bf16 %v5593_v37 }
 0x1fc   : > { %6577 = vst [vmem:[#allocation27_spill] sm:$0xff] %v5671_v17  ;;  %v1642_v29 = vmul.f32 %v6580_v9, %v5671_v17  ;;  %v1646_v14 = vmul.f32 %v6581_v50, %v5671_v17  ;;  %v1634_v34 = vmul.f32 %v6582_v60, %v5671_v17  ;;  %v6585_v9 = vunpack.c.l.bf16 %v5554_v32 }
 0x1fd   : > { %6579 = vst [vmem:[#allocation31_spill] sm:$0xff] %v5677_v46  ;;  %v1638_v47 = vmul.f32 %v6583_v41, %v5671_v17  ;;  %v1770_v49 = vmul.f32 %v6584_v26, %v5677_v46  ;;  %v1762_v55 = vmul.f32 %v6586_v39, %v5677_v46  ;;  %v1766_v20 = vmul.f32 %v6587_v0, %v5677_v46 }
 0x1fe   : > { %v1774_v8 = vmul.f32 %v6585_v9, %v5677_v46  ;;  %v1838_v50 = vpack.c.bf16 %v1646_v14, %v1642_v29  ;;  %v1899_v60 = vpack.c.bf16 %v1767_v15, %v1763_v42  ;;  %v1755_v41 = vmul.f32 %v1499_v56, %v5564_v12  ;;  %v5723_v42 = vld [vmem:[%s4165_s11 + $0x138] sm:$0xff] }
 0x1ff   : > { %v1619_v32 = vmul.f32 %v1363_v3, %v5548_v25  ;;  %v1478_v9 = vunpack.c.l.bf16 %v5694_v13  ;;  %v1834_v27 = vpack.c.bf16 %v1638_v47, %v1634_v34  ;;  %v1626_v39 = vmul.f32 %v6588_v31, %v5671_v17 }
 0x200   : > { %v1902_v26 = vpack.c.bf16 %v1774_v8, %v1770_v49  ;;  %2183 = vmatpush2.bf16.msra.mxu0 %v1838_v50  ;;  %v6589_v29 = vunpack.c.l.bf16 %v5590_v54  ;;  %v1898_v3 = vpack.c.bf16 %v1766_v20, %v1762_v55  ;;  %v1754_v15 = vmul.f32 %v6590_v28, %v5677_v46  ;;  %v5746_v20 = vld [vmem:[%s4165_s11 + $0x328] sm:$0xff] }
 0x201   : > { %2184 = vmatprep.subr.bf16.mxu0 %v1835_v59  ;;  %v6591_v51 = vunpack.c.l.bf16 %v5599_v6  ;;  %v1479_v14 = vunpack.c.h.bf16 %v5694_v13  ;;  %v1895_v54 = vpack.c.bf16 %v1759_v11, %v1755_v41  ;;  %v1747_v34 = vmul.f32 %v6592_v19, %v5564_v12 }
 0x202   : > { %v1630_v56 = vmul.f32 %v6589_v29, %v5671_v17  ;;  %2256 = vmatpush2.bf16.msra.mxu1 %v1902_v26  ;;  %v6593_v59 = vunpack.c.h.bf16 %v5619_v7  ;;  %v1338_v37 = vunpack.c.l.bf16 %v5713_v21  ;;  %v6594_v49 = vunpack.c.h.bf16 %v5622_v53  ;;  %v5755_v29 = vld [vmem:[%s4165_s11 + $0x338] sm:$0xff] }
 0x203   : > { %v1758_v4 = vmul.f32 %v6591_v51, %v5677_v46  ;;  %2257 = vmatprep.subr.bf16.mxu1 %v1899_v60  ;;  %v1615_v8 = vmul.f32 %v1359_v63, %v5548_v25  ;;  %v1339_v55 = vunpack.c.h.bf16 %v5713_v21  ;;  %v1342_v0 = vunpack.c.l.bf16 %v5723_v42 }
 0x204   : > { %v1751_v47 = vmul.f32 %v6593_v59, %v5564_v12  ;;  %v1611_v6 = vmul.f32 %v6594_v49, %v5548_v25  ;;  %2185 = vmatpush2.bf16.msra.mxu0 %v1834_v27  ;;  %v1830_v50 = vpack.c.bf16 %v1630_v56, %v1626_v39  ;;  %v1827_v60 = vpack.c.bf16 %v1623_v33, %v1619_v32 }
 0x205   : > { %v6595_v41 = vunpack.c.l.bf16 %v5602_v18  ;;  %v6596_v26 = vunpack.c.l.bf16 %v5609_v1  ;;  %2186 = vmatprep.subr.bf16.mxu0 %v1831_v2  ;;  %v1894_v63 = vpack.c.bf16 %v1758_v4, %v1754_v15  ;;  %v6597_v28 = vunpack.c.l.bf16 %v5612_v61 }
 0x206   : > { %2258 = vmatpush2.bf16.msra.mxu1 %v1898_v3  ;;  %v6598_v32 = vunpack.c.l.bf16 %v5619_v7  ;;  %v1343_v18 = vunpack.c.h.bf16 %v5723_v42  ;;  %v1891_v1 = vpack.c.bf16 %v1751_v47, %v1747_v34  ;;  %v6599_v56 = vunpack.c.h.bf16 %v5632_v22  ;;  %v5780_v34 = vld [vmem:[%s4165_s11 + $0x108] sm:$0xff] }
 0x207   : > { %v1618_v11 = vmul.f32 %v6595_v41, %v5671_v17  ;;  %v1622_v31 = vmul.f32 %v6596_v26, %v5671_v17  ;;  %v1746_v27 = vmul.f32 %v6597_v28, %v5677_v46  ;;  %2259 = vmatprep.subr.bf16.mxu1 %v1895_v54  ;;  %v6600_v2 = vunpack.c.h.bf16 %v5639_v45 }
 0x208   : > { %v1750_v39 = vmul.f32 %v6598_v32, %v5677_v46  ;;  %v1739_v33 = vmul.f32 %v6599_v56, %v5564_v12  ;;  %v1466_v61 = vunpack.c.l.bf16 %v5746_v20  ;;  %v6601_v15 = vunpack.c.h.bf16 %v5646_v38  ;;  %2187 = vmatpush2.bf16.msra.mxu0 %v1830_v50  ;;  %v1171_v32 = vld [vmem:[%s4165_s11 + $0x118] sm:$0xff] }
 0x209   : > { %v1743_v3 = vmul.f32 %v6600_v2, %v5564_v12  ;;  %v6602_v51 = vunpack.c.h.bf16 %v5653_v5  ;;  %v1467_v54 = vunpack.c.h.bf16 %v5746_v20  ;;  %v1470_v19 = vunpack.c.l.bf16 %v5755_v29  ;;  %2188 = vmatprep.subr.bf16.mxu0 %v1827_v60 }
 0x20a   : > { %v1603_v7 = vmul.f32 %v6601_v15, %v5548_v25  ;;  %v1826_v59 = vpack.c.bf16 %v1622_v31, %v1618_v11  ;;  %v1823_v47 = vpack.c.bf16 %v1615_v8, %v1611_v6  ;;  %v6603_v49 = vunpack.c.l.bf16 %v5622_v53  ;;  %2260 = vmatpush2.bf16.msra.mxu1 %v1894_v63  ;;  %v1235_v15 = vld [vmem:[%s4165_s11 + $0x318] sm:$0xff] }
 0x20b   : > { %v1607_v4 = vmul.f32 %v6602_v51, %v5548_v25  ;;  %v6604_v26 = vunpack.c.l.bf16 %v5629_v10  ;;  %v1890_v20 = vpack.c.bf16 %v1750_v39, %v1746_v27  ;;  %v6605_v56 = vunpack.c.l.bf16 %v5632_v22  ;;  %2261 = vmatprep.subr.bf16.mxu1 %v1891_v1  ;;  %v1233_v27 = vld [vmem:[%s4165_s11 + $0x308] sm:$0xff] }
 0x20c   : > { %v1610_v41 = vmul.f32 %v6603_v49, %v5671_v17  ;;  %v6606_v6 = vunpack.c.l.bf16 %v5639_v45  ;;  %v1471_v53 = vunpack.c.h.bf16 %v5755_v29  ;;  %v1887_v11 = vpack.c.bf16 %v1743_v3, %v1739_v33  ;;  %2189 = vmatpush2.bf16.msra.mxu0 %v1826_v59 }
 0x20d   : > { %v1614_v28 = vmul.f32 %v6604_v26, %v5671_v17  ;;  %v1738_v50 = vmul.f32 %v6605_v56, %v5677_v46  ;;  %v6607_v10 = vunpack.c.h.bf16 %v5656_v36  ;;  %v1735_v63 = vmul.f32 %v1479_v14, %v5564_v12  ;;  %2190 = vmatprep.subr.bf16.mxu0 %v1823_v47 }
 0x20e   : > { %v1742_v8 = vmul.f32 %v6606_v6, %v5677_v46  ;;  %v1330_v60 = vunpack.c.l.bf16 %v5780_v34  ;;  %v1595_v22 = vmul.f32 %v1339_v55, %v5548_v25  ;;  %v1599_v39 = vmul.f32 %v1343_v18, %v5548_v25  ;;  %2262 = vmatpush2.bf16.msra.mxu1 %v1890_v20 }
 0x20f   : > { %v1731_v31 = vmul.f32 %v6607_v10, %v5564_v12  ;;  %v1331_v45 = vunpack.c.h.bf16 %v5780_v34  ;;  %v1335_v2 = vunpack.c.h.bf16 %v1171_v32  ;;  %v1822_v29 = vpack.c.bf16 %v1614_v28, %v1610_v41  ;;  %2263 = vmatprep.subr.bf16.mxu1 %v1887_v11 }
 0x210   : > { %v1819_v1 = vpack.c.bf16 %v1607_v4, %v1603_v7  ;;  %v6608_v33 = vunpack.c.l.bf16 %v5646_v38  ;;  %v6609_v14 = vunpack.c.l.bf16 %v5653_v5  ;;  %v1886_v55 = vpack.c.bf16 %v1742_v8, %v1738_v50 }
 0x211   : > { %v6610_v18 = vunpack.c.l.bf16 %v5656_v36  ;;  %v1734_v59 = vmul.f32 %v1478_v9, %v5677_v46  ;;  %v1459_v7 = vunpack.c.h.bf16 %v1233_v27  ;;  %v1883_v4 = vpack.c.bf16 %v1735_v63, %v1731_v31  ;;  %2191 = vmatpush2.bf16.msra.mxu0 %v1822_v29  ;;  %v3523_v29 = vld [vmem:[#allocation12 + $0x8] ss:$16 sps:$4 sm:$0xff]  }
 0x212   : > { %v1602_v3 = vmul.f32 %v6608_v33, %v5671_v17  ;;  %v1606_v51 = vmul.f32 %v6609_v14, %v5671_v17  ;;  %v1723_v38 = vmul.f32 %v1467_v54, %v5564_v12  ;;  %v1727_v49 = vmul.f32 %v1471_v53, %v5564_v12  ;;  %2264 = vmatpush2.bf16.msra.mxu1 %v1886_v55  ;;  %v3525_v33 = vld [vmem:[#allocation12 + $0x2c] ss:$16 sps:$4 sm:$0xff]   ;;  %v3422_v14 = vld [vmem:[%s4156_s29 + $0x28] ss:$16 sps:$4 sm:$0xff]  }
 0x213   : > { %v1730_v34 = vmul.f32 %v6610_v18, %v5677_v46  ;;  %v1463_v5 = vunpack.c.h.bf16 %v1235_v15  ;;  %v1815_v41 = vpack.c.bf16 %v1599_v39, %v1595_v22  ;;  %v1334_v26 = vunpack.c.l.bf16 %v1171_v32  ;;  %2192 = vmatprep.subr.bf16.mxu0 %v1819_v1  ;;  %2265 = vmatprep.subr.bf16.mxu1 %v1883_v4  ;;  %v3413_v22 = vld [vmem:[%s4156_s29 + $0x40] ss:$16 sps:$4 sm:$0xff]   ;;  %v3416_v39 = vld [vmem:[%s4156_s29 + $0x48] ss:$16 sps:$4 sm:$0xff]   ;;  %v3524_v1 = vld [vmem:[#allocation12 + $0x24] ss:$16 sps:$4 sm:$0xff]  }
 0x214   : > { %v1587_v47 = vmul.f32 %v1331_v45, %v5548_v25  ;;  %v1458_v28 = vunpack.c.l.bf16 %v1233_v27  ;;  %v1818_v36 = vpack.c.bf16 %v1606_v51, %v1602_v3  ;;  %v1594_v13 = vmul.f32 %v1338_v37, %v5671_v17  ;;  %v3418_v27 = vld [vmem:[%s4156_s29 + $0x4c] ss:$16 sps:$4 sm:$0xff]   ;;  %v3421_v45 = vld [vmem:[%s4156_s29 + $0x24] ss:$16 sps:$4 sm:$0xff]   ;;  %v3419_v3 = vld [vmem:[%s4156_s29 + $0x20] ss:$16 sps:$4 sm:$0xff]  }
 0x215   : > { %v1598_v9 = vmul.f32 %v1342_v0, %v5671_v17  ;;  %v1591_v54 = vmul.f32 %v1335_v2, %v5548_v25  ;;  %v1882_v20 = vpack.c.bf16 %v1734_v59, %v1730_v34  ;;  %v1722_v32 = vmul.f32 %v1466_v61, %v5677_v46  ;;  %v3522_v2 = vld [vmem:[#allocation12] ss:$16 sps:$4 sm:$0xff]   ;;  %v3427_v51 = vld [vmem:[%s4156_s29 + $0x4] ss:$16 sps:$4 sm:$0xff]   ;;  %v3430_v55 = vld [vmem:[%s4156_s29 + $0xc] ss:$16 sps:$4 sm:$0xff]  }
 0x216   : > { %v1726_v56 = vmul.f32 %v1470_v19, %v5677_v46  ;;  %v1462_v50 = vunpack.c.l.bf16 %v1235_v15  ;;  %v1879_v6 = vpack.c.bf16 %v1727_v49, %v1723_v38  ;;  %v1715_v8 = vmul.f32 %v1459_v7, %v5564_v12  ;;  %2193 = vmatpush2.bf16.msra.mxu0 %v1818_v36  ;;  %v3424_v15 = vld [vmem:[%s4156_s29 + $0x2c] ss:$16 sps:$4 sm:$0xff]   ;;  %v3425_v18 = vld [vmem:[%s4156_s29] ss:$16 sps:$4 sm:$0xff]   ;;  %v3428_v34 = vld [vmem:[%s4156_s29 + $0x8] ss:$16 sps:$4 sm:$0xff]  }
 0x217   : > { %v1719_v21 = vmul.f32 %v1463_v5, %v5564_v12  ;;  %v1814_v37 = vpack.c.bf16 %v1598_v9, %v1594_v13  ;;  %v1811_v42 = vpack.c.bf16 %v1591_v54, %v1587_v47  ;;  %v1586_v0 = vmul.f32 %v1330_v60, %v5671_v17  ;;  %2266 = vmatpush2.bf16.msra.mxu1 %v1882_v20  ;;  %v3415_v60 = vld [vmem:[%s4156_s29 + $0x44] ss:$16 sps:$4 sm:$0xff]   ;;  %v3526_v59 = vld [vmem:[#allocation12 + $0x20] ss:$16 sps:$4 sm:$0xff]   ;;  %v3527_v7 = vld [vmem:[#allocation12 + $0x28] ss:$16 sps:$4 sm:$0xff]  }
 0x218   : > { %v1590_v53 = vmul.f32 %v1334_v26, %v5671_v17  ;;  %2194 = vmatprep.subr.bf16.mxu0 %v1815_v41  ;;  %v1878_v61 = vpack.c.bf16 %v1726_v56, %v1722_v32  ;;  %v1714_v19 = vmul.f32 %v1458_v28, %v5677_v46  ;;  %v1718_v11 = vmul.f32 %v1462_v50, %v5677_v46  ;;  %v3528_v4 = vld [vmem:[#allocation12 + $0x44] ss:$16 sps:$4 sm:$0xff]   ;;  %v3529_v38 = vld [vmem:[#allocation12 + $0x4c] ss:$16 sps:$4 sm:$0xff]  }
 0x219   : > { %2267 = vmatprep.subr.bf16.mxu1 %v1879_v6  ;;  %v1875_v10 = vpack.c.bf16 %v1719_v21, %v1715_v8  ;;  %v6611_v49 = vmov 0   ;;  %v3431_v5 = vld [vmem:[%s6269_s7] sm:$0xff]  }
 0x21a   : > { %2195 = vmatpush2.bf16.msra.mxu0 %v1814_v37  ;;  %v1810_v31 = vpack.c.bf16 %v1590_v53, %v1586_v0  ;;  %v1874_v63 = vpack.c.bf16 %v1718_v11, %v1714_v19 }
 0x21b   : > { %2268 = vmatpush2.bf16.msra.mxu1 %v1878_v61  ;;  %2196 = vmatprep.subr.bf16.mxu0 %v1811_v42 }
 0x21c   : > { %2269 = vmatprep.subr.bf16.mxu1 %v1875_v10 }
 0x21e   : > { %2197 = vmatpush2.bf16.msra.mxu0 %v1810_v31 }
 0x21f   : > { %2270 = vmatpush2.bf16.msra.mxu1 %v1874_v63  ;;  %2415 = vmatprep.subr.bf16.mxu0 %v3415_v60 }
 0x220   : > { %2488 = vmatprep.subr.bf16.mxu1 %v3418_v27 }
 0x221   : > { %2199 = vmatmul.mubr.bf16.vlgmr.msra.gmra.mxu0 %v3522_v2 }
 0x222   : > { %2272 = vmatmul.mubr.bf16.vlgmr.msra.gmra.mxu1 %v3523_v29  ;;  %2208 = vmatprep.mubr.bf16.mxu0 %v3524_v1 }
 0x223   : > { %2281 = vmatprep.mubr.bf16.mxu1 %v3525_v33  ;;  %2416 = vmatpush1.bf16.msra.mxu0 %v3413_v22 }
 0x224   : > { %2489 = vmatpush1.bf16.msra.mxu1 %v3416_v39  ;;  %2417 = vmatprep.subr.bf16.mxu0 %v3421_v45 }
 0x225   : > { %2490 = vmatprep.subr.bf16.mxu1 %v3424_v15 }
 0x227   : > { %2418 = vmatpush1.bf16.msra.mxu0 %v3419_v3 }
 0x228   : > { %2491 = vmatpush1.bf16.msra.mxu1 %v3422_v14  ;;  %2419 = vmatprep.subr.bf16.mxu0 %v3427_v51 }
 0x229   : > { %2209 = vmatmul.mubr.bf16.gmra.mxu0 %v3526_v59  ;;  %2492 = vmatprep.subr.bf16.mxu1 %v3430_v55 }
 0x22a   : > { %2282 = vmatmul.mubr.bf16.gmra.mxu1 %v3527_v7  ;;  %2218 = vmatprep.mubr.bf16.mxu0 %v3528_v4  ;;  %v3807_v7 = vmov 1   ;;  %v3808_v4 = vmov 2  }
 0x22b   : > { %2291 = vmatprep.mubr.bf16.mxu1 %v3529_v38  ;;  %2420 = vmatpush1.bf16.msra.mxu0 %v3425_v18  ;;  %v3809_v38 = vmov 3  }
 0x22c   : > { %2493 = vmatpush1.bf16.msra.mxu1 %v3428_v34  ;;  %3379 = vset.pattern.permute.xlu1 %v3807_v7 }
 0x22d   : > { %3378 = vset.pattern.permute.xlu0 %v3807_v7  ;;  %2676 = vperm.xlu1 %3379, %v5545_v40  }
 0x22e   : > { %2672 = vperm.xlu0 %3378, %v5540_v44  }
 0x231   : > { %2219 = vmatmul.mubr.bf16.gmra.mxu0 %v5247_v16  ;;  %v3434_v16 = vld [vmem:[%s6269_s7 + $0x18] sm:$0xff]   ;;  %2680 = vperm.xlu1 %3379, %v5518_v30  }
 0x232   : > { %2292 = vmatmul.mubr.bf16.gmra.mxu1 %v5253_v57  ;;  %2228 = vmatprep.mubr.bf16.mxu0 %v5263_v23  ;;  %v3433_v57 = vld [vmem:[%s6269_s7 + $0x10] sm:$0xff]  }
 0x233   : > { %2301 = vmatprep.mubr.bf16.mxu1 %v5271_v48  ;;  %v3432_v48 = vld [vmem:[%s6269_s7 + $0x8] sm:$0xff]   ;;  %2684 = vperm.xlu0 %3378, %v5523_v35  }
 0x235   : > { %3380 = vset.pattern.permute.xlu1 %v3808_v4 }
 0x236   : > { %2827 = vperm.xlu1 %3380, %v5540_v44  }
 0x237   : > { %3381 = vset.pattern.permute.xlu0 %v3808_v4 }
 0x238   : > { %2831 = vperm.xlu0 %3381, %v5545_v40  }
 0x239   : > { %2229 = vmatmul.mubr.bf16.gmra.mxu0 %v5334_v52 }
 0x23a   : > { %2302 = vmatmul.mubr.bf16.gmra.mxu1 %v5367_v24  ;;  %2437 = vmatprep.mubr.bf16.mxu0 %v6611_v49 }
 0x23b   : > { %2510 = vmatprep.mubr.bf16.mxu1 %v6611_v49  ;;  %2835 = vperm.xlu1 %3380, %v5518_v30  }
 0x23c   : > { %3383 = vset.pattern.permute.xlu0 %v3809_v38 }
 0x23d   : > { %1067 = vperm.xlu0 %3383, %v5545_v40  }
 0x23f   : > { %3382 = vset.pattern.permute.xlu1 %v3809_v38 }
 0x240   : > { %1062 = vperm.xlu1 %3382, %v5540_v44  }
 0x241   : > { %3258 = vmatmul.mubr.msk.bf16.vlgmr.msra.gmra.mxu0 %vm2392_vm0, %v3431_v5  ;;  %1072 = vperm.xlu0 %3383, %v5518_v30  }
 0x242   : > { %3262 = vmatmul.mubr.msk.bf16.vlgmr.msra.gmra.mxu1 %vm2392_vm0, %v3431_v5  ;;  %2447 = vmatprep.mubr.bf16.mxu0 %v6611_v49  ;;  %v640_v5 = vld [vmem:[%s6271_s9 + $0x5] sm:$0x1] }
 0x243   : > { %2520 = vmatprep.mubr.bf16.mxu1 %v6611_v49 }
 0x244   : > { %3384 = vset.pattern.permute.xlu1 %v3808_v4 }
 0x245   : > { %2839 = vperm.xlu1 %3384, %v5523_v35  }
 0x249   : > { %3259 = vmatmul.mubr.msk.bf16.gmra.mxu0 %vm2392_vm0, %v3432_v48 }
 0x24a   : > { %3263 = vmatmul.mubr.msk.bf16.gmra.mxu1 %vm2392_vm0, %v3432_v48  ;;  %2457 = vmatprep.mubr.bf16.mxu0 %v6611_v49  ;;  %v3810_v48 = vmov 4  }
 0x24b   : > { %2530 = vmatprep.mubr.bf16.mxu1 %v6611_v49  ;;  %3387 = vset.pattern.permute.xlu0 %v3810_v48 }
 0x24c   : > { %2896 = vperm.xlu0 %3387, %v640_v5   ;;  %3385 = vset.pattern.permute.xlu1 %v3810_v48 }
 0x251   : > { %3260 = vmatmul.mubr.msk.bf16.gmra.mxu0 %vm2392_vm0, %v3433_v57 }
 0x252   : > { %3264 = vmatmul.mubr.msk.bf16.gmra.mxu1 %vm2392_vm0, %v3433_v57  ;;  %2467 = vmatprep.mubr.bf16.mxu0 %v6611_v49  ;;  %v2054_v23 = vpop.f32.mrf.mxu0  ;;  %v637_v57 = vld [vmem:[%s6271_s9] sm:$0x7] }
 0x253   : > { %2540 = vmatprep.mubr.bf16.mxu1 %v6611_v49  ;;  %v2127_v52 = vpop.f32.mrf.mxu1  ;;  %981 = vperm.xlu1 %3385, %v637_v57  }
 0x254   : > { %v5884_v24 = vadd.f32 %v2127_v52, %v2054_v23  ;;  %v2056_v41 = vpop.f32.mrf.mxu0 }
 0x255   : > { %v2129_v26 = vpop.f32.mrf.mxu1 }
 0x256   : > { %v5886_v47 = vadd.f32 %v2129_v26, %v2056_v41  ;;  %v2058_v28 = vpop.f32.mrf.mxu0 }
 0x257   : > { %v2131_v36 = vpop.f32.mrf.mxu1  ;;  %3386 = vset.pattern.permute.xlu1 %v3809_v38 }
 0x258   : > { %v5888_v13 = vadd.f32 %v2131_v36, %v2058_v28  ;;  %v2060_v9 = vpop.f32.mrf.mxu0  ;;  %1077 = vperm.xlu1 %3386, %v5523_v35   ;;  %v639_v35 = vld [vmem:[%s6271_s9 + $0x4] sm:$0x1] }
 0x259   : > { %3261 = vmatmul.mubr.msk.bf16.gmra.mxu0 %vm2392_vm0, %v3434_v16  ;;  %v2133_v54 = vpop.f32.mrf.mxu1 }
 0x25a   : > { %3265 = vmatmul.mubr.msk.bf16.gmra.mxu1 %vm2392_vm0, %v3434_v16  ;;  %2736 = vmatprep.mubr.bf16.mxu0 %v6611_v49  ;;  %v5890_v20 = vadd.f32 %v2133_v54, %v2060_v9  ;;  %v2064_v32 = vpop.f32.mrf.mxu0  ;;  %v638_v9 = vld [vmem:[%s6271_s9 + $0x3] sm:$0x1] }
 0x25b   : > { %2789 = vmatprep.mubr.bf16.mxu1 %v6611_v49  ;;  %v2137_v56 = vpop.f32.mrf.mxu1 }
 0x25c   : > { %v5892_v50 = vadd.f32 %v2137_v56, %v2064_v32  ;;  %v2066_v6 = vpop.f32.mrf.mxu0  ;;  %3388 = vset.pattern.permute.xlu1 %v3810_v48 }
 0x25d   : > { %v2139_v8 = vpop.f32.mrf.mxu1  ;;  %2909 = vperm.xlu1 %3388, %v638_v9  }
 0x25e   : > { %v5894_v21 = vadd.f32 %v2139_v8, %v2066_v6  ;;  %v2068_v37 = vpop.f32.mrf.mxu0 }
 0x25f   : > { %v2141_v42 = vpop.f32.mrf.mxu1 }
 0x260   : > { %v5896_v0 = vadd.f32 %v2141_v42, %v2068_v37  ;;  %v2070_v53 = vpop.f32.mrf.mxu0 }
 0x261   : > { %v2143_v61 = vpop.f32.mrf.mxu1  ;;  %2922 = vperm.xlu1 %3388, %v639_v35  }
 0x262   : > { %v5898_v19 = vadd.f32 %v2143_v61, %v2070_v53  ;;  %v2074_v11 = vpop.f32.mrf.mxu0 }
 0x263   : > { %v2147_v10 = vpop.f32.mrf.mxu1 }
 0x264   : > { %v5900_v31 = vadd.f32 %v2147_v10, %v2074_v11  ;;  %v2076_v63 = vpop.f32.mrf.mxu0 }
 0x265   : > { %v2149_v60 = vpop.f32.mrf.mxu1 }
 0x266   : > { %v5902_v27 = vadd.f32 %v2149_v60, %v2076_v63  ;;  %v2078_v22 = vpop.f32.mrf.mxu0 }
 0x267   : > { %v2151_v39 = vpop.f32.mrf.mxu1 }
 0x268   : > { %v5904_v45 = vadd.f32 %v2151_v39, %v2078_v22  ;;  %v2080_v2 = vpop.f32.mrf.mxu0  ;;  %v5960_v22 = vpop.permute.xlu0 %2579 }
 0x269   : > { %v2153_v15 = vpop.f32.mrf.mxu1  ;;  %6614 = vst [vmem:[#allocation44_spill] sm:$0xff] %v5960_v22 }
 0x26a   : > { %v5906_v29 = vadd.f32 %v2153_v15, %v2080_v2  ;;  %v5966_v15 = vpop.permute.xlu1 %2569 }
 0x26b   : > { %v2084_v1 = vpop.f32.mrf.mxu0 }
 0x26d   : > { %v2086_v3 = vpop.f32.mrf.mxu0 }
 0x26e   : > { %v5982_v4 = vpop.permute.xlu1 %2574 }
 0x26f   : > { %v2088_v18 = vpop.f32.mrf.mxu0 }
 0x271   : > { %v2157_v33 = vpop.f32.mrf.mxu1  ;;  %v5931_v40 = vpop.f32.mrf.mxu0 }
 0x272   : > { %v5908_v14 = vadd.f32 %v2157_v33, %v2084_v1 }
 0x273   : > { %v2159_v51 = vpop.f32.mrf.mxu1 }
 0x274   : > { %v5910_v55 = vadd.f32 %v2159_v51, %v2086_v3 }
 0x275   : > { %v2161_v34 = vpop.f32.mrf.mxu1 }
 0x276   : > { %6612 = vst [vmem:[#allocation42_spill] sm:$0xff] %v5910_v55  ;;  %v5912_v59 = vadd.f32 %v2161_v34, %v2088_v18  ;;  %v5976_v18 = vpop.permute.xlu0 %2584 }
 0x277   : > { %v5933_v44 = vpop.f32.mrf.mxu1  ;;  %6615 = vst [vmem:[#allocation45_spill] sm:$0xff] %v5976_v18 }
 0x278   : > { %6613 = vst [vmem:[#allocation43_spill] sm:$0xff] %v5912_v59 }
 0x2e1   : > { %v2200_v30 = vpop.f32.mrf.mxu0 }
 0x2e2   : > { %v2273_v16 = vpop.f32.mrf.mxu1 }
 0x2e3   : > { %v2274_v23 = vadd.f32 %v2273_v16, %v2200_v30  ;;  %v2202_v52 = vpop.f32.mrf.mxu0  ;;  %v5992_v30 = vpop.permute.xlu0 %2560 }
 0x2e4   : > { %v2275_v41 = vpop.f32.mrf.mxu1 }
 0x2e5   : > { %v2276_v26 = vadd.f32 %v2275_v41, %v2202_v52  ;;  %v2204_v28 = vpop.f32.mrf.mxu0  ;;  %v5998_v41 = vpop.permute.xlu1 %2564 }
 0x2e6   : > { %v2277_v36 = vpop.f32.mrf.mxu1 }
 0x2e7   : > { %v2278_v54 = vadd.f32 %v2277_v36, %v2204_v28  ;;  %v2206_v32 = vpop.f32.mrf.mxu0  ;;  %v2553_v12 = vpop.permute.xlu0 %2552 }
 0x2e8   : > { %v2279_v56 = vpop.f32.mrf.mxu1 }
 0x2e9   : > { %v2280_v6 = vadd.f32 %v2279_v56, %v2206_v32  ;;  %v5939_v8 = vpop.f32.mrf.mxu0  ;;  %v2557_v17 = vpop.permute.xlu1 %2556 }
 0x2ea   : > { %v5941_v37 = vpop.f32.mrf.mxu1 }
 0x2eb   : > { %v5946_v42 = vpop.f32.mrf.mxu0 }
 0x2ec   : > { %v5948_v53 = vpop.f32.mrf.mxu1 }
 0x2ed   : > { %v5950_v61 = vpop.f32.mrf.mxu0 }
 0x2ee   : > { %v5952_v11 = vpop.f32.mrf.mxu1 }
 0x2ef   : > { %v5954_v10 = vpop.f32.mrf.mxu0 }
 0x2f0   : > { %v5956_v63 = vpop.f32.mrf.mxu1 }
 0x2f1   : > { %v5958_v60 = vpop.f32.mrf.mxu0 }
 0x2f2   : > { %v5962_v39 = vpop.f32.mrf.mxu1 }
 0x2f3   : > { %v5964_v2 = vpop.f32.mrf.mxu0 }
 0x2f4   : > { %v5968_v1 = vpop.f32.mrf.mxu1 }
 0x2f5   : > { %v5970_v33 = vpop.f32.mrf.mxu0 }
 0x2f6   : > { %v5972_v3 = vpop.f32.mrf.mxu1 }
 0x2f7   : > { %v5974_v51 = vpop.f32.mrf.mxu0 }
 0x2f8   : > { %v5978_v34 = vpop.f32.mrf.mxu1 }
 0x2f9   : > { %v5980_v7 = vpop.f32.mrf.mxu0 }
 0x2fa   : > { %v5984_v38 = vpop.f32.mrf.mxu1 }
 0x2fb   : > { %v5986_v5 = vpop.f32.mrf.mxu0 }
 0x2fc   : > { %v5988_v48 = vpop.f32.mrf.mxu1 }
 0x2fd   : > { %v5990_v57 = vpop.f32.mrf.mxu0 }
 0x2fe   : > { %6616 = vst [vmem:[#allocation46_spill] sm:$0xff] %v5990_v57  ;;  %v5994_v16 = vpop.f32.mrf.mxu1 }
 0x2ff   : > { %6617 = vst [vmem:[#allocation47_spill] sm:$0xff] %v5994_v16  ;;  %v5996_v52 = vpop.f32.mrf.mxu0 }
 0x300   : > { %6618 = vst [vmem:[#allocation48_spill] sm:$0xff] %v5996_v52  ;;  %v6000_v28 = vpop.f32.mrf.mxu1 }
 0x301   : > { %6619 = vst [vmem:[#allocation49_spill] sm:$0xff] %v6000_v28  ;;  %v2439_v36 = vpop.f32.mrf.mxu0 }
 0x302   : > { %v2440_v9 = vadd.f32 %v2439_v36, %v5884_v24  ;;  %v2512_v32 = vpop.f32.mrf.mxu1 }
 0x303   : > { %v2513_v56 = vadd.f32 %v2512_v32, %v2274_v23  ;;  %v2441_v35 = vpop.f32.mrf.mxu0 }
 0x304   : > { %v2442_v46 = vadd.f32 %v2441_v35, %v5886_v47  ;;  %v2514_v62 = vpop.f32.mrf.mxu1  ;;  %v2587_v43 = vadd.f32 %v2553_v12, %v2440_v9 }
 0x305   : > { %v2515_v25 = vadd.f32 %v2514_v62, %v2276_v26  ;;  %v2443_v58 = vpop.f32.mrf.mxu0  ;;  %v2589_v59 = vadd.f32 %v2553_v12, %v2513_v56 }
 0x306   : > { %v2444_v49 = vadd.f32 %v2443_v58, %v5888_v13  ;;  %v2516_v18 = vpop.f32.mrf.mxu1  ;;  %v2588_v52 = vadd.f32 %v2553_v12, %v2442_v46  ;;  %v2619_v35 = vmax.f32 %v2587_v43, 0.0 }
 0x307   : > { %v2517_v22 = vadd.f32 %v2516_v18, %v2278_v54  ;;  %v2445_v28 = vpop.f32.mrf.mxu0  ;;  %v2590_v32 = vadd.f32 %v2553_v12, %v2515_v25  ;;  %v2621_v58 = vmax.f32 %v2589_v59, 0.0 }
 0x308   : > { %v2446_v24 = vadd.f32 %v2445_v28, %v5890_v20  ;;  %v2518_v36 = vpop.f32.mrf.mxu1  ;;  %v2591_v23 = vadd.f32 %v2557_v17, %v2444_v49  ;;  %v2620_v49 = vmax.f32 %v2588_v52, 0.0 }
 0x309   : > { %v2519_v55 = vadd.f32 %v2518_v36, %v2280_v6  ;;  %v2593_v16 = vadd.f32 %v2557_v17, %v2517_v22  ;;  %v2449_v47 = vpop.f32.mrf.mxu0  ;;  %v2622_v43 = vmax.f32 %v2590_v32, 0.0 }
 0x30a   : > { %v2592_v62 = vadd.f32 %v2557_v17, %v2446_v24  ;;  %v2623_v26 = vmax.f32 %v2591_v23, 0.0  ;;  %v2450_v9 = vadd.f32 %v2449_v47, %v5892_v50  ;;  %v6007_v57 = vpop.f32.mrf.mxu1 }
 0x30b   : > { %v2594_v13 = vadd.f32 %v2557_v17, %v2519_v55  ;;  %v2625_v54 = vmax.f32 %v2593_v16, 0.0  ;;  %v2451_v18 = vpop.f32.mrf.mxu0 }
 0x30c   : > { %v2452_v46 = vadd.f32 %v2451_v18, %v5894_v21  ;;  %v6010_v20 = vpop.f32.mrf.mxu1  ;;  %v2624_v25 = vmax.f32 %v2592_v62, 0.0  ;;  %v6012_v12 = vpack.c.bf16 %v2623_v26, %v2619_v35  ;;  %v2595_v50 = vadd.f32 %v5992_v30, %v2450_v9 }
 0x30d   : > { %v2453_v6 = vpop.f32.mrf.mxu0  ;;  %v2626_v22 = vmax.f32 %v2594_v13, 0.0  ;;  %v6014_v28 = vpack.c.bf16 %v2625_v54, %v2621_v58 }
 0x30e   : > { %v2454_v59 = vadd.f32 %v2453_v6, %v5896_v0  ;;  %v6018_v17 = vpop.f32.mrf.mxu1  ;;  %v6020_v55 = vpack.c.bf16 %v2624_v25, %v2620_v49  ;;  %v2596_v52 = vadd.f32 %v5992_v30, %v2452_v46  ;;  %v2627_v32 = vmax.f32 %v2595_v50, 0.0 }
 0x30f   : > { %v2455_v21 = vpop.f32.mrf.mxu0  ;;  %v6022_v16 = vpack.c.bf16 %v2626_v22, %v2622_v43  ;;  %v6040_v43 = vadd.f32 %v5941_v37, %v5939_v8  ;;  %v2286_v22 = vadd.f32 %v5948_v53, %v5946_v42  ;;  %v2288_v50 = vadd.f32 %v5952_v11, %v5950_v61 }
 0x310   : > { %v2599_v56 = vadd.f32 %v5998_v41, %v2454_v59  ;;  %v2456_v24 = vadd.f32 %v2455_v21, %v5898_v19  ;;  %v2528_v36 = vpop.f32.mrf.mxu1  ;;  %v2628_v9 = vmax.f32 %v2596_v52, 0.0  ;;  %v2296_v8 = vadd.f32 %v5968_v1, %v5964_v2  ;;  %v6621_v2 = vld [vmem:[#allocation47_spill] sm:$0xff] }
 0x311   : > { %v2459_v23 = vpop.f32.mrf.mxu0  ;;  %v2298_v37 = vadd.f32 %v5972_v3, %v5970_v33 }
 0x312   : > { %v2631_v47 = vmax.f32 %v2599_v56, 0.0  ;;  %v2600_v35 = vadd.f32 %v5998_v41, %v2456_v24  ;;  %v2460_v0 = vadd.f32 %v2459_v23, %v5900_v31  ;;  %v2532_v62 = vpop.f32.mrf.mxu1  ;;  %v2164_v31 = vadd.f32 %v5933_v44, %v5931_v40 }
 0x313   : > { %v2461_v26 = vpop.f32.mrf.mxu0  ;;  %v2290_v40 = vadd.f32 %v5956_v63, %v5954_v10  ;;  %v2294_v44 = vadd.f32 %v5962_v39, %v5958_v60  ;;  %v2300_v10 = vadd.f32 %v5978_v34, %v5974_v51  ;;  %v2304_v63 = vadd.f32 %v5984_v38, %v5980_v7  ;;  %v6620_v39 = vld [vmem:[#allocation46_spill] sm:$0xff] }
 0x314   : > { %v6029_v58 = vpack.c.bf16 %v2631_v47, %v2627_v32  ;;  %v2632_v13 = vmax.f32 %v2600_v35, 0.0  ;;  %v2462_v54 = vadd.f32 %v2461_v26, %v5902_v27  ;;  %v2534_v18 = vpop.f32.mrf.mxu1  ;;  %v2603_v19 = vadd.f32 %v5966_v15, %v2460_v0  ;;  %v6622_v32 = vld [vmem:[#allocation42_spill] sm:$0xff]  ;;  %v6623_v35 = vld [vmem:[#allocation48_spill] sm:$0xff]  ;;  %v6624_v0 = vld [vmem:[#allocation49_spill] sm:$0xff] }
 0x315   : > { %v2463_v46 = vpop.f32.mrf.mxu0  ;;  %v2306_v60 = vadd.f32 %v5988_v48, %v5986_v5  ;;  %v2308_v1 = vadd.f32 %v6621_v2, %v6620_v39  ;;  %v2310_v51 = vadd.f32 %v6624_v0, %v6623_v35  ;;  %v2525_v34 = vadd.f32 %v6010_v20, %v2286_v22  ;;  %v6625_v5 = vld [vmem:[#allocation44_spill] sm:$0xff] }
 0x316   : > { %v2464_v49 = vadd.f32 %v2463_v46, %v5904_v45  ;;  %v2536_v25 = vpop.f32.mrf.mxu1  ;;  %v6034_v6 = vpack.c.bf16 %v2632_v13, %v2628_v9  ;;  %v2604_v59 = vadd.f32 %v5966_v15, %v2462_v54  ;;  %v2635_v53 = vmax.f32 %v2603_v19, 0.0  ;;  %v6626_v13 = vld [vmem:[#allocation43_spill] sm:$0xff] }
 0x317   : > { %v2465_v27 = vpop.f32.mrf.mxu0 }
 0x318   : > { %v2607_v45 = vadd.f32 %v5982_v4, %v2464_v49  ;;  %v2466_v21 = vadd.f32 %v2465_v27, %v5906_v29  ;;  %v2538_v52 = vpop.f32.mrf.mxu1  ;;  %v2636_v3 = vmax.f32 %v2604_v59, 0.0  ;;  %v2529_v49 = vadd.f32 %v2528_v36, %v2290_v40 }
 0x319   : > { %v2469_v42 = vpop.f32.mrf.mxu0  ;;  %v2539_v7 = vadd.f32 %v2538_v52, %v2300_v10  ;;  %v2535_v27 = vadd.f32 %v2534_v18, %v2296_v8  ;;  %v2537_v59 = vadd.f32 %v2536_v25, %v2298_v37 }
 0x31a   : > { %v2639_v61 = vmax.f32 %v2607_v45, 0.0  ;;  %v2608_v11 = vadd.f32 %v5982_v4, %v2466_v21  ;;  %v2470_v29 = vadd.f32 %v2469_v42, %v5908_v14  ;;  %v2542_v56 = vpop.f32.mrf.mxu1  ;;  %v2533_v42 = vadd.f32 %v2532_v62, %v2294_v44 }
 0x31b   : > { %v2471_v33 = vpop.f32.mrf.mxu0  ;;  %v2543_v9 = vadd.f32 %v2542_v56, %v2304_v63  ;;  %v2527_v62 = vadd.f32 %v6018_v17, %v2288_v50  ;;  %v2606_v40 = vadd.f32 %v5966_v15, %v2535_v27  ;;  %v2602_v2 = vadd.f32 %v5998_v41, %v2529_v49 }
 0x31c   : > { %v6067_v24 = vpack.c.bf16 %v2639_v61, %v2635_v53  ;;  %v2640_v23 = vmax.f32 %v2608_v11, 0.0  ;;  %v2472_v14 = vadd.f32 %v2471_v33, %v6622_v32  ;;  %v2544_v47 = vpop.f32.mrf.mxu1  ;;  %v2611_v48 = vadd.f32 %v6625_v5, %v2470_v29  ;;  %v6627_v61 = vld [vmem:[#allocation45_spill] sm:$0xff] }
 0x31d   : > { %v2545_v38 = vadd.f32 %v2544_v47, %v2306_v60  ;;  %v2473_v26 = vpop.f32.mrf.mxu0  ;;  %v2610_v11 = vadd.f32 %v5982_v4, %v2539_v7  ;;  %v2613_v36 = vadd.f32 %v6625_v5, %v2543_v9  ;;  %v2605_v17 = vadd.f32 %v5966_v15, %v2533_v42  ;;  %v1030_v42 = vld [vmem:[%s4158_s13 + $0x10] sm:$0xff] }
 0x31e   : > { %v2474_v54 = vadd.f32 %v2473_v26, %v6626_v13  ;;  %v2546_v46 = vpop.f32.mrf.mxu1  ;;  %v2664_v19 = vpack.c.bf16 %v2640_v23, %v2636_v3  ;;  %v2612_v53 = vadd.f32 %v6625_v5, %v2472_v14  ;;  %v2643_v63 = vmax.f32 %v2611_v48, 0.0 }
 0x31f   : > { %v2547_v45 = vadd.f32 %v2546_v46, %v2308_v1  ;;  %v2475_v21 = vpop.f32.mrf.mxu0  ;;  %v2614_v29 = vadd.f32 %v6625_v5, %v2545_v38  ;;  %v2642_v1 = vmax.f32 %v2610_v11, 0.0  ;;  %v2523_v23 = vadd.f32 %v6007_v57, %v6040_v43 }
 0x320   : > { %v2615_v20 = vadd.f32 %v6627_v61, %v2474_v54  ;;  %v2476_v22 = vadd.f32 %v2475_v21, %v2164_v31  ;;  %v2548_v52 = vpop.f32.mrf.mxu1  ;;  %v2609_v31 = vadd.f32 %v5982_v4, %v2537_v59  ;;  %v2644_v8 = vmax.f32 %v2612_v53, 0.0  ;;  %v1028_v21 = vld [vmem:[%s4158_s13] sm:$0xff] }
 0x321   : > { %v2617_v56 = vadd.f32 %v6627_v61, %v2547_v45  ;;  %v2549_v10 = vadd.f32 %v2548_v52, %v2310_v51  ;;  %v2646_v33 = vmax.f32 %v2614_v29, 0.0  ;;  %v2645_v50 = vmax.f32 %v2613_v36, 0.0  ;;  %v1032_v53 = vld [vmem:[%s4158_s13 + $0x20] sm:$0xff]  ;;  %v6629_v52 = vld [vmem:[#allocation37_spill] sm:$0xff]  ;;  %v1033_v29 = vld [vmem:[%s4158_s13 + $0x28] sm:$0xff] }
 0x322   : > { %v2647_v18 = vmax.f32 %v2615_v20, 0.0  ;;  %v2616_v25 = vadd.f32 %v6627_v61, %v2476_v22  ;;  %v2598_v4 = vadd.f32 %v5992_v30, %v2525_v34  ;;  %v2638_v14 = vmax.f32 %v2606_v40, 0.0  ;;  %v1029_v22 = vld [vmem:[%s4158_s13 + $0x8] sm:$0xff]  ;;  %v6630_v36 = vld [vmem:[#allocation34_spill] sm:$0xff] }
 0x323   : > { %v2618_v44 = vadd.f32 %v6627_v61, %v2549_v10  ;;  %v2649_v60 = vmax.f32 %v2617_v56, 0.0  ;;  %v2601_v35 = vadd.f32 %v5998_v41, %v2527_v62  ;;  %v2641_v0 = vmax.f32 %v2609_v31, 0.0  ;;  %v1034_v61 = vld [vmem:[%s4158_s13 + $0x30] sm:$0xff]  ;;  %v6631_v62 = vld [vmem:[#allocation30_spill] sm:$0xff]  ;;  %v6632_v31 = vld [vmem:[#allocation27_spill] sm:$0xff] }
 0x324   : > { %v2667_v37 = vpack.c.bf16 %v2647_v18, %v2643_v63  ;;  %v2648_v39 = vmax.f32 %v2616_v25, 0.0  ;;  %v2634_v7 = vmax.f32 %v2602_v2, 0.0  ;;  %v2666_v38 = vpack.c.bf16 %v2642_v1, %v2638_v14  ;;  %v1031_v63 = vld [vmem:[%s4158_s13 + $0x18] sm:$0xff] }
 0x325   : > { %v2650_v3 = vmax.f32 %v2618_v44, 0.0  ;;  %v2669_v51 = vpack.c.bf16 %v2649_v60, %v2645_v50  ;;  %v2597_v26 = vadd.f32 %v5992_v30, %v2523_v23  ;;  %v2637_v57 = vmax.f32 %v2605_v17, 0.0  ;;  %v3435_v30 = vld [vmem:[#allocation14] sm:$0xff]   ;;  %v1035_v25 = vld [vmem:[%s4158_s13 + $0x38] sm:$0xff]  ;;  %v6636_v50 = vld [vmem:[#allocation40_spill] sm:$0xff] }
 0x326   : > { %v2668_v32 = vpack.c.bf16 %v2648_v39, %v2644_v8  ;;  %v2630_v15 = vmax.f32 %v2598_v4, 0.0  ;;  %v2633_v43 = vmax.f32 %v2601_v35, 0.0  ;;  %v3811_v54 = vmov 839922192   ;;  %v1036_v8 = vld [vmem:[%s4158_s13 + $0x40] sm:$0xff]  ;;  %v6634_v39 = vld [vmem:[#allocation28_spill] sm:$0xff] }
 0x327   : > { %v2670_v47 = vpack.c.bf16 %v2650_v3, %v2646_v33  ;;  %v2665_v34 = vpack.c.bf16 %v2641_v0, %v2637_v57  ;;  %v2629_v41 = vmax.f32 %v2597_v26, 0.0  ;;  %v984_v46 = vunpack.c.l.s4 %v3811_v54  ;;  %v1038_v33 = vld [vmem:[%s4158_s13 + $0x50] sm:$0xff]  ;;  %v6635_v3 = vld [vmem:[#allocation32_spill] sm:$0xff]  ;;  %v1039_v26 = vld [vmem:[%s4158_s13 + $0x58] sm:$0xff] }
 0x328   : > { %2712 = vmatprep.subr.bf16.mxu0 %v2668_v32  ;;  %v2662_v5 = vpack.c.bf16 %v2634_v7, %v2630_v15  ;;  %v1044_v11 = vmul.f32 %v1028_v21, %v6629_v52  ;;  %v1046_v18 = vmul.f32 %v1030_v42, %v6630_v36  ;;  %v1048_v40 = vmul.f32 %v1032_v53, %v6631_v62  ;;  %v977_v4 = vld [vmem:[%s4147_s21] sm:$0x77]  ;;  %v978_v0 = vld [vmem:[%s4147_s21 + $0x8] sm:$0x77]  ;;  %s3225_s21 = sshll.u32 %s4143_s18, 2 }
 0x329   : > { %2765 = vmatprep.subr.bf16.mxu1 %v2670_v47  ;;  %2713 = vmatpush1.bf16.msra.mxu0 %v2667_v37  ;;  %v2661_v48 = vpack.c.bf16 %v2633_v43, %v2629_v41  ;;  %v985_v59 = vunpack.c.0.s8 %v984_v46  ;;  %v1050_v44 = vmul.f32 %v1034_v61, %v6632_v31  ;;  %v6633_v37 = vld [vmem:[#allocation35_spill] sm:$0xff]  ;;  %v1049_v2 = vmul.f32 %v1033_v29, %v6634_v39  ;;  %v6637_v7 = vld [vmem:[#allocation38_spill] sm:$0xff]  ;;  %v6639_v46 = vld [vmem:[#allocation36_spill] sm:$0xff]  ;;  %s620_s1 = scalar_lea.vmem [#allocation15], %s3225_s21 }
 0x32a   : > { %2766 = vmatpush1.bf16.msra.mxu1 %v2669_v51  ;;  %2714 = vmatprep.subr.bf16.mxu0 %v2664_v19  ;;  %v986_v19 = vlaneseq  ;;  %v1045_v60 = vmul.f32 %v1029_v22, %v6633_v37  ;;  %v1047_v23 = vmul.f32 %v1031_v63, %v6635_v3  ;;  %v1051_v32 = vmul.f32 %v1035_v25, %v6636_v50  ;;  %v1037_v51 = vld [vmem:[%s4158_s13 + $0x48] sm:$0xff]  ;;  %v6638_v57 = vld [vmem:[#allocation39_spill] sm:$0xff]  ;;  %v6640_v53 = vld [vmem:[#allocation33_spill] sm:$0xff]  ;;  %s3002_s20 = sshll.u32 %s620_s1, 4  ;;  %s3003_s20 = int_to_ptr.vmem [resolvable:$true] %s3002_s20 }
 0x32b   : > { %2767 = vmatprep.subr.bf16.mxu1 %v2666_v38  ;;  %v1052_v38 = vmul.f32 %v1036_v8, %v6637_v7  ;;  %v1054_v15 = vmul.f32 %v1038_v33, %v6638_v57  ;;  %v1055_v61 = vmul.f32 %v1039_v26, %v6640_v53  ;;  %v1041_v22 = vld [vmem:[%s4158_s13 + $0x68] sm:$0xff]  ;;  %v6641_v29 = vld [vmem:[#allocation26_spill] sm:$0xff]  ;;  %v6642_v63 = vld [vmem:[#allocation31_spill] sm:$0xff]  ;;  %s3712_s12 = scalar_lea.vmem %s3003_s20, 64 }
 0x32c   : > { %v6119_v45 = vshrl.u32 %v986_v19, 7  ;;  %v6643_v31 = vld [vmem:[#allocation29_spill] sm:$0xff]  ;;  %vm2984_vm3 = vcmp.lt.s32.totalorder %v986_v19, 512  ;;  %p3713_p12 = scmp.ne.s32.totalorder %s3003_s20, %s3712_s12 }
 0x32d   : > { %2715 = vmatpush1.bf16.msra.mxu0 %v6067_v24  ;;  %v6628_v24 = vmov 0   ;;  %v6644_v39 = vld [vmem:[#allocation41_spill] sm:$0xff] }
 0x32e   : > { %2768 = vmatpush1.bf16.msra.mxu1 %v2665_v34  ;;  %2716 = vmatprep.subr.bf16.mxu0 %v6034_v6  ;;  %v3436_v6 = vld [vmem:[#allocation14 + $0x8] sm:$0xff]   ;;  %v988_v20 = vsub.s32 %v985_v59, %v6119_v45  ;;  %v1053_v59 = vmul.f32 %v1037_v51, %v6639_v46  ;;  %p3714_p6 = pnand %p3713_p12, %p6645_p4 }
 0x32f   : > { %2769 = vmatprep.subr.bf16.mxu1 %v2662_v5 }
 0x330   : > { %p3715_p8 = pneg %p3714_p6 }
 0x331   : > { %2717 = vmatpush1.bf16.msra.mxu0 %v6029_v58 }
 0x332   : > { %2770 = vmatpush1.bf16.msra.mxu1 %v2661_v48  ;;  %2718 = vmatprep.subr.bf16.mxu0 %v6020_v55  ;;  %v6102_v55 = vpop.permute.xlu1 %2676  ;;  %v1040_v48 = vld [vmem:[%s4158_s13 + $0x60] sm:$0xff] }
 0x333   : > { %2771 = vmatprep.subr.bf16.mxu1 %v6022_v16 }
 0x335   : > { %2719 = vmatpush1.bf16.msra.mxu0 %v6012_v12 }
 0x336   : > { %2772 = vmatpush1.bf16.msra.mxu1 %v6014_v28  ;;  %v6104_v16 = vpop.permute.xlu1 %2680  ;;  %v6108_v28 = vpop.permute.xlu0 %2672 }
 0x338   : > { %3268 = vmatmul.mubr.msk.bf16.vlgmr.msra.gmra.mxu0 %vm2697_vm1, %v3435_v30 }
 0x339   : > { %3270 = vmatmul.mubr.msk.bf16.vlgmr.msra.gmra.mxu1 %vm2697_vm1, %v3435_v30  ;;  %2746 = vmatprep.mubr.bf16.mxu0 %v6628_v24  ;;  %v1042_v30 = vld [vmem:[%s4158_s13 + $0x70] sm:$0xff] }
 0x33a   : > { %2799 = vmatprep.mubr.bf16.mxu1 %v6628_v24  ;;  %v6106_v12 = vpop.permute.xlu1 %2827  ;;  %v6112_v9 = vpop.permute.xlu0 %2684  ;;  %v1058_v36 = vmul.f32 %v1042_v30, %v6642_v63 }
 0x33e   : > { %v6110_v58 = vpop.permute.xlu1 %2835  ;;  %v6114_v49 = vpop.permute.xlu0 %2831 }
 0x340   : > { %3269 = vmatmul.mubr.msk.bf16.gmra.mxu0 %vm2697_vm1, %v3436_v6 }
 0x341   : > { %3271 = vmatmul.mubr.msk.bf16.gmra.mxu1 %vm2697_vm1, %v3436_v6 }
 0x342   : > { %v1063_v13 = vpop.permute.xlu1 %1062  ;;  %v1068_v56 = vpop.permute.xlu0 %1067 }
 0x343   : > { %v1080_v17 = vmul.f32 %v1063_v13, %v1044_v11  ;;  %v1082_v14 = vmul.f32 %v1063_v13, %v1046_v18  ;;  %v1084_v47 = vmul.f32 %v1068_v56, %v1048_v40  ;;  %v1086_v35 = vmul.f32 %v1068_v56, %v1050_v44  ;;  %v1043_v11 = vld [vmem:[%s4158_s13 + $0x78] sm:$0xff]  ;;  %s3287_s13 = sshll.u32 %s3890_s17, 6  ;;  %s3716_s17 = sshll.u32 %s3813_s30, 4  ;;  %s3717_s17 = int_to_ptr.vmem [resolvable:$false] %s3716_s17 }
 0x344   : > { %v1081_v34 = vmul.f32 %v1063_v13, %v1045_v60  ;;  %v1085_v5 = vmul.f32 %v1068_v56, %v1049_v2  ;;  %v1083_v24 = vmul.f32 %v1063_v13, %v1047_v23  ;;  %v1087_v6 = vmul.f32 %v1068_v56, %v1051_v32  ;;  %s3000_s24 = scalar_lea.hbm %s6272_s10, %s3287_s13  ;;  %s3718_s6 = scalar_lea.vmem %s3717_s17, 128 }
 0x345   : > { %v1096_v21 = vadd.f32 %v1084_v47, %v1080_v17  ;;  %v1114_v42 = vadd.f32 %v1086_v35, %v1082_v14  ;;  %v1057_v44 = vmul.f32 %v1041_v22, %v6643_v31  ;;  %v1059_v2 = vmul.f32 %v1043_v11, %v6644_v39  ;;  %p3719_p11 = scmp.lt.s32.totalorder %s3003_s20, %s3717_s17  ;;  %p3720_p2 = scmp.lt.s32.totalorder %s3718_s6, %s3712_s12 }
 0x346   : > { %v6116_v27 = vpop.permute.xlu1 %2839  ;;  %v1073_v43 = vpop.permute.xlu0 %1072  ;;  %v1105_v18 = vadd.f32 %v1085_v5, %v1081_v34  ;;  %v1123_v56 = vadd.f32 %v1087_v6, %v1083_v24 }
 0x347   : > { %v1090_v52 = vmul.f32 %v1073_v43, %v1054_v15  ;;  %v1089_v40 = vmul.f32 %v1073_v43, %v1053_v59  ;;  %v1091_v60 = vmul.f32 %v1073_v43, %v1055_v61  ;;  %p3721_p0 = por %p3720_p2, %p3719_p11 }
 0x349   : > { %v1115_v33 = vadd.f32 %v1114_v42, %v1090_v52  ;;  %v1106_v32 = vadd.f32 %v1105_v18, %v1089_v40  ;;  %p3722_p10 = pnand %p3721_p0, %p3715_p8 }
 0x34a   : > { %v982_v10 = vpop.permute.xlu1 %981 }
 0x34b   : > { %v989_v1 = vrot.slane %v982_v10, %v988_v20  ;;  %v1088_v20 = vmul.f32 %v1073_v43, %v1052_v38  ;;  %v1056_v10 = vmul.f32 %v1040_v48, %v6641_v29 }
 0x34d   : > { %v991_v41 = vmul.f32 %v989_v1, %v977_v4  ;;  %v992_v54 = vmul.f32 %v989_v1, %v978_v0  ;;  %v1097_v1 = vadd.f32 %v1096_v21, %v1088_v20  ;;  %v1124_v0 = vadd.f32 %v1123_v56, %v1091_v60 }
 0x34e   : > { %v1078_v13 = vpop.permute.xlu1 %1077 }
 0x34f   : > { %v995_v25 = vcombine.high %v991_v41, %v991_v41  ;;  %v996_v62 = vcombine.high %v992_v54, %v992_v54  ;;  %v1000_v8 = vsel %vm999_vm2, %v991_v41, 0.0  ;;  %v1014_v37 = vsel %vm999_vm2, %v992_v54, 0.0 }
 0x350   : > { %v1092_v3 = vmul.f32 %v1078_v13, %v1056_v10  ;;  %v1094_v23 = vmul.f32 %v1078_v13, %v1058_v36  ;;  %v1093_v4 = vmul.f32 %v1078_v13, %v1057_v44  ;;  %v1001_v47 = vrot.slane %v1000_v8, 4 }
 0x351   : > { %v1007_v17 = vsel %vm999_vm2, %v995_v25, 0.0  ;;  %v1021_v50 = vsel %vm999_vm2, %v996_v62, 0.0  ;;  %v1015_v35 = vrot.slane %v1014_v37, 4  ;;  %v1095_v51 = vmul.f32 %v1078_v13, %v1059_v2 }
 0x352   : > { %v1008_v38 = vrot.slane %v1007_v17, 4  ;;  %v1098_v26 = vadd.f32 %v1097_v1, %v1092_v3  ;;  %v1116_v57 = vadd.f32 %v1115_v33, %v1094_v23  ;;  %v1022_v5 = vrot.slane %v1021_v50, 4 }
 0x353   : > { %v6163_v30 = vadd.f32 %v1106_v32, %v1093_v4  ;;  %v6166_v54 = vadd.f32 %v1001_v47, %v1000_v8  ;;  %v6168_v46 = vadd.f32 %v1015_v35, %v1014_v37  ;;  %v6170_v59 = vadd.f32 %v1124_v0, %v1095_v51 }
 0x354   : > { %v6173_v53 = vadd.f32 %v1008_v38, %v1007_v17  ;;  %v1099_v61 = vrot.slane %v1098_v26, 4  ;;  %v1117_v20 = vrot.slane %v1116_v57, 4 }
 0x355   : > { %v1108_v25 = vrot.slane %v6163_v30, 4  ;;  %v1126_v31 = vrot.slane %v6170_v59, 4 }
 0x356   : > { %v6183_v60 = vadd.f32 %v1099_v61, %v1098_v26  ;;  %v6185_v39 = vadd.f32 %v1117_v20, %v1116_v57 }
 0x3f8   : > { %v2738_v14 = vpop.f32.mrf.mxu0 }
 0x3f9   : > { %v2791_v7 = vpop.f32.mrf.mxu1  ;;  %v2739_v43 = vadd.f32 %v2738_v14, %v6108_v28 }
 0x3fa   : > { %v2740_v15 = vpop.f32.mrf.mxu0  ;;  %v2792_v34 = vadd.f32 %v2791_v7, %v6108_v28 }
 0x3fb   : > { %v2793_v41 = vpop.f32.mrf.mxu1  ;;  %v2741_v48 = vadd.f32 %v2740_v15, %v6108_v28  ;;  %v2810_v22 = vmax.f32 %v2739_v43, 0.0 }
 0x3fc   : > { %v2794_v24 = vadd.f32 %v2793_v41, %v6108_v28  ;;  %v2742_v6 = vpop.f32.mrf.mxu0  ;;  %v2812_v52 = vmax.f32 %v2792_v34, 0.0  ;;  %v6176_v28 = vadd.f32 %v1022_v5, %v1021_v50 }
 0x3fd   : > { %v2743_v21 = vadd.f32 %v2742_v6, %v6102_v55  ;;  %v2795_v42 = vpop.f32.mrf.mxu1  ;;  %v2811_v10 = vmax.f32 %v2741_v48, 0.0  ;;  %v2842_v2 = vmul.f32 %v6106_v12, %v2810_v22 }
 0x3fe   : > { %v2796_v11 = vadd.f32 %v2795_v42, %v6102_v55  ;;  %v2744_v29 = vpop.f32.mrf.mxu0  ;;  %v2813_v13 = vmax.f32 %v2794_v24, 0.0  ;;  %v2844_v1 = vmul.f32 %v6106_v12, %v2812_v52 }
 0x3ff   : > { %v2814_v63 = vmax.f32 %v2743_v21, 0.0  ;;  %v2745_v36 = vadd.f32 %v2744_v29, %v6102_v55  ;;  %v2797_v18 = vpop.f32.mrf.mxu1 }
 0x400   : > { %v2816_v56 = vmax.f32 %v2796_v11, 0.0  ;;  %v2798_v62 = vadd.f32 %v2797_v18, %v6102_v55  ;;  %v2748_v40 = vpop.f32.mrf.mxu0  ;;  %v2843_v55 = vmul.f32 %v6106_v12, %v2811_v10  ;;  %v2845_v14 = vmul.f32 %v6106_v12, %v2813_v13 }
 0x401   : > { %v2815_v44 = vmax.f32 %v2745_v36, 0.0  ;;  %v2749_v8 = vadd.f32 %v2748_v40, %v6104_v16  ;;  %v2801_v37 = vpop.f32.mrf.mxu1  ;;  %v2846_v4 = vmul.f32 %v6114_v49, %v2814_v63 }
 0x402   : > { %v2817_v33 = vmax.f32 %v2798_v62, 0.0  ;;  %v2802_v3 = vadd.f32 %v2801_v37, %v6104_v16  ;;  %v2750_v23 = vpop.f32.mrf.mxu0  ;;  %v2848_v0 = vmul.f32 %v6114_v49, %v2816_v56 }
 0x403   : > { %v2818_v17 = vmax.f32 %v2749_v8, 0.0  ;;  %v2751_v50 = vadd.f32 %v2750_v23, %v6104_v16  ;;  %v2803_v32 = vpop.f32.mrf.mxu1  ;;  %v2847_v26 = vmul.f32 %v6114_v49, %v2815_v44  ;;  %v2858_v48 = vadd.f32 %v2846_v4, %v2842_v2 }
 0x404   : > { %v2820_v47 = vmax.f32 %v2802_v3, 0.0  ;;  %v2804_v35 = vadd.f32 %v2803_v32, %v6104_v16  ;;  %v2752_v51 = vpop.f32.mrf.mxu0  ;;  %v2849_v5 = vmul.f32 %v6114_v49, %v2817_v33  ;;  %v2876_v61 = vadd.f32 %v2848_v0, %v2844_v1 }
 0x405   : > { %v2850_v7 = vmul.f32 %v6110_v58, %v2818_v17  ;;  %v2819_v38 = vmax.f32 %v2751_v50, 0.0  ;;  %v2753_v57 = vadd.f32 %v2752_v51, %v6112_v9  ;;  %v2805_v15 = vpop.f32.mrf.mxu1  ;;  %v2867_v52 = vadd.f32 %v2847_v26, %v2843_v55 }
 0x406   : > { %v2852_v43 = vmul.f32 %v6110_v58, %v2820_v47  ;;  %v2821_v34 = vmax.f32 %v2804_v35, 0.0  ;;  %v2806_v12 = vadd.f32 %v2805_v15, %v6112_v9  ;;  %v2754_v41 = vpop.f32.mrf.mxu0  ;;  %v2885_v10 = vadd.f32 %v2849_v5, %v2845_v14 }
 0x407   : > { %v2851_v16 = vmul.f32 %v6110_v58, %v2819_v38  ;;  %v2822_v24 = vmax.f32 %v2753_v57, 0.0  ;;  %v2755_v6 = vadd.f32 %v2754_v41, %v6112_v9  ;;  %v2807_v21 = vpop.f32.mrf.mxu1  ;;  %v2859_v49 = vadd.f32 %v2858_v48, %v2850_v7 }
 0x408   : > { %v2853_v42 = vmul.f32 %v6110_v58, %v2821_v34  ;;  %v2824_v20 = vmax.f32 %v2806_v12, 0.0  ;;  %v2808_v22 = vadd.f32 %v2807_v21, %v6112_v9  ;;  %v2877_v36 = vadd.f32 %v2876_v61, %v2852_v43 }
 0x409   : > { %v2854_v11 = vmul.f32 %v6116_v27, %v2822_v24  ;;  %v2823_v29 = vmax.f32 %v2755_v6, 0.0  ;;  %v2868_v62 = vadd.f32 %v2867_v52, %v2851_v16  ;;  %v1109_v58 = vadd.f32 %v1108_v25, %v6163_v30 }
 0x40a   : > { %v2856_v63 = vmul.f32 %v6116_v27, %v2824_v20  ;;  %v2825_v18 = vmax.f32 %v2808_v22, 0.0  ;;  %v2886_v9 = vadd.f32 %v2885_v10, %v2853_v42  ;;  %v1127_v8 = vadd.f32 %v1126_v31, %v6170_v59 }
 0x40b   : > { %v2860_v13 = vadd.f32 %v2859_v49, %v2854_v11  ;;  %v2855_v56 = vmul.f32 %v6116_v27, %v2823_v29  ;;  %v1003_v1 = vrot.slane %v6166_v54, 2  ;;  %v1101_v33 = vrot.slane %v6183_v60, 2 }
 0x40c   : > { %v2878_v40 = vadd.f32 %v2877_v36, %v2856_v63  ;;  %v2857_v44 = vmul.f32 %v6116_v27, %v2825_v18  ;;  %v1017_v55 = vrot.slane %v6168_v46, 2  ;;  %v1119_v17 = vrot.slane %v6185_v39, 2 }
 0x40d   : > { %v2861_v37 = vrot.slane %v2860_v13, 4  ;;  %v2869_v2 = vadd.f32 %v2868_v62, %v2855_v56  ;;  %v1010_v25 = vrot.slane %v6173_v53, 2  ;;  %v1110_v27 = vrot.slane %v1109_v58, 2  ;;  %v2910_v56 = vpop.permute.xlu1 %2909 }
 0x40e   : > { %v2879_v3 = vrot.slane %v2878_v40, 4  ;;  %v2887_v23 = vadd.f32 %v2886_v9, %v2857_v44  ;;  %v1024_v59 = vrot.slane %v6176_v28, 2  ;;  %v1128_v31 = vrot.slane %v1127_v8, 2 }
 0x40f   : > { %v2862_v50 = vadd.f32 %v2861_v37, %v2860_v13  ;;  %v2870_v30 = vrot.slane %v2869_v2, 4  ;;  %v1004_v35 = vadd.f32 %v1003_v1, %v6166_v54  ;;  %v1102_v0 = vadd.f32 %v1101_v33, %v6183_v60 }
 0x410   : > { %v2880_v32 = vadd.f32 %v2879_v3, %v2878_v40  ;;  %v2888_v4 = vrot.slane %v2887_v23, 4  ;;  %v1018_v38 = vadd.f32 %v1017_v55, %v6168_v46  ;;  %v1120_v26 = vadd.f32 %v1119_v17, %v6185_v39  ;;  %v2897_v46 = vpop.permute.xlu0 %2896 }
 0x411   : > { %v2863_v14 = vrot.slane %v2862_v50, 2  ;;  %v2871_v47 = vadd.f32 %v2870_v30, %v2869_v2  ;;  %v1011_v15 = vadd.f32 %v1010_v25, %v6173_v53  ;;  %v1111_v34 = vadd.f32 %v1110_v27, %v1109_v58 }
 0x412   : > { %v2881_v51 = vrot.slane %v2880_v32, 2  ;;  %v2889_v7 = vadd.f32 %v2888_v4, %v2887_v23  ;;  %v1025_v12 = vadd.f32 %v1024_v59, %v6176_v28  ;;  %v1129_v16 = vadd.f32 %v1128_v31, %v1127_v8  ;;  %v2923_v59 = vpop.permute.xlu1 %2922 }
 0x413   : > { %v2872_v57 = vrot.slane %v2871_v47, 2  ;;  %v2864_v43 = vadd.f32 %v2863_v14, %v2862_v50  ;;  %v1005_v48 = vrot.slane %v1004_v35, 1  ;;  %v1103_v60 = vrot.slane %v1102_v0, 1 }
 0x414   : > { %v2890_v5 = vrot.slane %v2889_v7, 2  ;;  %v2882_v41 = vadd.f32 %v2881_v51, %v2880_v32  ;;  %v1019_v6 = vrot.slane %v1018_v38, 1  ;;  %v1121_v61 = vrot.slane %v1120_v26, 1 }
 0x415   : > { %v2865_v54 = vrot.slane %v2864_v43, 1  ;;  %v2873_v24 = vadd.f32 %v2872_v57, %v2871_v47  ;;  %v1012_v22 = vrot.slane %v1011_v15, 1  ;;  %v1112_v53 = vrot.slane %v1111_v34, 1 }
 0x416   : > { %v2883_v21 = vrot.slane %v2882_v41, 1  ;;  %v2891_v42 = vadd.f32 %v2890_v5, %v2889_v7  ;;  %v1026_v49 = vrot.slane %v1025_v12, 1  ;;  %v1130_v29 = vrot.slane %v1129_v16, 1 }
 0x417   : > { %v2866_v39 = vadd.f32 %v2865_v54, %v2864_v43  ;;  %v2874_v20 = vrot.slane %v2873_v24, 1  ;;  %v1006_v63 = vadd.f32 %v1005_v48, %v1004_v35  ;;  %v1104_v36 = vadd.f32 %v1103_v60, %v1102_v0 }
 0x418   : > { %v2884_v52 = vadd.f32 %v2883_v21, %v2882_v41  ;;  %v2892_v11 = vrot.slane %v2891_v42, 1  ;;  %v1020_v62 = vadd.f32 %v1019_v6, %v1018_v38  ;;  %v1122_v58 = vadd.f32 %v1121_v61, %v1120_v26 }
 0x419   : > { %v2875_v28 = vadd.f32 %v2874_v20, %v2873_v24  ;;  %v2899_v10 = vadd.f32 %v2897_v46, %v2866_v39  ;;  %v1013_v9 = vadd.f32 %v1012_v22, %v1011_v15  ;;  %v1113_v8 = vadd.f32 %v1112_v53, %v1111_v34 }
 0x41a   : > { %v2893_v18 = vadd.f32 %v2892_v11, %v2891_v42  ;;  %v2901_v13 = vadd.f32 %v2897_v46, %v2884_v52  ;;  %v1027_v1 = vadd.f32 %v1026_v49, %v1025_v12  ;;  %v1131_v33 = vadd.f32 %v1130_v29, %v1129_v16 }
 0x41b   : > { %v2900_v40 = vadd.f32 %v2897_v46, %v2875_v28  ;;  %v2903_v44 = vmax.f32 %v2899_v10, 0.0  ;;  %v1132_v55 = vadd.f32 %v1104_v36, %v1006_v63  ;;  %v1134_v30 = vadd.f32 %v1122_v58, %v1020_v62 }
 0x41c   : > { %v2902_v37 = vadd.f32 %v2897_v46, %v2893_v18  ;;  %v2905_v2 = vmax.f32 %v2901_v13, 0.0  ;;  %v1133_v27 = vadd.f32 %v1113_v8, %v1013_v9  ;;  %v1135_v31 = vadd.f32 %v1131_v33, %v1027_v1 }
 0x41d   : > { %v2904_v3 = vmax.f32 %v2900_v40, 0.0  ;;  %v2912_v23 = vmul.f32 %v2910_v56, %v2903_v44  ;;  %v3812_v60 = vmov 1966171168  }
 0x41e   : > { %v2906_v17 = vmax.f32 %v2902_v37, 0.0  ;;  %v2914_v50 = vmul.f32 %v2910_v56, %v2905_v2  ;;  %v2960_v6 = vunpack.c.l.s4 %v3812_v60 }
 0x41f   : > { %v2913_v25 = vmul.f32 %v2910_v56, %v2904_v3  ;;  %v2916_v32 = vadd.f32 %v2912_v23, %v1132_v55 }
 0x420   : > { %v2915_v4 = vmul.f32 %v2910_v56, %v2906_v17  ;;  %v2918_v14 = vadd.f32 %v2914_v50, %v1134_v30  ;;  %v2961_v21 = vunpack.c.0.s8 %v2960_v6 }
 0x421   : > { %v2917_v47 = vadd.f32 %v2913_v25, %v1133_v27  ;;  %v2925_v35 = vadd.f32 %v2923_v59, %v2916_v32 }
 0x422   : > { %v2919_v0 = vadd.f32 %v2915_v4, %v1135_v31  ;;  %v2927_v51 = vadd.f32 %v2923_v59, %v2918_v14  ;;  %v2964_v61 = vsub.s32 %v2961_v21, %v6119_v45 }
 0x423   : > { %v2926_v7 = vadd.f32 %v2923_v59, %v2917_v47  ;;  %v3272_v38 = vmul.f32 -1.442695, %v2925_v35 }
 0x424   : > { %v2928_v26 = vadd.f32 %v2923_v59, %v2919_v0  ;;  %v3274_v57 = vmul.f32 -1.442695, %v2927_v51 }
 0x425   : > { %3501 = vpow2.f32 %v3272_v38  ;;  %v3273_v15 = vmul.f32 -1.442695, %v2926_v7 }
 0x426   : > { %3503 = vpow2.f32 %v3274_v57  ;;  %v3275_v43 = vmul.f32 -1.442695, %v2928_v26 }
 0x427   : > { %3505 = vpow2.f32 %v3273_v15 }
 0x428   : > { %3507 = vpow2.f32 %v3275_v43 }
 0x432   : > { %v3502_v34 = vpop.eup %3501 }
 0x433   : > { %v3504_v5 = vpop.eup %3503  ;;  %v2941_v12 = vadd.f32 1.0, %v3502_v34 }
 0x434   : > { %v3506_v41 = vpop.eup %3505  ;;  %v2943_v16 = vadd.f32 1.0, %v3504_v5 }
 0x435   : > { %v3508_v48 = vpop.eup %3507  ;;  %v2942_v54 = vadd.f32 1.0, %v3506_v41  ;;  %3509 = vrcp.f32 %v2941_v12 }
 0x436   : > { %v2944_v24 = vadd.f32 1.0, %v3508_v48  ;;  %3511 = vrcp.f32 %v2943_v16 }
 0x437   : > { %3513 = vrcp.f32 %v2942_v54 }
 0x438   : > { %3515 = vrcp.f32 %v2944_v24 }
 0x442   : > { %v3510_v42 = vpop.eup %3509 }
 0x443   : > { %v3512_v46 = vpop.eup %3511 }
 0x444   : > { %v3514_v39 = vpop.eup %3513 }
 0x445   : > { %v3516_v20 = vpop.eup %3515  ;;  %v2957_v22 = vcombine.low %v3510_v42, %v3514_v39 }
 0x446   : > { %v2958_v53 = vcombine.low %v3512_v46, %v3516_v20 }
 0x447   : > { %v2965_v52 = vrot.slane %v2957_v22, %v2964_v61 }
 0x448   : > { %v2972_v11 = vrot.slane %v2958_v53, %v2964_v61 }
 0x44a   : > { %v2973_v49 = vcombine.low %v2965_v52, %v2972_v11 }
 0x44c   : > { %v2980_v29 = vrot.slane %v2973_v49, %v2964_v61 }
 0x44e   : > { %2986 = vst.msk [vmem:[%s620_s1] sm:$0xf] %vm2984_vm3, %v2980_v29 }
 0x44f   : > { %3725 = shalt.err (!%p3722_p10)
}
 0x450   : > { %s3726_s19 = scalar_lea.hbm %s3000_s24, 64  ;;  %s3730_s22 = scalar_lea.hbm %s6272_s10, 128 }
 0x451   : > { %p3727_p1 = scmp.ne.s32.totalorder %s3000_s24, %s3726_s19  ;;  %p3731_p9 = scmp.lt.s32.totalorder %s3000_s24, %s6272_s10 }
 0x452   : > { %p3732_p5 = scmp.lt.s32.totalorder %s3730_s22, %s3726_s19 }
 0x453   : > { %p3728_p3 = pnand %p3727_p1, %p6645_p4 }
 0x454   : > { %p3733_p13 = por %p3732_p5, %p3731_p9 }
 0x455   : > { %p3729_p7 = pneg %p3728_p3 }
 0x457   : > { %p3734_p12 = pnand %p3733_p13, %p3729_p7 }
 0x459   : > { %3737 = shalt.err (!%p3734_p12)
}
 0x45a   : > { %3308 = dma.vmem_to_hbm [thread:$0]  (%p6645_p4), %s3003_s20, 64, %s3000_s24, %s2988_s26  }
 0x45b PF: > { %s6646_s27 = sld [smem:[#allocation21_spill]]  ;;  %p6649_p8 = scmp.ge.s32.totalorder %s3788_s16, 2 }
 0x45c   : > { %s6647_s15 = sld [smem:[#allocation25_spill]] }
 0x461   : > { %s3014_s0 = sand.u32 1, %s6646_s27  }
 0x462   : > { %p6648_p6 = scmp.ne.s32.totalorder %s6647_s15, 0  ;;  %s3015_s8 = scalar_lea.sflag [#allocation4], %s3014_s0 }
 0x464   : > { %p3318_p11 = pnand %p6649_p8, %p6648_p6 }
 0x466   : > { %p3319_p2 = pneg %p3318_p11 }
 0x468   : > { %3771 = dma.done.wait (%p3319_p2), %s3015_s8, 64  }
 0x469   : > { %3773 = vsyncadd (%p3319_p2), %s3015_s8, 4294967232  ;;  %s6650_s16 = sld [smem:[#allocation23_spill]]  ;;  %s6653_s13 = smov %s3780_s14 }
 0x46a   : > { %s6651_s21 = sld [smem:[#allocation22_spill]] }
 0x46b   : > { %s6652_s15 = sld [smem:[#allocation24_spill]] }
 0x46f   : > { %p30_p0 = scmp.ge.s32.totalorder %s6650_s16, 4  }
 0x470   : > { %s6654_s14 = smov %s6651_s21 }
 0x471   :  { %32 = sbr.rel (!%p30_p0) target bundleno = 16 (0x10), region = 192 }
 0x476   :  { %3020 = vsyncpa [#allocation3], 1 }
 0x477   :  { %3022 = vsyncpa [#allocation3 + $0x1], 1 }
 0x478   :  { %3023 = vsyncpa [#allocation7], 1 }
 0x479   :  { %3025 = vsyncpa [#allocation7 + $0x1], 1 }
 0x47a   :  { %3026 = vsyncpa [#allocation10], 1 }
 0x47b   :  { %3028 = vsyncpa [#allocation10 + $0x1], 1 }
 0x47c   :  { %3029 = vsyncpa [#allocation13], 1 }
 0x47d   :  { %3030 = vsyncpa [#allocation4], 1 }
 0x47e   :  { %3032 = vsyncpa [#allocation4 + $0x1], 1 }

</bundles_post_ra>
